<compile_context>
chip_gen: v7x
topology: tpu7x:2x2x1
jax: 0.10.0
libtpu: 0.0.40
codegen_flags: <defaults>
</compile_context>

<pallas_src>
import functools

import jax
import jax.numpy as jnp
import numpy as np
from jax.experimental import pallas as pl
from jax.experimental.pallas import tpu as pltpu

_LANE = 128


def _round_up(v, m):
    return ((v + m - 1) // m) * m


# ----------------------------------------------------------------------------
# Fused kernel: conv1(+folded BN2) + ReLU + conv2(stride) + bias + shortcut
# ----------------------------------------------------------------------------
def _wide_basic_fused_kernel(a1p_ref, w1_ref, t2f_ref, w2_ref, bo_ref, *rest,
                             stride, has_proj):
    """One image per grid step.

    a1p_ref : (H+2, W+2, Cin_p)  relu(bn1(x)), pre-padded, compute dtype
    w1_ref  : (3, 3, Cin_p, Cp)  conv1 weights with BN2 scale folded in (HWIO)
    t2f_ref : (1, Cp) f32        BN2 shift with conv1 bias folded in
    w2_ref  : (3, 3, Cp, Cp)     conv2 weights
    bo_ref  : (1, Cp) f32        conv2 bias (+ shortcut bias if projection)
    rest (has_proj=True ): xs_ref (H2,W2,Cin_p), ws_ref (Cin_p,Cp)
    rest (has_proj=False): xid_ref (H2, W2, Cp)  (identity shortcut, compute dt)
    then: o_ref (H2, W2, Cp) f32, pad2 scratch, acc1 scratch, acc2 scratch.
    """
    if has_proj:
        xs_ref, ws_ref, o_ref, pad2_ref, acc1_ref, acc2_ref = rest
    else:
        xid_ref, o_ref, pad2_ref, acc1_ref, acc2_ref = rest

    H = a1p_ref.shape[0] - 2
    W = a1p_ref.shape[1] - 2
    Cin_p = a1p_ref.shape[2]
    Cp = w1_ref.shape[3]
    H2, W2 = o_ref.shape[0], o_ref.shape[1]

    # ---- Stage 1: 3x3 conv1 as 9 shifted (H*W, Cin_p) @ (Cin_p, Cp) MXU taps,
    # accumulated into an f32 VMEM scratch (first tap initializes, no memset).
    # BN2's per-channel scale is already folded into w1 host-side.
    # TODO(synk): the kw-shifted tap slices still relayout by 1-2 sublanes;
    # pltpu.roll could remove that, left out to keep lowering simple.
    for kh in range(3):
        for kw in range(3):
            tap = a1p_ref[kh:kh + H, kw:kw + W, :].reshape(H * W, Cin_p)
            part = jnp.dot(tap, w1_ref[kh, kw],
                           preferred_element_type=jnp.float32)
            if kh == 0 and kw == 0:
                acc1_ref[...] = part
            else:
                acc1_ref[...] += part

    # conv1 bias + BN2(eval) folded into t2f; ReLU.  Dropout: identity (eval).
    a2 = jnp.maximum(acc1_ref[...] + t2f_ref[...], 0.0)

    # Zero only the 1-pixel halo of the conv2 input scratch (interior is fully
    # overwritten every step).  Done every step for core-parallel safety.
    zrow = jnp.zeros((1, W + 2, Cp), pad2_ref.dtype)
    zcol = jnp.zeros((H + 2, 1, Cp), pad2_ref.dtype)
    pad2_ref[0:1, :, :] = zrow
    pad2_ref[H + 1:H + 2, :, :] = zrow
    pad2_ref[:, 0:1, :] = zcol
    pad2_ref[:, W + 1:W + 2, :] = zcol
    pad2_ref[1:H + 1, 1:W + 1, :] = a2.reshape(H, W, Cp).astype(pad2_ref.dtype)

    # ---- Stage 2: 3x3 conv2 (stride) as 9 MXU taps, f32 VMEM accumulation.
    for kh in range(3):
        for kw in range(3):
            if stride == 1:
                tap = pad2_ref[kh:kh + H2, kw:kw + W2, :]
            else:
                # TODO(synk): strided sublane reads, untested at runtime here;
                # for production stride-2 blocks compact the spatial phases
                # once instead of 9 strided taps.
                tap = pad2_ref[pl.ds(kh, H2, stride=stride),
                               pl.ds(kw, W2, stride=stride), :]
            part = jnp.dot(tap.reshape(H2 * W2, Cp), w2_ref[kh, kw],
                           preferred_element_type=jnp.float32)
            if kh == 0 and kw == 0:
                acc2_ref[...] = part
            else:
                acc2_ref[...] += part

    out = acc2_ref[...] + bo_ref[...]          # conv2 bias (+ shortcut bias)

    # ---- Shortcut.
    if has_proj:
        # 1x1 projection; stride already applied host-side => dense matmul
        # with lane-dense K = Cin_p.
        xs = xs_ref[...].reshape(H2 * W2, xs_ref.shape[2])
        out = out + jnp.dot(xs, ws_ref[...],
                            preferred_element_type=jnp.float32)
    else:
        # Identity shortcut (empty nn.Sequential): plain add in f32.
        out = out + xid_ref[...].reshape(H2 * W2, Cp).astype(jnp.float32)

    o_ref[...] = out.reshape(H2, W2, Cp).astype(o_ref.dtype)


# ----------------------------------------------------------------------------
# Parameter setup + forward wrapper (plain-JAX glue)
# ----------------------------------------------------------------------------
def init_params(key, in_planes, planes, stride):
    ks = list(jax.random.split(key, 16))

    def nrm(k, shape, s=0.1):
        return s * jax.random.normal(k, shape, jnp.float32)

    p = {
        "bn1_gamma": 1.0 + nrm(ks[0], (in_planes,)),
        "bn1_beta":  nrm(ks[1], (in_planes,)),
        "bn1_mean":  nrm(ks[2], (in_planes,)),
        "bn1_var":   1.0 + 0.1 * jax.random.uniform(ks[3], (in_planes,), jnp.float32),
        "conv1_w":   nrm(ks[4], (planes, in_planes, 3, 3), 0.2),   # OIHW
        "conv1_b":   nrm(ks[5], (planes,)),
        "bn2_gamma": 1.0 + nrm(ks[6], (planes,)),
        "bn2_beta":  nrm(ks[7], (planes,)),
        "bn2_mean":  nrm(ks[8], (planes,)),
        "bn2_var":   1.0 + 0.1 * jax.random.uniform(ks[9], (planes,), jnp.float32),
        "conv2_w":   nrm(ks[10], (planes, planes, 3, 3), 0.2),     # OIHW
        "conv2_b":   nrm(ks[11], (planes,)),
    }
    if stride != 1 or in_planes != planes:
        p["sc_w"] = nrm(ks[12], (planes, in_planes, 1, 1), 0.2)    # OIHW, 1x1
        p["sc_b"] = nrm(ks[13], (planes,))
    return p


def wide_basic_forward(x_nchw, params, stride, eps=1e-5,
                       compute_dtype=jnp.bfloat16):
    """Eval-mode wide_basic forward.  NCHW in / NCHW out (PyTorch layout)."""
    # NCHW -> NHWC so channels land on the 128-lane axis.
    x = jnp.transpose(x_nchw, (0, 2, 3, 1)).astype(jnp.float32)
    N, H, W, Cin = x.shape
    planes = params["conv1_w"].shape[0]
    Cin_p = _round_up(Cin, _LANE)      # lane-dense channel padding
    Cp = _round_up(planes, _LANE)
    H2 = (H - 1) // stride + 1
    W2 = (W - 1) // stride + 1
    has_proj = "sc_w" in params        # == (stride != 1 or in_planes != planes)

    def fold_bn(g, b, m, v):
        scale = g / jnp.sqrt(v + eps)
        return scale, b - m * scale

    s1, t1 = fold_bn(params["bn1_gamma"], params["bn1_beta"],
                     params["bn1_mean"], params["bn1_var"])
    s2, t2 = fold_bn(params["bn2_gamma"], params["bn2_beta"],
                     params["bn2_mean"], params["bn2_var"])

    def pad_vec(v, c):
        return jnp.pad(v, (0, c - v.shape[0])).reshape(1, c).astype(jnp.float32)

    # BN1 + ReLU fused into the layout pass (transpose / pad / cast) the
    # wrapper has to do anyway; the result is spatially pre-padded so the
    # kernel needs no memset or offset interior store for stage 1.
    a1 = jnp.maximum(x * s1 + t1, 0.0)
    a1p = jnp.pad(a1, ((0, 0), (1, 1), (1, 1), (0, Cin_p - Cin))
                  ).astype(compute_dtype)

    # conv1 weights with BN2 scale folded into the output channels; conv1 bias
    # folded into the BN2 shift:  bn2(conv1(a)+b1) = (s2*W1)*a + (s2*b1 + t2).
    w1 = jnp.transpose(params["conv1_w"], (2, 3, 1, 0)) * s2[None, None, None, :]
    w1 = jnp.pad(w1, ((0, 0), (0, 0), (0, Cin_p - Cin), (0, Cp - planes))
                 ).astype(compute_dtype)
    t2f = pad_vec(s2 * params["conv1_b"] + t2, Cp)

    w2 = jnp.transpose(params["conv2_w"], (2, 3, 1, 0))            # (3,3,planes,planes)
    w2 = jnp.pad(w2, ((0, 0), (0, 0), (0, Cp - planes), (0, Cp - planes))
                 ).astype(compute_dtype)
    b_out = params["conv2_b"] + (params["sc_b"] if has_proj else 0.0)
    b_out = pad_vec(b_out, Cp)

    args = [a1p, w1, t2f, w2, b_out]
    in_specs = [
        pl.BlockSpec((None, H + 2, W + 2, Cin_p), lambda n: (n, 0, 0, 0)),
        pl.BlockSpec((3, 3, Cin_p, Cp), lambda n: (0, 0, 0, 0)),
        pl.BlockSpec((1, Cp), lambda n: (0, 0)),
        pl.BlockSpec((3, 3, Cp, Cp), lambda n: (0, 0, 0, 0)),
        pl.BlockSpec((1, Cp), lambda n: (0, 0)),
    ]
    if has_proj:
        ws = params["sc_w"][:, :, 0, 0].T                          # (Cin, planes)
        ws = jnp.pad(ws, ((0, Cin_p - Cin), (0, Cp - planes))).astype(compute_dtype)
        xs = x[:, ::stride, ::stride, :]                           # stride host-side
        xs = jnp.pad(xs, ((0, 0), (0, 0), (0, 0), (0, Cin_p - Cin))
                     ).astype(compute_dtype)
        args += [xs, ws]
        in_specs += [
            pl.BlockSpec((None, H2, W2, Cin_p), lambda n: (n, 0, 0, 0)),
            pl.BlockSpec((Cin_p, Cp), lambda n: (0, 0)),
        ]
    else:
        # Identity shortcut (stride == 1, Cin == planes): residual in compute
        # dtype (halves HBM read on the bf16 path); the add stays f32.
        xid = jnp.pad(x, ((0, 0), (0, 0), (0, 0), (0, Cp - Cin))
                      ).astype(compute_dtype)
        args += [xid]
        in_specs += [pl.BlockSpec((None, H2, W2, Cp), lambda n: (n, 0, 0, 0))]

    kernel = functools.partial(_wide_basic_fused_kernel,
                               stride=stride, has_proj=has_proj)
    out_p = pl.pallas_call(
        kernel,
        out_shape=jax.ShapeDtypeStruct((N, H2, W2, Cp), jnp.float32),
        grid=(N,),
        in_specs=in_specs,
        out_specs=pl.BlockSpec((None, H2, W2, Cp), lambda n: (n, 0, 0, 0)),
        scratch_shapes=[
            pltpu.VMEM((H + 2, W + 2, Cp), compute_dtype),   # padded conv2 input
            pltpu.VMEM((H * W, Cp), jnp.float32),            # conv1 accumulator
            pltpu.VMEM((H2 * W2, Cp), jnp.float32),          # conv2 accumulator
        ],
        compiler_params=pltpu.CompilerParams(
            dimension_semantics=("parallel",)),
    )(*args)

    # Drop channel padding, back to NCHW.
    return jnp.transpose(out_p[..., :planes], (0, 3, 1, 2))


# ----------------------------------------------------------------------------
# Pure-JAX f32 reference (independent correctness check)
# ----------------------------------------------------------------------------
def ref_forward(x, p, stride, eps=1e-5):
    def bn(y, g, b, m, v):
        return ((y - m[None, :, None, None]) /
                jnp.sqrt(v[None, :, None, None] + eps) *
                g[None, :, None, None] + b[None, :, None, None])

    dn = ("NCHW", "OIHW", "NCHW")
    a = jax.nn.relu(bn(x, p["bn1_gamma"], p["bn1_beta"], p["bn1_mean"], p["bn1_var"]))
    u = jax.lax.conv_general_dilated(a, p["conv1_w"], (1, 1), [(1, 1), (1, 1)],
                                     dimension_numbers=dn)
    u = u + p["conv1_b"][None, :, None, None]
    a2 = jax.nn.relu(bn(u, p["bn2_gamma"], p["bn2_beta"], p["bn2_mean"], p["bn2_var"]))
    o = jax.lax.conv_general_dilated(a2, p["conv2_w"], (stride, stride),
                                     [(1, 1), (1, 1)], dimension_numbers=dn)
    o = o + p["conv2_b"][None, :, None, None]
    if "sc_w" in p:
        sc = jax.lax.conv_general_dilated(x, p["sc_w"], (stride, stride),
                                          [(0, 0), (0, 0)], dimension_numbers=dn)
        sc = sc + p["sc_b"][None, :, None, None]
    else:
        sc = x
    return o + sc


if __name__ == "__main__":
    key = jax.random.PRNGKey(0)
    N, H, W = 2, 16, 16
    dropout_rate = 0.1   # nn.Dropout is identity in eval mode (see TODO above)
    configs = [
        (4, 8, 1),   # projection shortcut (in_planes != planes)
        (8, 8, 1),   # identity shortcut  (stride == 1, in_planes == planes)
    ]
    for in_planes, planes, stride in configs:
        key, kp, kx = jax.random.split(key, 3)
        params = init_params(kp, in_planes, planes, stride)
        x = jax.random.normal(kx, (N, in_planes, H, W), jnp.float32)  # NCHW
        ref = np.asarray(ref_forward(x, params, stride))

        # Exact-semantics check: f32 matmul path vs pure-JAX f32 reference.
        out_f32 = jax.block_until_ready(
            wide_basic_forward(x, params, stride, compute_dtype=jnp.float32))
        np.testing.assert_allclose(np.asarray(out_f32), ref,
                                   rtol=1e-4, atol=1e-4)

        # Performance path: bf16 matmul inputs / f32 accumulation.  Two chained
        # 3x3 convs with bf16 inputs give ~1e-2 absolute deviation vs f32.
        out_bf16 = jax.block_until_ready(
            wide_basic_forward(x, params, stride, compute_dtype=jnp.bfloat16))
        np.testing.assert_allclose(np.asarray(out_bf16), ref,
                                   rtol=5e-2, atol=5e-2)

    print("KERNEL_OK")
</pallas_src>

<mosaic_0001>
module attributes {stable_mosaic.version = 11 : i64} {
  func.func @_wide_basic_fused_kernel(%arg0: i32, %arg1: memref<1x18x18x128xf32, #tpu.memory_space<vmem>>, %arg2: memref<3x3x128x128xf32, #tpu.memory_space<vmem>>, %arg3: memref<1x128xf32, #tpu.memory_space<vmem>>, %arg4: memref<3x3x128x128xf32, #tpu.memory_space<vmem>>, %arg5: memref<1x128xf32, #tpu.memory_space<vmem>>, %arg6: memref<1x16x16x128xf32, #tpu.memory_space<vmem>>, %arg7: memref<128x128xf32, #tpu.memory_space<vmem>>, %arg8: memref<1x16x16x128xf32, #tpu.memory_space<vmem>>, %arg9: memref<18x18x128xf32, #tpu.memory_space<vmem>>, %arg10: memref<256x128xf32, #tpu.memory_space<vmem>>, %arg11: memref<256x128xf32, #tpu.memory_space<vmem>>) attributes {dimension_semantics = [#tpu.dimension_semantics<parallel>], iteration_bounds = array<i64: 2>, scalar_prefetch = 0 : i64, scratch_operands = 3 : i64, tpu.core_type = #tpu.core_type<tc>, window_params = [{transform_indices = @transform_0, window_bounds = array<i64: 1, 18, 18, 128>}, {pipeline_mode = #tpu.pipeline_mode<synchronous>, transform_indices = @transform_1, window_bounds = array<i64: 3, 3, 128, 128>}, {pipeline_mode = #tpu.pipeline_mode<synchronous>, transform_indices = @transform_2, window_bounds = array<i64: 1, 128>}, {pipeline_mode = #tpu.pipeline_mode<synchronous>, transform_indices = @transform_3, window_bounds = array<i64: 3, 3, 128, 128>}, {pipeline_mode = #tpu.pipeline_mode<synchronous>, transform_indices = @transform_4, window_bounds = array<i64: 1, 128>}, {transform_indices = @transform_5, window_bounds = array<i64: 1, 16, 16, 128>}, {pipeline_mode = #tpu.pipeline_mode<synchronous>, transform_indices = @transform_6, window_bounds = array<i64: 128, 128>}, {transform_indices = @transform_7, window_bounds = array<i64: 1, 16, 16, 128>}]} {
    %c0 = arith.constant 0 : index
    %c0_0 = arith.constant 0 : index
    %c0_1 = arith.constant 0 : index
    %c0_2 = arith.constant 0 : index
    %0 = vector.load %arg1[%c0, %c0_0, %c0_1, %c0_2] : memref<1x18x18x128xf32, #tpu.memory_space<vmem>>, vector<1x16x16x128xf32>
    %1 = vector.shape_cast %0 : vector<1x16x16x128xf32> to vector<16x16x128xf32>
    %2 = vector.shape_cast %1 : vector<16x16x128xf32> to vector<256x128xf32>
    %c0_3 = arith.constant 0 : index
    %c0_4 = arith.constant 0 : index
    %c0_5 = arith.constant 0 : index
    %c0_6 = arith.constant 0 : index
    %3 = vector.load %arg2[%c0_3, %c0_4, %c0_5, %c0_6] : memref<3x3x128x128xf32, #tpu.memory_space<vmem>>, vector<1x1x128x128xf32>
    %4 = vector.shape_cast %3 : vector<1x1x128x128xf32> to vector<128x128xf32>
    %cst = arith.constant dense<0.000000e+00> : vector<256x128xf32>
    %5 = tpu.matmul %2, %4, %cst {dimension_numbers = #tpu.dot_dimension_numbers<[1], [0], [0], [1], [0, 0, 1, 1], [], []>} : vector<256x128xf32>, vector<128x128xf32>, vector<256x128xf32> -> vector<256x128xf32>
    %c0_7 = arith.constant 0 : index
    %c0_8 = arith.constant 0 : index
    %6 = vector.load %arg10[%c0_7, %c0_8] : memref<256x128xf32, #tpu.memory_space<vmem>>, vector<256x128xf32>
    tpu.vector_store %arg10[%c0_7, %c0_8], %5 {strides = array<i32>} : memref<256x128xf32, #tpu.memory_space<vmem>>, vector<256x128xf32>,
    %c0_9 = arith.constant 0 : index
    %c0_10 = arith.constant 0 : index
    %c1 = arith.constant 1 : index
    %c0_11 = arith.constant 0 : index
    %7 = vector.load %arg1[%c0_9, %c0_10, %c1, %c0_11] : memref<1x18x18x128xf32, #tpu.memory_space<vmem>>, vector<1x16x16x128xf32>
    %8 = vector.shape_cast %7 : vector<1x16x16x128xf32> to vector<16x16x128xf32>
    %9 = vector.shape_cast %8 : vector<16x16x128xf32> to vector<256x128xf32>
    %c0_12 = arith.constant 0 : index
    %c1_13 = arith.constant 1 : index
    %c0_14 = arith.constant 0 : index
    %c0_15 = arith.constant 0 : index
    %10 = vector.load %arg2[%c0_12, %c1_13, %c0_14, %c0_15] : memref<3x3x128x128xf32, #tpu.memory_space<vmem>>, vector<1x1x128x128xf32>
    %11 = vector.shape_cast %10 : vector<1x1x128x128xf32> to vector<128x128xf32>
    %cst_16 = arith.constant dense<0.000000e+00> : vector<256x128xf32>
    %12 = tpu.matmul %9, %11, %cst_16 {dimension_numbers = #tpu.dot_dimension_numbers<[1], [0], [0], [1], [0, 0, 1, 1], [], []>} : vector<256x128xf32>, vector<128x128xf32>, vector<256x128xf32> -> vector<256x128xf32>
    %c0_17 = arith.constant 0 : index
    %c0_18 = arith.constant 0 : index
    %13 = vector.load %arg10[%c0_17, %c0_18] : memref<256x128xf32, #tpu.memory_space<vmem>>, vector<256x128xf32>
    %14 = arith.addf %13, %12 : vector<256x128xf32>
    %c0_19 = arith.constant 0 : index
    %c0_20 = arith.constant 0 : index
    %15 = vector.load %arg10[%c0_19, %c0_20] : memref<256x128xf32, #tpu.memory_space<vmem>>, vector<256x128xf32>
    tpu.vector_store %arg10[%c0_19, %c0_20], %14 {strides = array<i32>} : memref<256x128xf32, #tpu.memory_space<vmem>>, vector<256x128xf32>,
    %c0_21 = arith.constant 0 : index
    %c0_22 = arith.constant 0 : index
    %c2 = arith.constant 2 : index
    %c0_23 = arith.constant 0 : index
    %16 = vector.load %arg1[%c0_21, %c0_22, %c2, %c0_23] : memref<1x18x18x128xf32, #tpu.memory_space<vmem>>, vector<1x16x16x128xf32>
    %17 = vector.shape_cast %16 : vector<1x16x16x128xf32> to vector<16x16x128xf32>
    %18 = vector.shape_cast %17 : vector<16x16x128xf32> to vector<256x128xf32>
    %c0_24 = arith.constant 0 : index
    %c2_25 = arith.constant 2 : index
    %c0_26 = arith.constant 0 : index
    %c0_27 = arith.constant 0 : index
    %19 = vector.load %arg2[%c0_24, %c2_25, %c0_26, %c0_27] : memref<3x3x128x128xf32, #tpu.memory_space<vmem>>, vector<1x1x128x128xf32>
    %20 = vector.shape_cast %19 : vector<1x1x128x128xf32> to vector<128x128xf32>
    %cst_28 = arith.constant dense<0.000000e+00> : vector<256x128xf32>
    %21 = tpu.matmul %18, %20, %cst_28 {dimension_numbers = #tpu.dot_dimension_numbers<[1], [0], [0], [1], [0, 0, 1, 1], [], []>} : vector<256x128xf32>, vector<128x128xf32>, vector<256x128xf32> -> vector<256x128xf32>
    %c0_29 = arith.constant 0 : index
    %c0_30 = arith.constant 0 : index
    %22 = vector.load %arg10[%c0_29, %c0_30] : memref<256x128xf32, #tpu.memory_space<vmem>>, vector<256x128xf32>
    %23 = arith.addf %22, %21 : vector<256x128xf32>
    %c0_31 = arith.constant 0 : index
    %c0_32 = arith.constant 0 : index
    %24 = vector.load %arg10[%c0_31, %c0_32] : memref<256x128xf32, #tpu.memory_space<vmem>>, vector<256x128xf32>
    tpu.vector_store %arg10[%c0_31, %c0_32], %23 {strides = array<i32>} : memref<256x128xf32, #tpu.memory_space<vmem>>, vector<256x128xf32>,
    %c0_33 = arith.constant 0 : index
    %c1_34 = arith.constant 1 : index
    %c0_35 = arith.constant 0 : index
    %c0_36 = arith.constant 0 : index
    %25 = vector.load %arg1[%c0_33, %c1_34, %c0_35, %c0_36] : memref<1x18x18x128xf32, #tpu.memory_space<vmem>>, vector<1x16x16x128xf32>
    %26 = vector.shape_cast %25 : vector<1x16x16x128xf32> to vector<16x16x128xf32>
    %27 = vector.shape_cast %26 : vector<16x16x128xf32> to vector<256x128xf32>
    %c1_37 = arith.constant 1 : index
    %c0_38 = arith.constant 0 : index
    %c0_39 = arith.constant 0 : index
    %c0_40 = arith.constant 0 : index
    %28 = vector.load %arg2[%c1_37, %c0_38, %c0_39, %c0_40] : memref<3x3x128x128xf32, #tpu.memory_space<vmem>>, vector<1x1x128x128xf32>
    %29 = vector.shape_cast %28 : vector<1x1x128x128xf32> to vector<128x128xf32>
    %cst_41 = arith.constant dense<0.000000e+00> : vector<256x128xf32>
    %30 = tpu.matmul %27, %29, %cst_41 {dimension_numbers = #tpu.dot_dimension_numbers<[1], [0], [0], [1], [0, 0, 1, 1], [], []>} : vector<256x128xf32>, vector<128x128xf32>, vector<256x128xf32> -> vector<256x128xf32>
    %c0_42 = arith.constant 0 : index
    %c0_43 = arith.constant 0 : index
    %31 = vector.load %arg10[%c0_42, %c0_43] : memref<256x128xf32, #tpu.memory_space<vmem>>, vector<256x128xf32>
    %32 = arith.addf %31, %30 : vector<256x128xf32>
    %c0_44 = arith.constant 0 : index
    %c0_45 = arith.constant 0 : index
    %33 = vector.load %arg10[%c0_44, %c0_45] : memref<256x128xf32, #tpu.memory_space<vmem>>, vector<256x128xf32>
    tpu.vector_store %arg10[%c0_44, %c0_45], %32 {strides = array<i32>} : memref<256x128xf32, #tpu.memory_space<vmem>>, vector<256x128xf32>,
    %c0_46 = arith.constant 0 : index
    %c1_47 = arith.constant 1 : index
    %c1_48 = arith.constant 1 : index
    %c0_49 = arith.constant 0 : index
    %34 = vector.load %arg1[%c0_46, %c1_47, %c1_48, %c0_49] : memref<1x18x18x128xf32, #tpu.memory_space<vmem>>, vector<1x16x16x128xf32>
    %35 = vector.shape_cast %34 : vector<1x16x16x128xf32> to vector<16x16x128xf32>
    %36 = vector.shape_cast %35 : vector<16x16x128xf32> to vector<256x128xf32>
    %c1_50 = arith.constant 1 : index
    %c1_51 = arith.constant 1 : index
    %c0_52 = arith.constant 0 : index
    %c0_53 = arith.constant 0 : index
    %37 = vector.load %arg2[%c1_50, %c1_51, %c0_52, %c0_53] : memref<3x3x128x128xf32, #tpu.memory_space<vmem>>, vector<1x1x128x128xf32>
    %38 = vector.shape_cast %37 : vector<1x1x128x128xf32> to vector<128x128xf32>
    %cst_54 = arith.constant dense<0.000000e+00> : vector<256x128xf32>
    %39 = tpu.matmul %36, %38, %cst_54 {dimension_numbers = #tpu.dot_dimension_numbers<[1], [0], [0], [1], [0, 0, 1, 1], [], []>} : vector<256x128xf32>, vector<128x128xf32>, vector<256x128xf32> -> vector<256x128xf32>
    %c0_55 = arith.constant 0 : index
    %c0_56 = arith.constant 0 : index
    %40 = vector.load %arg10[%c0_55, %c0_56] : memref<256x128xf32, #tpu.memory_space<vmem>>, vector<256x128xf32>
    %41 = arith.addf %40, %39 : vector<256x128xf32>
    %c0_57 = arith.constant 0 : index
    %c0_58 = arith.constant 0 : index
    %42 = vector.load %arg10[%c0_57, %c0_58] : memref<256x128xf32, #tpu.memory_space<vmem>>, vector<256x128xf32>
    tpu.vector_store %arg10[%c0_57, %c0_58], %41 {strides = array<i32>} : memref<256x128xf32, #tpu.memory_space<vmem>>, vector<256x128xf32>,
    %c0_59 = arith.constant 0 : index
    %c1_60 = arith.constant 1 : index
    %c2_61 = arith.constant 2 : index
    %c0_62 = arith.constant 0 : index
    %43 = vector.load %arg1[%c0_59, %c1_60, %c2_61, %c0_62] : memref<1x18x18x128xf32, #tpu.memory_space<vmem>>, vector<1x16x16x128xf32>
    %44 = vector.shape_cast %43 : vector<1x16x16x128xf32> to vector<16x16x128xf32>
    %45 = vector.shape_cast %44 : vector<16x16x128xf32> to vector<256x128xf32>
    %c1_63 = arith.constant 1 : index
    %c2_64 = arith.constant 2 : index
    %c0_65 = arith.constant 0 : index
    %c0_66 = arith.constant 0 : index
    %46 = vector.load %arg2[%c1_63, %c2_64, %c0_65, %c0_66] : memref<3x3x128x128xf32, #tpu.memory_space<vmem>>, vector<1x1x128x128xf32>
    %47 = vector.shape_cast %46 : vector<1x1x128x128xf32> to vector<128x128xf32>
    %cst_67 = arith.constant dense<0.000000e+00> : vector<256x128xf32>
    %48 = tpu.matmul %45, %47, %cst_67 {dimension_numbers = #tpu.dot_dimension_numbers<[1], [0], [0], [1], [0, 0, 1, 1], [], []>} : vector<256x128xf32>, vector<128x128xf32>, vector<256x128xf32> -> vector<256x128xf32>
    %c0_68 = arith.constant 0 : index
    %c0_69 = arith.constant 0 : index
    %49 = vector.load %arg10[%c0_68, %c0_69] : memref<256x128xf32, #tpu.memory_space<vmem>>, vector<256x128xf32>
    %50 = arith.addf %49, %48 : vector<256x128xf32>
    %c0_70 = arith.constant 0 : index
    %c0_71 = arith.constant 0 : index
    %51 = vector.load %arg10[%c0_70, %c0_71] : memref<256x128xf32, #tpu.memory_space<vmem>>, vector<256x128xf32>
    tpu.vector_store %arg10[%c0_70, %c0_71], %50 {strides = array<i32>} : memref<256x128xf32, #tpu.memory_space<vmem>>, vector<256x128xf32>,
    %c0_72 = arith.constant 0 : index
    %c2_73 = arith.constant 2 : index
    %c0_74 = arith.constant 0 : index
    %c0_75 = arith.constant 0 : index
    %52 = vector.load %arg1[%c0_72, %c2_73, %c0_74, %c0_75] : memref<1x18x18x128xf32, #tpu.memory_space<vmem>>, vector<1x16x16x128xf32>
    %53 = vector.shape_cast %52 : vector<1x16x16x128xf32> to vector<16x16x128xf32>
    %54 = vector.shape_cast %53 : vector<16x16x128xf32> to vector<256x128xf32>
    %c2_76 = arith.constant 2 : index
    %c0_77 = arith.constant 0 : index
    %c0_78 = arith.constant 0 : index
    %c0_79 = arith.constant 0 : index
    %55 = vector.load %arg2[%c2_76, %c0_77, %c0_78, %c0_79] : memref<3x3x128x128xf32, #tpu.memory_space<vmem>>, vector<1x1x128x128xf32>
    %56 = vector.shape_cast %55 : vector<1x1x128x128xf32> to vector<128x128xf32>
    %cst_80 = arith.constant dense<0.000000e+00> : vector<256x128xf32>
    %57 = tpu.matmul %54, %56, %cst_80 {dimension_numbers = #tpu.dot_dimension_numbers<[1], [0], [0], [1], [0, 0, 1, 1], [], []>} : vector<256x128xf32>, vector<128x128xf32>, vector<256x128xf32> -> vector<256x128xf32>
    %c0_81 = arith.constant 0 : index
    %c0_82 = arith.constant 0 : index
    %58 = vector.load %arg10[%c0_81, %c0_82] : memref<256x128xf32, #tpu.memory_space<vmem>>, vector<256x128xf32>
    %59 = arith.addf %58, %57 : vector<256x128xf32>
    %c0_83 = arith.constant 0 : index
    %c0_84 = arith.constant 0 : index
    %60 = vector.load %arg10[%c0_83, %c0_84] : memref<256x128xf32, #tpu.memory_space<vmem>>, vector<256x128xf32>
    tpu.vector_store %arg10[%c0_83, %c0_84], %59 {strides = array<i32>} : memref<256x128xf32, #tpu.memory_space<vmem>>, vector<256x128xf32>,
    %c0_85 = arith.constant 0 : index
    %c2_86 = arith.constant 2 : index
    %c1_87 = arith.constant 1 : index
    %c0_88 = arith.constant 0 : index
    %61 = vector.load %arg1[%c0_85, %c2_86, %c1_87, %c0_88] : memref<1x18x18x128xf32, #tpu.memory_space<vmem>>, vector<1x16x16x128xf32>
    %62 = vector.shape_cast %61 : vector<1x16x16x128xf32> to vector<16x16x128xf32>
    %63 = vector.shape_cast %62 : vector<16x16x128xf32> to vector<256x128xf32>
    %c2_89 = arith.constant 2 : index
    %c1_90 = arith.constant 1 : index
    %c0_91 = arith.constant 0 : index
    %c0_92 = arith.constant 0 : index
    %64 = vector.load %arg2[%c2_89, %c1_90, %c0_91, %c0_92] : memref<3x3x128x128xf32, #tpu.memory_space<vmem>>, vector<1x1x128x128xf32>
    %65 = vector.shape_cast %64 : vector<1x1x128x128xf32> to vector<128x128xf32>
    %cst_93 = arith.constant dense<0.000000e+00> : vector<256x128xf32>
    %66 = tpu.matmul %63, %65, %cst_93 {dimension_numbers = #tpu.dot_dimension_numbers<[1], [0], [0], [1], [0, 0, 1, 1], [], []>} : vector<256x128xf32>, vector<128x128xf32>, vector<256x128xf32> -> vector<256x128xf32>
    %c0_94 = arith.constant 0 : index
    %c0_95 = arith.constant 0 : index
    %67 = vector.load %arg10[%c0_94, %c0_95] : memref<256x128xf32, #tpu.memory_space<vmem>>, vector<256x128xf32>
    %68 = arith.addf %67, %66 : vector<256x128xf32>
    %c0_96 = arith.constant 0 : index
    %c0_97 = arith.constant 0 : index
    %69 = vector.load %arg10[%c0_96, %c0_97] : memref<256x128xf32, #tpu.memory_space<vmem>>, vector<256x128xf32>
    tpu.vector_store %arg10[%c0_96, %c0_97], %68 {strides = array<i32>} : memref<256x128xf32, #tpu.memory_space<vmem>>, vector<256x128xf32>,
    %c0_98 = arith.constant 0 : index
    %c2_99 = arith.constant 2 : index
    %c2_100 = arith.constant 2 : index
    %c0_101 = arith.constant 0 : index
    %70 = vector.load %arg1[%c0_98, %c2_99, %c2_100, %c0_101] : memref<1x18x18x128xf32, #tpu.memory_space<vmem>>, vector<1x16x16x128xf32>
    %71 = vector.shape_cast %70 : vector<1x16x16x128xf32> to vector<16x16x128xf32>
    %72 = vector.shape_cast %71 : vector<16x16x128xf32> to vector<256x128xf32>
    %c2_102 = arith.constant 2 : index
    %c2_103 = arith.constant 2 : index
    %c0_104 = arith.constant 0 : index
    %c0_105 = arith.constant 0 : index
    %73 = vector.load %arg2[%c2_102, %c2_103, %c0_104, %c0_105] : memref<3x3x128x128xf32, #tpu.memory_space<vmem>>, vector<1x1x128x128xf32>
    %74 = vector.shape_cast %73 : vector<1x1x128x128xf32> to vector<128x128xf32>
    %cst_106 = arith.constant dense<0.000000e+00> : vector<256x128xf32>
    %75 = tpu.matmul %72, %74, %cst_106 {dimension_numbers = #tpu.dot_dimension_numbers<[1], [0], [0], [1], [0, 0, 1, 1], [], []>} : vector<256x128xf32>, vector<128x128xf32>, vector<256x128xf32> -> vector<256x128xf32>
    %c0_107 = arith.constant 0 : index
    %c0_108 = arith.constant 0 : index
    %76 = vector.load %arg10[%c0_107, %c0_108] : memref<256x128xf32, #tpu.memory_space<vmem>>, vector<256x128xf32>
    %77 = arith.addf %76, %75 : vector<256x128xf32>
    %c0_109 = arith.constant 0 : index
    %c0_110 = arith.constant 0 : index
    %78 = vector.load %arg10[%c0_109, %c0_110] : memref<256x128xf32, #tpu.memory_space<vmem>>, vector<256x128xf32>
    tpu.vector_store %arg10[%c0_109, %c0_110], %77 {strides = array<i32>} : memref<256x128xf32, #tpu.memory_space<vmem>>, vector<256x128xf32>,
    %c0_111 = arith.constant 0 : index
    %c0_112 = arith.constant 0 : index
    %79 = vector.load %arg10[%c0_111, %c0_112] : memref<256x128xf32, #tpu.memory_space<vmem>>, vector<256x128xf32>
    %c0_113 = arith.constant 0 : index
    %c0_114 = arith.constant 0 : index
    %80 = vector.load %arg3[%c0_113, %c0_114] : memref<1x128xf32, #tpu.memory_space<vmem>>, vector<1x128xf32>
    %81 = vector.broadcast %80 : vector<1x128xf32> to vector<256x128xf32>
    %82 = arith.addf %79, %81 : vector<256x128xf32>
    %cst_115 = arith.constant 0.000000e+00 : f32
    %83 = vector.broadcast %cst_115 : f32 to vector<256x128xf32>
    %84 = arith.maximumf %82, %83 : vector<256x128xf32>
    %cst_116 = arith.constant 0.000000e+00 : f32
    %85 = vector.broadcast %cst_116 : f32 to vector<1x18x128xf32>
    %cst_117 = arith.constant 0.000000e+00 : f32
    %86 = vector.broadcast %cst_117 : f32 to vector<18x1x128xf32>
    %c0_118 = arith.constant 0 : index
    %c0_119 = arith.constant 0 : index
    %c0_120 = arith.constant 0 : index
    %87 = vector.load %arg9[%c0_118, %c0_119, %c0_120] : memref<18x18x128xf32, #tpu.memory_space<vmem>>, vector<1x18x128xf32>
    tpu.vector_store %arg9[%c0_118, %c0_119, %c0_120], %85 {strides = array<i32>} : memref<18x18x128xf32, #tpu.memory_space<vmem>>, vector<1x18x128xf32>,
    %c17 = arith.constant 17 : index
    %c0_121 = arith.constant 0 : index
    %c0_122 = arith.constant 0 : index
    %88 = vector.load %arg9[%c17, %c0_121, %c0_122] : memref<18x18x128xf32, #tpu.memory_space<vmem>>, vector<1x18x128xf32>
    tpu.vector_store %arg9[%c17, %c0_121, %c0_122], %85 {strides = array<i32>} : memref<18x18x128xf32, #tpu.memory_space<vmem>>, vector<1x18x128xf32>,
    %c0_123 = arith.constant 0 : index
    %c0_124 = arith.constant 0 : index
    %c0_125 = arith.constant 0 : index
    %89 = vector.load %arg9[%c0_123, %c0_124, %c0_125] : memref<18x18x128xf32, #tpu.memory_space<vmem>>, vector<18x1x128xf32>
    tpu.vector_store %arg9[%c0_123, %c0_124, %c0_125], %86 {strides = array<i32>} : memref<18x18x128xf32, #tpu.memory_space<vmem>>, vector<18x1x128xf32>,
    %c0_126 = arith.constant 0 : index
    %c17_127 = arith.constant 17 : index
    %c0_128 = arith.constant 0 : index
    %90 = vector.load %arg9[%c0_126, %c17_127, %c0_128] : memref<18x18x128xf32, #tpu.memory_space<vmem>>, vector<18x1x128xf32>
    tpu.vector_store %arg9[%c0_126, %c17_127, %c0_128], %86 {strides = array<i32>} : memref<18x18x128xf32, #tpu.memory_space<vmem>>, vector<18x1x128xf32>,
    %91 = vector.shape_cast %84 : vector<256x128xf32> to vector<16x16x128xf32>
    %c1_129 = arith.constant 1 : index
    %c1_130 = arith.constant 1 : index
    %c0_131 = arith.constant 0 : index
    %92 = vector.load %arg9[%c1_129, %c1_130, %c0_131] : memref<18x18x128xf32, #tpu.memory_space<vmem>>, vector<16x16x128xf32>
    tpu.vector_store %arg9[%c1_129, %c1_130, %c0_131], %91 {strides = array<i32>} : memref<18x18x128xf32, #tpu.memory_space<vmem>>, vector<16x16x128xf32>,
    %c0_132 = arith.constant 0 : index
    %c0_133 = arith.constant 0 : index
    %c0_134 = arith.constant 0 : index
    %93 = vector.load %arg9[%c0_132, %c0_133, %c0_134] : memref<18x18x128xf32, #tpu.memory_space<vmem>>, vector<16x16x128xf32>
    %94 = vector.shape_cast %93 : vector<16x16x128xf32> to vector<256x128xf32>
    %c0_135 = arith.constant 0 : index
    %c0_136 = arith.constant 0 : index
    %c0_137 = arith.constant 0 : index
    %c0_138 = arith.constant 0 : index
    %95 = vector.load %arg4[%c0_135, %c0_136, %c0_137, %c0_138] : memref<3x3x128x128xf32, #tpu.memory_space<vmem>>, vector<1x1x128x128xf32>
    %96 = vector.shape_cast %95 : vector<1x1x128x128xf32> to vector<128x128xf32>
    %cst_139 = arith.constant dense<0.000000e+00> : vector<256x128xf32>
    %97 = tpu.matmul %94, %96, %cst_139 {dimension_numbers = #tpu.dot_dimension_numbers<[1], [0], [0], [1], [0, 0, 1, 1], [], []>} : vector<256x128xf32>, vector<128x128xf32>, vector<256x128xf32> -> vector<256x128xf32>
    %c0_140 = arith.constant 0 : index
    %c0_141 = arith.constant 0 : index
    %98 = vector.load %arg11[%c0_140, %c0_141] : memref<256x128xf32, #tpu.memory_space<vmem>>, vector<256x128xf32>
    tpu.vector_store %arg11[%c0_140, %c0_141], %97 {strides = array<i32>} : memref<256x128xf32, #tpu.memory_space<vmem>>, vector<256x128xf32>,
    %c0_142 = arith.constant 0 : index
    %c1_143 = arith.constant 1 : index
    %c0_144 = arith.constant 0 : index
    %99 = vector.load %arg9[%c0_142, %c1_143, %c0_144] : memref<18x18x128xf32, #tpu.memory_space<vmem>>, vector<16x16x128xf32>
    %100 = vector.shape_cast %99 : vector<16x16x128xf32> to vector<256x128xf32>
    %c0_145 = arith.constant 0 : index
    %c1_146 = arith.constant 1 : index
    %c0_147 = arith.constant 0 : index
    %c0_148 = arith.constant 0 : index
    %101 = vector.load %arg4[%c0_145, %c1_146, %c0_147, %c0_148] : memref<3x3x128x128xf32, #tpu.memory_space<vmem>>, vector<1x1x128x128xf32>
    %102 = vector.shape_cast %101 : vector<1x1x128x128xf32> to vector<128x128xf32>
    %cst_149 = arith.constant dense<0.000000e+00> : vector<256x128xf32>
    %103 = tpu.matmul %100, %102, %cst_149 {dimension_numbers = #tpu.dot_dimension_numbers<[1], [0], [0], [1], [0, 0, 1, 1], [], []>} : vector<256x128xf32>, vector<128x128xf32>, vector<256x128xf32> -> vector<256x128xf32>
    %c0_150 = arith.constant 0 : index
    %c0_151 = arith.constant 0 : index
    %104 = vector.load %arg11[%c0_150, %c0_151] : memref<256x128xf32, #tpu.memory_space<vmem>>, vector<256x128xf32>
    %105 = arith.addf %104, %103 : vector<256x128xf32>
    %c0_152 = arith.constant 0 : index
    %c0_153 = arith.constant 0 : index
    %106 = vector.load %arg11[%c0_152, %c0_153] : memref<256x128xf32, #tpu.memory_space<vmem>>, vector<256x128xf32>
    tpu.vector_store %arg11[%c0_152, %c0_153], %105 {strides = array<i32>} : memref<256x128xf32, #tpu.memory_space<vmem>>, vector<256x128xf32>,
    %c0_154 = arith.constant 0 : index
    %c2_155 = arith.constant 2 : index
    %c0_156 = arith.constant 0 : index
    %107 = vector.load %arg9[%c0_154, %c2_155, %c0_156] : memref<18x18x128xf32, #tpu.memory_space<vmem>>, vector<16x16x128xf32>
    %108 = vector.shape_cast %107 : vector<16x16x128xf32> to vector<256x128xf32>
    %c0_157 = arith.constant 0 : index
    %c2_158 = arith.constant 2 : index
    %c0_159 = arith.constant 0 : index
    %c0_160 = arith.constant 0 : index
    %109 = vector.load %arg4[%c0_157, %c2_158, %c0_159, %c0_160] : memref<3x3x128x128xf32, #tpu.memory_space<vmem>>, vector<1x1x128x128xf32>
    %110 = vector.shape_cast %109 : vector<1x1x128x128xf32> to vector<128x128xf32>
    %cst_161 = arith.constant dense<0.000000e+00> : vector<256x128xf32>
    %111 = tpu.matmul %108, %110, %cst_161 {dimension_numbers = #tpu.dot_dimension_numbers<[1], [0], [0], [1], [0, 0, 1, 1], [], []>} : vector<256x128xf32>, vector<128x128xf32>, vector<256x128xf32> -> vector<256x128xf32>
    %c0_162 = arith.constant 0 : index
    %c0_163 = arith.constant 0 : index
    %112 = vector.load %arg11[%c0_162, %c0_163] : memref<256x128xf32, #tpu.memory_space<vmem>>, vector<256x128xf32>
    %113 = arith.addf %112, %111 : vector<256x128xf32>
    %c0_164 = arith.constant 0 : index
    %c0_165 = arith.constant 0 : index
    %114 = vector.load %arg11[%c0_164, %c0_165] : memref<256x128xf32, #tpu.memory_space<vmem>>, vector<256x128xf32>
    tpu.vector_store %arg11[%c0_164, %c0_165], %113 {strides = array<i32>} : memref<256x128xf32, #tpu.memory_space<vmem>>, vector<256x128xf32>,
    %c1_166 = arith.constant 1 : index
    %c0_167 = arith.constant 0 : index
    %c0_168 = arith.constant 0 : index
    %115 = vector.load %arg9[%c1_166, %c0_167, %c0_168] : memref<18x18x128xf32, #tpu.memory_space<vmem>>, vector<16x16x128xf32>
    %116 = vector.shape_cast %115 : vector<16x16x128xf32> to vector<256x128xf32>
    %c1_169 = arith.constant 1 : index
    %c0_170 = arith.constant 0 : index
    %c0_171 = arith.constant 0 : index
    %c0_172 = arith.constant 0 : index
    %117 = vector.load %arg4[%c1_169, %c0_170, %c0_171, %c0_172] : memref<3x3x128x128xf32, #tpu.memory_space<vmem>>, vector<1x1x128x128xf32>
    %118 = vector.shape_cast %117 : vector<1x1x128x128xf32> to vector<128x128xf32>
    %cst_173 = arith.constant dense<0.000000e+00> : vector<256x128xf32>
    %119 = tpu.matmul %116, %118, %cst_173 {dimension_numbers = #tpu.dot_dimension_numbers<[1], [0], [0], [1], [0, 0, 1, 1], [], []>} : vector<256x128xf32>, vector<128x128xf32>, vector<256x128xf32> -> vector<256x128xf32>
    %c0_174 = arith.constant 0 : index
    %c0_175 = arith.constant 0 : index
    %120 = vector.load %arg11[%c0_174, %c0_175] : memref<256x128xf32, #tpu.memory_space<vmem>>, vector<256x128xf32>
    %121 = arith.addf %120, %119 : vector<256x128xf32>
    %c0_176 = arith.constant 0 : index
    %c0_177 = arith.constant 0 : index
    %122 = vector.load %arg11[%c0_176, %c0_177] : memref<256x128xf32, #tpu.memory_space<vmem>>, vector<256x128xf32>
    tpu.vector_store %arg11[%c0_176, %c0_177], %121 {strides = array<i32>} : memref<256x128xf32, #tpu.memory_space<vmem>>, vector<256x128xf32>,
    %c1_178 = arith.constant 1 : index
    %c1_179 = arith.constant 1 : index
    %c0_180 = arith.constant 0 : index
    %123 = vector.load %arg9[%c1_178, %c1_179, %c0_180] : memref<18x18x128xf32, #tpu.memory_space<vmem>>, vector<16x16x128xf32>
    %124 = vector.shape_cast %123 : vector<16x16x128xf32> to vector<256x128xf32>
    %c1_181 = arith.constant 1 : index
    %c1_182 = arith.constant 1 : index
    %c0_183 = arith.constant 0 : index
    %c0_184 = arith.constant 0 : index
    %125 = vector.load %arg4[%c1_181, %c1_182, %c0_183, %c0_184] : memref<3x3x128x128xf32, #tpu.memory_space<vmem>>, vector<1x1x128x128xf32>
    %126 = vector.shape_cast %125 : vector<1x1x128x128xf32> to vector<128x128xf32>
    %cst_185 = arith.constant dense<0.000000e+00> : vector<256x128xf32>
    %127 = tpu.matmul %124, %126, %cst_185 {dimension_numbers = #tpu.dot_dimension_numbers<[1], [0], [0], [1], [0, 0, 1, 1], [], []>} : vector<256x128xf32>, vector<128x128xf32>, vector<256x128xf32> -> vector<256x128xf32>
    %c0_186 = arith.constant 0 : index
    %c0_187 = arith.constant 0 : index
    %128 = vector.load %arg11[%c0_186, %c0_187] : memref<256x128xf32, #tpu.memory_space<vmem>>, vector<256x128xf32>
    %129 = arith.addf %128, %127 : vector<256x128xf32>
    %c0_188 = arith.constant 0 : index
    %c0_189 = arith.constant 0 : index
    %130 = vector.load %arg11[%c0_188, %c0_189] : memref<256x128xf32, #tpu.memory_space<vmem>>, vector<256x128xf32>
    tpu.vector_store %arg11[%c0_188, %c0_189], %129 {strides = array<i32>} : memref<256x128xf32, #tpu.memory_space<vmem>>, vector<256x128xf32>,
    %c1_190 = arith.constant 1 : index
    %c2_191 = arith.constant 2 : index
    %c0_192 = arith.constant 0 : index
    %131 = vector.load %arg9[%c1_190, %c2_191, %c0_192] : memref<18x18x128xf32, #tpu.memory_space<vmem>>, vector<16x16x128xf32>
    %132 = vector.shape_cast %131 : vector<16x16x128xf32> to vector<256x128xf32>
    %c1_193 = arith.constant 1 : index
    %c2_194 = arith.constant 2 : index
    %c0_195 = arith.constant 0 : index
    %c0_196 = arith.constant 0 : index
    %133 = vector.load %arg4[%c1_193, %c2_194, %c0_195, %c0_196] : memref<3x3x128x128xf32, #tpu.memory_space<vmem>>, vector<1x1x128x128xf32>
    %134 = vector.shape_cast %133 : vector<1x1x128x128xf32> to vector<128x128xf32>
    %cst_197 = arith.constant dense<0.000000e+00> : vector<256x128xf32>
    %135 = tpu.matmul %132, %134, %cst_197 {dimension_numbers = #tpu.dot_dimension_numbers<[1], [0], [0], [1], [0, 0, 1, 1], [], []>} : vector<256x128xf32>, vector<128x128xf32>, vector<256x128xf32> -> vector<256x128xf32>
    %c0_198 = arith.constant 0 : index
    %c0_199 = arith.constant 0 : index
    %136 = vector.load %arg11[%c0_198, %c0_199] : memref<256x128xf32, #tpu.memory_space<vmem>>, vector<256x128xf32>
    %137 = arith.addf %136, %135 : vector<256x128xf32>
    %c0_200 = arith.constant 0 : index
    %c0_201 = arith.constant 0 : index
    %138 = vector.load %arg11[%c0_200, %c0_201] : memref<256x128xf32, #tpu.memory_space<vmem>>, vector<256x128xf32>
    tpu.vector_store %arg11[%c0_200, %c0_201], %137 {strides = array<i32>} : memref<256x128xf32, #tpu.memory_space<vmem>>, vector<256x128xf32>,
    %c2_202 = arith.constant 2 : index
    %c0_203 = arith.constant 0 : index
    %c0_204 = arith.constant 0 : index
    %139 = vector.load %arg9[%c2_202, %c0_203, %c0_204] : memref<18x18x128xf32, #tpu.memory_space<vmem>>, vector<16x16x128xf32>
    %140 = vector.shape_cast %139 : vector<16x16x128xf32> to vector<256x128xf32>
    %c2_205 = arith.constant 2 : index
    %c0_206 = arith.constant 0 : index
    %c0_207 = arith.constant 0 : index
    %c0_208 = arith.constant 0 : index
    %141 = vector.load %arg4[%c2_205, %c0_206, %c0_207, %c0_208] : memref<3x3x128x128xf32, #tpu.memory_space<vmem>>, vector<1x1x128x128xf32>
    %142 = vector.shape_cast %141 : vector<1x1x128x128xf32> to vector<128x128xf32>
    %cst_209 = arith.constant dense<0.000000e+00> : vector<256x128xf32>
    %143 = tpu.matmul %140, %142, %cst_209 {dimension_numbers = #tpu.dot_dimension_numbers<[1], [0], [0], [1], [0, 0, 1, 1], [], []>} : vector<256x128xf32>, vector<128x128xf32>, vector<256x128xf32> -> vector<256x128xf32>
    %c0_210 = arith.constant 0 : index
    %c0_211 = arith.constant 0 : index
    %144 = vector.load %arg11[%c0_210, %c0_211] : memref<256x128xf32, #tpu.memory_space<vmem>>, vector<256x128xf32>
    %145 = arith.addf %144, %143 : vector<256x128xf32>
    %c0_212 = arith.constant 0 : index
    %c0_213 = arith.constant 0 : index
    %146 = vector.load %arg11[%c0_212, %c0_213] : memref<256x128xf32, #tpu.memory_space<vmem>>, vector<256x128xf32>
    tpu.vector_store %arg11[%c0_212, %c0_213], %145 {strides = array<i32>} : memref<256x128xf32, #tpu.memory_space<vmem>>, vector<256x128xf32>,
    %c2_214 = arith.constant 2 : index
    %c1_215 = arith.constant 1 : index
    %c0_216 = arith.constant 0 : index
    %147 = vector.load %arg9[%c2_214, %c1_215, %c0_216] : memref<18x18x128xf32, #tpu.memory_space<vmem>>, vector<16x16x128xf32>
    %148 = vector.shape_cast %147 : vector<16x16x128xf32> to vector<256x128xf32>
    %c2_217 = arith.constant 2 : index
    %c1_218 = arith.constant 1 : index
    %c0_219 = arith.constant 0 : index
    %c0_220 = arith.constant 0 : index
    %149 = vector.load %arg4[%c2_217, %c1_218, %c0_219, %c0_220] : memref<3x3x128x128xf32, #tpu.memory_space<vmem>>, vector<1x1x128x128xf32>
    %150 = vector.shape_cast %149 : vector<1x1x128x128xf32> to vector<128x128xf32>
    %cst_221 = arith.constant dense<0.000000e+00> : vector<256x128xf32>
    %151 = tpu.matmul %148, %150, %cst_221 {dimension_numbers = #tpu.dot_dimension_numbers<[1], [0], [0], [1], [0, 0, 1, 1], [], []>} : vector<256x128xf32>, vector<128x128xf32>, vector<256x128xf32> -> vector<256x128xf32>
    %c0_222 = arith.constant 0 : index
    %c0_223 = arith.constant 0 : index
    %152 = vector.load %arg11[%c0_222, %c0_223] : memref<256x128xf32, #tpu.memory_space<vmem>>, vector<256x128xf32>
    %153 = arith.addf %152, %151 : vector<256x128xf32>
    %c0_224 = arith.constant 0 : index
    %c0_225 = arith.constant 0 : index
    %154 = vector.load %arg11[%c0_224, %c0_225] : memref<256x128xf32, #tpu.memory_space<vmem>>, vector<256x128xf32>
    tpu.vector_store %arg11[%c0_224, %c0_225], %153 {strides = array<i32>} : memref<256x128xf32, #tpu.memory_space<vmem>>, vector<256x128xf32>,
    %c2_226 = arith.constant 2 : index
    %c2_227 = arith.constant 2 : index
    %c0_228 = arith.constant 0 : index
    %155 = vector.load %arg9[%c2_226, %c2_227, %c0_228] : memref<18x18x128xf32, #tpu.memory_space<vmem>>, vector<16x16x128xf32>
    %156 = vector.shape_cast %155 : vector<16x16x128xf32> to vector<256x128xf32>
    %c2_229 = arith.constant 2 : index
    %c2_230 = arith.constant 2 : index
    %c0_231 = arith.constant 0 : index
    %c0_232 = arith.constant 0 : index
    %157 = vector.load %arg4[%c2_229, %c2_230, %c0_231, %c0_232] : memref<3x3x128x128xf32, #tpu.memory_space<vmem>>, vector<1x1x128x128xf32>
    %158 = vector.shape_cast %157 : vector<1x1x128x128xf32> to vector<128x128xf32>
    %cst_233 = arith.constant dense<0.000000e+00> : vector<256x128xf32>
    %159 = tpu.matmul %156, %158, %cst_233 {dimension_numbers = #tpu.dot_dimension_numbers<[1], [0], [0], [1], [0, 0, 1, 1], [], []>} : vector<256x128xf32>, vector<128x128xf32>, vector<256x128xf32> -> vector<256x128xf32>
    %c0_234 = arith.constant 0 : index
    %c0_235 = arith.constant 0 : index
    %160 = vector.load %arg11[%c0_234, %c0_235] : memref<256x128xf32, #tpu.memory_space<vmem>>, vector<256x128xf32>
    %161 = arith.addf %160, %159 : vector<256x128xf32>
    %c0_236 = arith.constant 0 : index
    %c0_237 = arith.constant 0 : index
    %162 = vector.load %arg11[%c0_236, %c0_237] : memref<256x128xf32, #tpu.memory_space<vmem>>, vector<256x128xf32>
    tpu.vector_store %arg11[%c0_236, %c0_237], %161 {strides = array<i32>} : memref<256x128xf32, #tpu.memory_space<vmem>>, vector<256x128xf32>,
    %c0_238 = arith.constant 0 : index
    %c0_239 = arith.constant 0 : index
    %163 = vector.load %arg11[%c0_238, %c0_239] : memref<256x128xf32, #tpu.memory_space<vmem>>, vector<256x128xf32>
    %c0_240 = arith.constant 0 : index
    %c0_241 = arith.constant 0 : index
    %164 = vector.load %arg5[%c0_240, %c0_241] : memref<1x128xf32, #tpu.memory_space<vmem>>, vector<1x128xf32>
    %165 = vector.broadcast %164 : vector<1x128xf32> to vector<256x128xf32>
    %166 = arith.addf %163, %165 : vector<256x128xf32>
    %c0_242 = arith.constant 0 : index
    %c0_243 = arith.constant 0 : index
    %c0_244 = arith.constant 0 : index
    %c0_245 = arith.constant 0 : index
    %167 = vector.load %arg6[%c0_242, %c0_243, %c0_244, %c0_245] : memref<1x16x16x128xf32, #tpu.memory_space<vmem>>, vector<1x16x16x128xf32>
    %168 = vector.shape_cast %167 : vector<1x16x16x128xf32> to vector<16x16x128xf32>
    %169 = vector.shape_cast %168 : vector<16x16x128xf32> to vector<256x128xf32>
    %c0_246 = arith.constant 0 : index
    %c0_247 = arith.constant 0 : index
    %170 = vector.load %arg7[%c0_246, %c0_247] : memref<128x128xf32, #tpu.memory_space<vmem>>, vector<128x128xf32>
    %cst_248 = arith.constant dense<0.000000e+00> : vector<256x128xf32>
    %171 = tpu.matmul %169, %170, %cst_248 {dimension_numbers = #tpu.dot_dimension_numbers<[1], [0], [0], [1], [0, 0, 1, 1], [], []>} : vector<256x128xf32>, vector<128x128xf32>, vector<256x128xf32> -> vector<256x128xf32>
    %172 = arith.addf %166, %171 : vector<256x128xf32>
    %173 = vector.shape_cast %172 : vector<256x128xf32> to vector<16x16x128xf32>
    %c0_249 = arith.constant 0 : index
    %c0_250 = arith.constant 0 : index
    %c0_251 = arith.constant 0 : index
    %c0_252 = arith.constant 0 : index
    %174 = vector.load %arg8[%c0_249, %c0_250, %c0_251, %c0_252] : memref<1x16x16x128xf32, #tpu.memory_space<vmem>>, vector<1x16x16x128xf32>
    %175 = vector.shape_cast %174 : vector<1x16x16x128xf32> to vector<16x16x128xf32>
    %176 = vector.shape_cast %173 : vector<16x16x128xf32> to vector<1x16x16x128xf32>
    tpu.vector_store %arg8[%c0_249, %c0_250, %c0_251, %c0_252], %176 {strides = array<i32>} : memref<1x16x16x128xf32, #tpu.memory_space<vmem>>, vector<1x16x16x128xf32>,
    return
  }
  func.func @transform_0(%arg0: i32) -> (i32, i32, i32, i32) {
    %c0_i32 = arith.constant 0 : i32
    %c0_i32_0 = arith.constant 0 : i32
    %c0_i32_1 = arith.constant 0 : i32
    %c0_i32_2 = arith.constant 0 : i32
    return %arg0, %c0_i32, %c0_i32_0, %c0_i32_1 : i32, i32, i32, i32
  }
  func.func @transform_1(%arg0: i32) -> (i32, i32, i32, i32) {
    %c0_i32 = arith.constant 0 : i32
    %c0_i32_0 = arith.constant 0 : i32
    %c0_i32_1 = arith.constant 0 : i32
    %c0_i32_2 = arith.constant 0 : i32
    %c0_i32_3 = arith.constant 0 : i32
    return %c0_i32, %c0_i32_0, %c0_i32_1, %c0_i32_2 : i32, i32, i32, i32
  }
  func.func @transform_2(%arg0: i32) -> (i32, i32) {
    %c0_i32 = arith.constant 0 : i32
    %c0_i32_0 = arith.constant 0 : i32
    %c0_i32_1 = arith.constant 0 : i32
    return %c0_i32, %c0_i32_0 : i32, i32
  }
  func.func @transform_3(%arg0: i32) -> (i32, i32, i32, i32) {
    %c0_i32 = arith.constant 0 : i32
    %c0_i32_0 = arith.constant 0 : i32
    %c0_i32_1 = arith.constant 0 : i32
    %c0_i32_2 = arith.constant 0 : i32
    %c0_i32_3 = arith.constant 0 : i32
    return %c0_i32, %c0_i32_0, %c0_i32_1, %c0_i32_2 : i32, i32, i32, i32
  }
  func.func @transform_4(%arg0: i32) -> (i32, i32) {
    %c0_i32 = arith.constant 0 : i32
    %c0_i32_0 = arith.constant 0 : i32
    %c0_i32_1 = arith.constant 0 : i32
    return %c0_i32, %c0_i32_0 : i32, i32
  }
  func.func @transform_5(%arg0: i32) -> (i32, i32, i32, i32) {
    %c0_i32 = arith.constant 0 : i32
    %c0_i32_0 = arith.constant 0 : i32
    %c0_i32_1 = arith.constant 0 : i32
    %c0_i32_2 = arith.constant 0 : i32
    return %arg0, %c0_i32, %c0_i32_0, %c0_i32_1 : i32, i32, i32, i32
  }
  func.func @transform_6(%arg0: i32) -> (i32, i32) {
    %c0_i32 = arith.constant 0 : i32
    %c0_i32_0 = arith.constant 0 : i32
    %c0_i32_1 = arith.constant 0 : i32
    return %c0_i32, %c0_i32_0 : i32, i32
  }
  func.func @transform_7(%arg0: i32) -> (i32, i32, i32, i32) {
    %c0_i32 = arith.constant 0 : i32
    %c0_i32_0 = arith.constant 0 : i32
    %c0_i32_1 = arith.constant 0 : i32
    %c0_i32_2 = arith.constant 0 : i32
    return %arg0, %c0_i32, %c0_i32_0, %c0_i32_1 : i32, i32, i32, i32
  }
}

</mosaic_0001>

<bundles_post_ra>
// kernel: tpu_custom_call.1
= control target key start
LH: loop header
LB: loop body
LE: loop exit
PB: predicated region body
PF: predicated region fallthrough
CT: control target
= control target key end

     0   :  { %12 = vsyncpa [#allocation6], 0  ;;  %s13839_s0 = inlined_call_operand.vmem [shape: f32[2,18,18,128], index: 0, kind: input, shape index: {}]   ;;  %s13840_s1 = inlined_call_operand.vmem [shape: f32[3,3,128,128], index: 1, kind: input, shape index: {}]   ;;  %s13841_s2 = inlined_call_operand.vmem [shape: f32[1,128], index: 2, kind: input, shape index: {}]   ;;  %s13842_s3 = inlined_call_operand.hbm [shape: f32[3,3,128,128], index: 3, kind: input, shape index: {}]   ;;  %s13843_s4 = inlined_call_operand.vmem [shape: f32[1,128], index: 4, kind: input, shape index: {}]   ;;  %s13844_s5 = inlined_call_operand.hbm [shape: f32[2,16,16,128], index: 5, kind: input, shape index: {}]   ;;  %s13845_s6 = inlined_call_operand.vmem [shape: f32[128,128], index: 6, kind: input, shape index: {}]   ;;  %s13846_s7 = inlined_call_operand.hbm [shape: f32[2,16,16,128], index: 7, kind: output, shape index: {}]  }
   0x1   :  { %13 = vsyncpa [#allocation9], 0 }
   0x2   :  { %15 = vsyncpa [#allocation9 + $0x1], 0 }
   0x3   :  { %16 = vsyncpa [#allocation7], 0 }
   0x4   :  { %18 = vsyncpa [#allocation7 + $0x1], 0  ;;  %s11778_s24 = smov 0   ;;  %s11780_s25 = smov 0  }
   0x5   :  { %s11782_s26 = smov 0   ;;  %s11784_s27 = smov 0  }
   0x6 LB: > { %s11799_s28 = sadd.s32 4294967295, %s11728_s27   ;;  %s7563_s29 = sadd.s32 4294967294, %s11728_s27   ;;  %s11728_s27 = sphi %s11784_s27, %s14101_s27   ;;  %s11724_s26 = sphi %s11782_s26, %s14100_s26   ;;  %s11720_s25 = sphi %s11780_s25, %s14099_s25   ;;  %s11716_s24 = sphi %s11778_s24, %s14098_s24  }
   0x7   : > { %p154_p0 = scmp.ne.s32.totalorder %s11720_s25, %s11716_s24  ;;  %p13847_p1 = scmp.eq.s32.totalorder %s11799_s28, 0 }
   0x8   : > { %p205_p3 = scmp.eq.s32.totalorder %s7563_s29, 1  ;;  %p7564_p5 = scmp.ge.s32.totalorder %s11728_s27, 1 }
   0x9   : > { %p11808_p4 = por %p13847_p1, %p154_p0  ;;  %p212_p7 = scmp.lt.s32.totalorder %s11728_s27, 3 }
   0xa   : > { %p11813_p6 = por %p205_p3, %p154_p0  ;;  %s11730_s10 = smov [#allocation5]  }
   0xb   : > { %s13927_s30 = scalar_select %p11808_p4, 1, 0 }
   0xc   : > { %s13928_s8 = scalar_select %p11813_p6, 1, 0 }
   0xd   : > { %p11818_p8 = pnand %p7564_p5, %p212_p7  ;;  %s230_s11 = sshll.u32 %s11730_s10, 4  ;;  %s11822_s11 = int_to_ptr.vmem [resolvable:$true] %s230_s11 }
   0xe   : > { %s11834_s13 = sadd.s32 1, %s11728_s27   ;;  %s141_s14 = sadd.s32 1, %s11724_s26 }
   0xf   : > { %s13929_s9 = scalar_select %p11818_p8, 1, 0 }
  0x10   : > { %p11545_p9 = pneg %p11818_p8  ;;  %s138_s15 = ssub.s32 %s11728_s27, %s11834_s13 }
  0x11   : > { %s11600_s18 = scalar_lea.hbm %s13842_s3, 18432 }
  0x12   : > { %p11829_p11 = pnand %p11545_p9, %p13847_p1  ;;  %p11601_p12 = scmp.ne.s32.totalorder %s13842_s3, %s11600_s18 }
  0x13   : > { %p11607_p5 = scmp.lt.u32.totalorder %s11600_s18, %s13842_s3 }
  0x14   : > { %p11602_p13 = pneg %p11829_p11 }
  0x16   : > { %p11603_p0 = pnand %p11602_p13, %p11601_p12 }
  0x18   : > { %p11604_p3 = pneg %p11603_p0 }
  0x1a   : > { %p11609_p7 = pnand %p11607_p5, %p11604_p3 }
  0x1c   : > { %11612 = shalt.err (!%p11609_p7)
}
  0x1d   : > { %s11613_s23 = scalar_lea.vmem %s11822_s11, 18432  ;;  %p11621_p2 = scmp.lt.s32.totalorder %s11822_s11, %s11822_s11 }
  0x1e   : > { %p11614_p9 = scmp.ne.s32.totalorder %s11822_s11, %s11613_s23  ;;  %p11622_p6 = scmp.lt.s32.totalorder %s11613_s23, %s11613_s23 }
  0x20   : > { %p11616_p10 = pnand %p11614_p9, %p11602_p13  ;;  %p11623_p4 = por %p11622_p6, %p11621_p2 }
  0x22   : > { %p11617_p1 = pneg %p11616_p10 }
  0x24   : > { %p11624_p8 = pnand %p11623_p4, %p11617_p1 }
  0x26   : > { %11627 = shalt.err (!%p11624_p8)
}
  0x27   : > { %s13850_s29 = smov 128   ;;  %s11732_s10 = smov 8  }
  0x28   : > { %11548 = dma.hbm_to_vmem [thread:$0]  (!%p11829_p11), %s13842_s3, 18432, %s11822_s11, [#allocation6], %s13850_s29, %s13850_s29, %s11732_s10  }
  0x29   : > { %p139_p1 = scmp.eq.s32.totalorder %s138_s15, 0  ;;  %p148_p2 = scmp.ne.s32.totalorder %s11724_s26, %s11720_s25 }
  0x2a   : > { %p149_p4 = scmp.eq.s32.totalorder %s11728_s27, 0  ;;  %p11558_p6 = scmp.lt.s32.totalorder %s11728_s27, 2 }
  0x2b   : > { %s11868_s18 = scalar_select %p139_p1, %s11724_s26, %s141_s14  }
  0x2c   : > { %p150_p8 = por %p149_p4, %p148_p2  ;;  %p13931_p10 = scmp.eq.s32.totalorder %s11799_s28, 1 }
  0x2d   : > { %s258_s12 = sand.u32 1, %s11724_s26   ;;  %s7902_s20 = sshll.u32 %s11728_s27, 12 }
  0x2e   : > { %p11872_p12 = por %p13931_p10, %p148_p2  ;;  %s7567_s21 = sshll.u32 %s258_s12, 8 }
  0x2f   : > { %s11881_s16 = scalar_lea.hbm %s13844_s5, %s7902_s20  ;;  %s262_s11 = scalar_lea.vmem [#allocation8], %s7567_s21 }
  0x30   : > { %s269_s14 = sshll.u32 %s262_s11, 4  ;;  %p11883_p11 = pnand %p11558_p6, %p150_p8  ;;  %s11887_s14 = int_to_ptr.vmem [resolvable:$true] %s269_s14 }
  0x31   : > { %s11889_s17 = scalar_lea.sflag [#allocation9], %s258_s12  ;;  %s11628_s29 = scalar_lea.hbm %s11881_s16, 4096 }
  0x32   : > { %p11629_p13 = scmp.ne.s32.totalorder %s11881_s16, %s11628_s29  ;;  %p11630_p0 = pneg %p11883_p11 }
  0x33   : > { %s11633_s22 = scalar_lea.hbm %s13844_s5, 8192  ;;  %p11634_p7 = scmp.lt.u32.totalorder %s11881_s16, %s13844_s5 }
  0x34   : > { %p11631_p3 = pnand %p11630_p0, %p11629_p13  ;;  %p11635_p9 = scmp.lt.u32.totalorder %s11633_s22, %s11628_s29 }
  0x35   : > { %p11637_p2 = scmp.lt.u32.totalorder %s11628_s29, %s11881_s16 }
  0x36   : > { %p11632_p5 = pneg %p11631_p3  ;;  %p11636_p1 = por %p11635_p9, %p11634_p7 }
  0x38   : > { %p11638_p4 = por %p11637_p2, %p11636_p1 }
  0x3a   : > { %p11639_p6 = pnand %p11638_p4, %p11632_p5 }
  0x3c   : > { %11642 = shalt.err (!%p11639_p6)
}
  0x3d   : > { %s11643_s12 = scalar_lea.vmem %s11887_s14, 4096  ;;  %s11733_s20 = smov [#allocation8]  }
  0x3e   : > { %p11644_p8 = scmp.ne.s32.totalorder %s11887_s14, %s11643_s12  ;;  %s11648_s21 = sshll.u32 %s11733_s20, 4  ;;  %s11649_s21 = int_to_ptr.vmem [resolvable:$false] %s11648_s21 }
  0x3f   : > { %s11650_s23 = scalar_lea.vmem %s11649_s21, 8192  ;;  %p11651_p3 = scmp.lt.s32.totalorder %s11887_s14, %s11649_s21 }
  0x40   : > { %p11646_p10 = pnand %p11644_p8, %p11630_p0  ;;  %p11652_p7 = scmp.lt.s32.totalorder %s11650_s23, %s11643_s12 }
  0x42   : > { %p11647_p13 = pneg %p11646_p10  ;;  %p11653_p9 = por %p11652_p7, %p11651_p3 }
  0x44   : > { %p11654_p1 = pnand %p11653_p9, %p11647_p13 }
  0x46   : > { %11657 = shalt.err (!%p11654_p1)
}
  0x47   : > { %s13934_s29 = smov 128   ;;  %p13935_p0 = scmp.ne.s32.totalorder %s13929_s9, 0 }
  0x48   : > { %11552 = dma.hbm_to_vmem [thread:$0]  (!%p11883_p11), %s11881_s16, 4096, %s11887_s14, %s11889_s17, %s13934_s29, %s13934_s29, %s11732_s10  }
  0x49   : > { %281 = sbr.rel (%p13935_p0) target bundleno = 1723 (0x6bb), region = 48 }
  0x50   : > { %p13936_p5 = scmp.eq.s32.totalorder %s11799_s28, 0 }
  0x52   : > { %11703 = dma.done.wait (%p13936_p5), [#allocation6], 18432   ;;  %p13937_p2 = pmov %p13936_p5 }
  0x53   : > { %s11927_s22 = sand.u32 1, %s11720_s25   ;;  %p13938_p11 = scmp.ne.s32.totalorder %s13927_s30, 0 }
  0x54   : > { %11705 = vsyncadd (%p13937_p2), [#allocation6], 4294948864  ;;  %s13851_s15 = sshll.u32 %s11927_s22, 8  ;;  %s288_s11 = scalar_lea.sflag [#allocation9], %s11927_s22 }
  0x55   : > { %s11933_s10 = scalar_lea.vmem [#allocation8], %s13851_s15 }
  0x56   : > { %11707 = dma.done.wait (%p13938_p11), %s288_s11, 4096  }
  0x57   : > { %11709 = vsyncadd (%p13938_p11), %s288_s11, 4294963200  ;;  %p327_p4 = scmp.lt.s32.totalorder %s11799_s28, 1  ;;  %v364_v0 = vld [vmem:[%s13840_s1] sm:$0xff]  ;;  %v365_v1 = vld [vmem:[%s13840_s1 + $0x8] sm:$0xff]  ;;  %s7903_s23 = sshll.u32 %s11799_s28, 12 }
  0x58   : > { %v366_v2 = vld [vmem:[%s13840_s1 + $0x10] sm:$0xff]  ;;  %v10336_v3 = vpack.c.bf16 %v365_v1, %v364_v0  ;;  %v367_v4 = vld [vmem:[%s13840_s1 + $0x18] sm:$0xff]  ;;  %v368_v6 = vld [vmem:[%s13840_s1 + $0x20] sm:$0xff]  ;;  %s13790_s11 = scalar_lea.hbm %s13846_s7, %s7903_s23  ;;  %s11735_s14 = smov [#allocation10]  }
  0x59   : > { %s328_s9 = scalar_select %p327_p4, %s11799_s28, 1  ;;  %v10340_v5 = vpack.c.bf16 %v367_v4, %v366_v2  ;;  %v369_v7 = vld [vmem:[%s13840_s1 + $0x28] sm:$0xff]  ;;  %v370_v10 = vld [vmem:[%s13840_s1 + $0x30] sm:$0xff]  ;;  %v371_v11 = vld [vmem:[%s13840_s1 + $0x38] sm:$0xff] }
  0x5a   : > { %10337 = vmatprep.subr.bf16.mxu0 %v10336_v3  ;;  %v10344_v8 = vpack.c.bf16 %v369_v7, %v368_v6  ;;  %v10348_v12 = vpack.c.bf16 %v371_v11, %v370_v10  ;;  %v372_v13 = vld [vmem:[%s13840_s1 + $0x40] sm:$0xff]  ;;  %v373_v14 = vld [vmem:[%s13840_s1 + $0x48] sm:$0xff]  ;;  %v374_v16 = vld [vmem:[%s13840_s1 + $0x50] sm:$0xff]  ;;  %s7453_s28 = scalar_lea.sflag [#allocation7], %s11927_s22  ;;  %s11662_s17 = sshll.u32 %s11735_s14, 4  ;;  %s11663_s17 = int_to_ptr.vmem [resolvable:$false] %s11662_s17 }
  0x5b   : > { %s11536_s16 = smul.u32 432, %s328_s9  ;;  %10339 = vmatpush3.bf16.msra.mxu0 %v10336_v3  ;;  %v10352_v15 = vpack.c.bf16 %v373_v14, %v372_v13  ;;  %v375_v17 = vld [vmem:[%s13840_s1 + $0x58] sm:$0xff]  ;;  %v376_v19 = vld [vmem:[%s13840_s1 + $0x60] sm:$0xff]  ;;  %v377_v20 = vld [vmem:[%s13840_s1 + $0x68] sm:$0xff]  ;;  %s11664_s12 = scalar_lea.vmem %s11663_s17, 8192 }
  0x5c   : > { %10341 = vmatprep.subr.bf16.mxu0 %v10340_v5  ;;  %v10356_v18 = vpack.c.bf16 %v375_v17, %v374_v16  ;;  %v10360_v21 = vpack.c.bf16 %v377_v20, %v376_v19  ;;  %v378_v22 = vld [vmem:[%s13840_s1 + $0x70] sm:$0xff]  ;;  %v379_v23 = vld [vmem:[%s13840_s1 + $0x78] sm:$0xff]  ;;  %v7575_v25 = vld [vmem:[%s13840_s1 + $0x80] sm:$0xff] }
  0x5d   : > { %s11962_s15 = scalar_lea.vmem %s13839_s0, %s11536_s16  ;;  %v10364_v24 = vpack.c.bf16 %v379_v23, %v378_v22  ;;  %v7576_v26 = vld [vmem:[%s13840_s1 + $0x88] sm:$0xff]  ;;  %v7577_v28 = vld [vmem:[%s13840_s1 + $0x90] sm:$0xff]  ;;  %v7578_v29 = vld [vmem:[%s13840_s1 + $0x98] sm:$0xff] }
  0x5e   : > { %v332_v9 = vld [vmem:[%s11962_s15] sm:$0xff]  ;;  %v10368_v27 = vpack.c.bf16 %v7576_v26, %v7575_v25  ;;  %v333_v30 = vld [vmem:[%s11962_s15 + $0x8] sm:$0xff]  ;;  %v12009_v31 = vld [vmem:[%s11962_s15 + $0x18] sm:$0xff]  ;;  %v10372_v32 = vpack.c.bf16 %v7578_v29, %v7577_v28 }
  0x5f   : > { %8848 = vmatprep.mubr.f32.mxu0 %v332_v9  ;;  %10343 = vmatpush3.bf16.msra.mxu0 %v10340_v5  ;;  %v7579_v33 = vld [vmem:[%s13840_s1 + $0xa0] sm:$0xff]  ;;  %v7580_v34 = vld [vmem:[%s13840_s1 + $0xa8] sm:$0xff]  ;;  %v12022_v36 = vld [vmem:[%s11962_s15 + $0x30] sm:$0xff] }
  0x60   : > { %10345 = vmatprep.subr.bf16.mxu0 %v10344_v8  ;;  %v12019_v35 = vld [vmem:[%s11962_s15 + $0x20] sm:$0xff]  ;;  %v10376_v37 = vpack.c.bf16 %v7580_v34, %v7579_v33  ;;  %v7581_v38 = vld [vmem:[%s13840_s1 + $0xb0] sm:$0xff]  ;;  %v7582_v39 = vld [vmem:[%s13840_s1 + $0xb8] sm:$0xff] }
  0x61   : > { %v12033_v40 = vld [vmem:[%s11962_s15 + $0x38] sm:$0xff]  ;;  %v12036_v41 = vld [vmem:[%s11962_s15 + $0x48] sm:$0xff]  ;;  %v10380_v42 = vpack.c.bf16 %v7582_v39, %v7581_v38  ;;  %v7583_v43 = vld [vmem:[%s13840_s1 + $0xc0] sm:$0xff] }
  0x62   : > { %v7584_v44 = vld [vmem:[%s13840_s1 + $0xc8] sm:$0xff]  ;;  %v12047_v45 = vld [vmem:[%s11962_s15 + $0x50] sm:$0xff]  ;;  %v12050_v46 = vld [vmem:[%s11962_s15 + $0x60] sm:$0xff] }
  0x63   : > { %10347 = vmatpush3.bf16.msra.mxu0 %v10344_v8  ;;  %v10384_v47 = vpack.c.bf16 %v7584_v44, %v7583_v43  ;;  %v7585_v48 = vld [vmem:[%s13840_s1 + $0xd0] sm:$0xff]  ;;  %v7586_v49 = vld [vmem:[%s13840_s1 + $0xd8] sm:$0xff]  ;;  %v12061_v50 = vld [vmem:[%s11962_s15 + $0x68] sm:$0xff] }
  0x64   : > { %10349 = vmatprep.subr.bf16.mxu0 %v10348_v12  ;;  %v12064_v51 = vld [vmem:[%s11962_s15 + $0x78] sm:$0xff]  ;;  %v10388_v52 = vpack.c.bf16 %v7586_v49, %v7585_v48  ;;  %v7587_v53 = vld [vmem:[%s13840_s1 + $0xe0] sm:$0xff]  ;;  %v7588_v54 = vld [vmem:[%s13840_s1 + $0xe8] sm:$0xff] }
  0x65   : > { %v12075_v55 = vld [vmem:[%s11962_s15 + $0x80] sm:$0xff]  ;;  %v12078_v56 = vld [vmem:[%s11962_s15 + $0x90] sm:$0xff]  ;;  %v10392_v57 = vpack.c.bf16 %v7588_v54, %v7587_v53  ;;  %v7590_v59 = vld [vmem:[%s13840_s1 + $0xf8] sm:$0xff] }
  0x66   : > { %v7589_v58 = vld [vmem:[%s13840_s1 + $0xf0] sm:$0xff]  ;;  %v12089_v60 = vld [vmem:[%s11962_s15 + $0x98] sm:$0xff]  ;;  %v12092_v61 = vld [vmem:[%s11962_s15 + $0xa8] sm:$0xff] }
  0x67   : > { %10351 = vmatpush3.bf16.msra.mxu0 %v10348_v12  ;;  %v10396_v62 = vpack.c.bf16 %v7590_v59, %v7589_v58  ;;  %v7591_v63 = vld [vmem:[%s13840_s1 + $0x100] sm:$0xff]  ;;  %v7592_v0 = vld [vmem:[%s13840_s1 + $0x108] sm:$0xff]  ;;  %v12103_v1 = vld [vmem:[%s11962_s15 + $0xb0] sm:$0xff] }
  0x68   : > { %10353 = vmatprep.subr.bf16.mxu0 %v10352_v15  ;;  %v12106_v2 = vld [vmem:[%s11962_s15 + $0xc0] sm:$0xff]  ;;  %v10400_v3 = vpack.c.bf16 %v7592_v0, %v7591_v63  ;;  %v12111_v4 = vld [vmem:[%s11962_s15 + $0xc8] sm:$0xff]  ;;  %v12114_v5 = vld [vmem:[%s11962_s15 + $0xd8] sm:$0xff] }
  0x69   : > { %v12119_v6 = vld [vmem:[%s11962_s15 + $0xe0] sm:$0xff]  ;;  %v12122_v7 = vld [vmem:[%s11962_s15 + $0xf0] sm:$0xff]  ;;  %v12127_v8 = vld [vmem:[%s11962_s15 + $0xf8] sm:$0xff] }
  0x6a   : > { %v12130_v9 = vld [vmem:[%s11962_s15 + $0x108] sm:$0xff]  ;;  %v12135_v10 = vld [vmem:[%s11962_s15 + $0x110] sm:$0xff]  ;;  %v12138_v11 = vld [vmem:[%s11962_s15 + $0x120] sm:$0xff] }
  0x6b   : > { %10355 = vmatpush3.bf16.msra.mxu0 %v10352_v15  ;;  %v12143_v12 = vld [vmem:[%s11962_s15 + $0x128] sm:$0xff]  ;;  %v12146_v13 = vld [vmem:[%s11962_s15 + $0x138] sm:$0xff]  ;;  %v12151_v14 = vld [vmem:[%s11962_s15 + $0x140] sm:$0xff] }
  0x6c   : > { %10357 = vmatprep.subr.bf16.mxu0 %v10356_v18  ;;  %v12154_v15 = vld [vmem:[%s11962_s15 + $0x150] sm:$0xff]  ;;  %v12159_v16 = vld [vmem:[%s11962_s15 + $0x158] sm:$0xff]  ;;  %v12162_v17 = vld [vmem:[%s11962_s15 + $0x168] sm:$0xff] }
  0x6d   : > { %v637_v19 = vld [vmem:[%s11962_s15 + $0x1] sm:$0xff]  ;;  %v7593_v20 = vld [vmem:[%s13840_s1 + $0x110] sm:$0xff]  ;;  %v12179_v23 = vld [vmem:[%s11962_s15 + $0x19] sm:$0xff] }
  0x6e   : > { %v638_v22 = vld [vmem:[%s11962_s15 + $0x9] sm:$0xff]  ;;  %v7595_v25 = vld [vmem:[%s13840_s1 + $0x120] sm:$0xff]  ;;  %v12192_v28 = vld [vmem:[%s11962_s15 + $0x31] sm:$0xff] }
  0x6f   : > { %10359 = vmatpush3.bf16.msra.mxu0 %v10356_v18  ;;  %v12167_v18 = vld [vmem:[%s11962_s15 + $0x170] sm:$0xff]  ;;  %v7596_v26 = vld [vmem:[%s13840_s1 + $0x128] sm:$0xff]  ;;  %v12203_v33 = vld [vmem:[%s11962_s15 + $0x39] sm:$0xff] }
  0x70   : > { %10361 = vmatprep.subr.bf16.mxu0 %v10360_v21  ;;  %v10408_v29 = vpack.c.bf16 %v7596_v26, %v7595_v25  ;;  %v12206_v34 = vld [vmem:[%s11962_s15 + $0x49] sm:$0xff]  ;;  %v7599_v38 = vld [vmem:[%s13840_s1 + $0x140] sm:$0xff]  ;;  %v7602_v48 = vld [vmem:[%s13840_s1 + $0x158] sm:$0xff] }
  0x71   : > { %v7600_v39 = vld [vmem:[%s13840_s1 + $0x148] sm:$0xff]  ;;  %v7603_v54 = vld [vmem:[%s13840_s1 + $0x160] sm:$0xff]  ;;  %v12248_v59 = vld [vmem:[%s11962_s15 + $0x91] sm:$0xff] }
  0x72   : > { %v12220_v43 = vld [vmem:[%s11962_s15 + $0x61] sm:$0xff]  ;;  %v10416_v44 = vpack.c.bf16 %v7600_v39, %v7599_v38  ;;  %v12231_v49 = vld [vmem:[%s11962_s15 + $0x69] sm:$0xff]  ;;  %v7606_v0 = vld [vmem:[%s13840_s1 + $0x178] sm:$0xff] }
  0x73   : > { %10363 = vmatpush3.bf16.msra.mxu0 %v10360_v21  ;;  %v7594_v21 = vld [vmem:[%s13840_s1 + $0x118] sm:$0xff]  ;;  %v12245_v58 = vld [vmem:[%s11962_s15 + $0x81] sm:$0xff]  ;;  %v7605_v63 = vld [vmem:[%s13840_s1 + $0x170] sm:$0xff] }
  0x74   : > { %10365 = vmatprep.subr.bf16.mxu0 %v10364_v24  ;;  %v12276_v25 = vld [vmem:[%s11962_s15 + $0xc1] sm:$0xff]  ;;  %v12297_v38 = vld [vmem:[%s11962_s15 + $0xf9] sm:$0xff]  ;;  %v12300_v39 = vld [vmem:[%s11962_s15 + $0x109] sm:$0xff] }
  0x77   : > { %10367 = vmatpush3.bf16.msra.mxu0 %v10364_v24  ;;  %v10404_v24 = vpack.c.bf16 %v7594_v21, %v7593_v20  ;;  %v10428_v20 = vpack.c.bf16 %v7606_v0, %v7605_v63  ;;  %v7639_v21 = vld [vmem:[%s13840_s1 + $0x180] sm:$0xff]  ;;  %v12332_v63 = vld [vmem:[%s11962_s15 + $0x169] sm:$0xff]  ;;  %v12337_v0 = vld [vmem:[%s11962_s15 + $0x171] sm:$0xff] }
  0x78   : > { %10369 = vmatprep.subr.bf16.mxu0 %v10368_v27  ;;  %13944 = vst [vmem:[#allocation19_spill] sm:$0xff] %v12332_v63  ;;  %13945 = vst [vmem:[#allocation20_spill] sm:$0xff] %v12337_v0 }
  0x7a   : > { %8849 = vmatmul.mubr.f32.vlgmr.msra.gmra.mrb[0].mxu0 %v333_v30  ;;  %v7597_v30 = vld [vmem:[%s13840_s1 + $0x130] sm:$0xff] }
  0x7b   : > { %10371 = vmatpush3.bf16.msra.mxu0 %v10368_v27  ;;  %8851 = vmatprep.mubr.f32.mxu0 %v12009_v31  ;;  %v12189_v27 = vld [vmem:[%s11962_s15 + $0x21] sm:$0xff] }
  0x7c   : > { %10373 = vmatprep.subr.bf16.mxu0 %v10372_v32 }
  0x7e   : > { %8852 = vmatmul.mubr.f32.gmra.mrb[2].mxu0 %v12019_v35 }
  0x7f   : > { %8854 = vmatprep.mubr.f32.mxu0 %v12022_v36  ;;  %10375 = vmatpush3.bf16.msra.mxu0 %v10372_v32  ;;  %v7598_v32 = vld [vmem:[%s13840_s1 + $0x138] sm:$0xff] }
  0x80   : > { %10377 = vmatprep.subr.bf16.mxu0 %v10376_v37 }
  0x82   : > { %8855 = vmatmul.mubr.f32.gmra.mrb[4].mxu0 %v12033_v40 }
  0x83   : > { %8857 = vmatprep.mubr.f32.mxu0 %v12036_v41  ;;  %10379 = vmatpush3.bf16.msra.mxu0 %v10376_v37  ;;  %v10412_v37 = vpack.c.bf16 %v7598_v32, %v7597_v30  ;;  %v12284_v30 = vld [vmem:[%s11962_s15 + $0xd9] sm:$0xff]  ;;  %v12289_v32 = vld [vmem:[%s11962_s15 + $0xe1] sm:$0xff] }
  0x84   : > { %10381 = vmatprep.subr.bf16.mxu0 %v10380_v42 }
  0x86   : > { %8858 = vmatmul.mubr.f32.gmra.mrb[6].mxu0 %v12047_v45 }
  0x87   : > { %8860 = vmatprep.mubr.f32.mxu0 %v12050_v46  ;;  %10383 = vmatpush3.bf16.msra.mxu0 %v10380_v42  ;;  %v12217_v42 = vld [vmem:[%s11962_s15 + $0x51] sm:$0xff] }
  0x88   : > { %10385 = vmatprep.subr.bf16.mxu0 %v10384_v47 }
  0x8a   : > { %8861 = vmatmul.mubr.f32.gmra.mrb[8].mxu0 %v12061_v50 }
  0x8b   : > { %8863 = vmatprep.mubr.f32.mxu0 %v12064_v51  ;;  %10387 = vmatpush3.bf16.msra.mxu0 %v10384_v47  ;;  %v7601_v47 = vld [vmem:[%s13840_s1 + $0x150] sm:$0xff] }
  0x8c   : > { %10389 = vmatprep.subr.bf16.mxu0 %v10388_v52  ;;  %v10420_v53 = vpack.c.bf16 %v7602_v48, %v7601_v47  ;;  %v12308_v47 = vld [vmem:[%s11962_s15 + $0x121] sm:$0xff]  ;;  %v12313_v48 = vld [vmem:[%s11962_s15 + $0x129] sm:$0xff] }
  0x8d   : > { %13939 = vst [vmem:[#allocation14_spill] sm:$0xff] %v12313_v48 }
  0x8e   : > { %8864 = vmatmul.mubr.f32.gmra.mrb[10].mxu0 %v12075_v55 }
  0x8f   : > { %8866 = vmatprep.mubr.f32.mxu0 %v12078_v56  ;;  %10391 = vmatpush3.bf16.msra.mxu0 %v10388_v52  ;;  %v12234_v52 = vld [vmem:[%s11962_s15 + $0x79] sm:$0xff] }
  0x90   : > { %10393 = vmatprep.subr.bf16.mxu0 %v10392_v57 }
  0x92   : > { %8867 = vmatmul.mubr.f32.gmra.mrb[12].mxu0 %v12089_v60 }
  0x93   : > { %8869 = vmatprep.mubr.f32.mxu0 %v12092_v61  ;;  %10395 = vmatpush3.bf16.msra.mxu0 %v10392_v57  ;;  %v7604_v57 = vld [vmem:[%s13840_s1 + $0x168] sm:$0xff] }
  0x94   : > { %10397 = vmatprep.subr.bf16.mxu0 %v10396_v62 }
  0x96   : > { %8870 = vmatmul.mubr.f32.gmra.mrb[14].mxu0 %v12103_v1 }
  0x97   : > { %8872 = vmatprep.mubr.f32.mxu0 %v12106_v2  ;;  %10399 = vmatpush3.bf16.msra.mxu0 %v10396_v62  ;;  %v10424_v62 = vpack.c.bf16 %v7604_v57, %v7603_v54  ;;  %v12321_v54 = vld [vmem:[%s11962_s15 + $0x141] sm:$0xff]  ;;  %v12324_v57 = vld [vmem:[%s11962_s15 + $0x151] sm:$0xff] }
  0x98   : > { %10401 = vmatprep.subr.bf16.mxu0 %v10400_v3  ;;  %13941 = vst [vmem:[#allocation16_spill] sm:$0xff] %v12321_v54  ;;  %13942 = vst [vmem:[#allocation17_spill] sm:$0xff] %v12324_v57 }
  0x9a   : > { %8873 = vmatmul.mubr.f32.gmra.mrb[16].mxu0 %v12111_v4 }
  0x9b   : > { %8875 = vmatprep.mubr.f32.mxu0 %v12114_v5 }
  0x9e   : > { %8876 = vmatmul.mubr.f32.gmra.mrb[18].mxu0 %v12119_v6 }
  0x9f   : > { %8878 = vmatprep.mubr.f32.mxu0 %v12122_v7 }
  0xa2   : > { %8879 = vmatmul.mubr.f32.gmra.mrb[20].mxu0 %v12127_v8 }
  0xa3   : > { %8881 = vmatprep.mubr.f32.mxu0 %v12130_v9 }
  0xa6   : > { %8882 = vmatmul.mubr.f32.gmra.mrb[22].mxu0 %v12135_v10 }
  0xa7   : > { %8884 = vmatprep.mubr.f32.mxu0 %v12138_v11 }
  0xaa   : > { %8885 = vmatmul.mubr.f32.gmra.mrb[24].mxu0 %v12143_v12 }
  0xab   : > { %8887 = vmatprep.mubr.f32.mxu0 %v12146_v13 }
  0xae   : > { %8888 = vmatmul.mubr.f32.gmra.mrb[26].mxu0 %v12151_v14 }
  0xaf   : > { %8890 = vmatprep.mubr.f32.mxu0 %v12154_v15 }
  0xb2   : > { %8891 = vmatmul.mubr.f32.gmra.mrb[28].mxu0 %v12159_v16 }
  0xb3   : > { %8893 = vmatprep.mubr.f32.mxu0 %v12162_v17 }
  0xb6   : > { %8894 = vmatmul.mubr.f32.gmra.mrb[30].mxu0 %v12167_v18 }
  0xb7   : > { %8928 = vmatprep.mubr.f32.mxu0 %v637_v19  ;;  %v12262_v19 = vld [vmem:[%s11962_s15 + $0xa9] sm:$0xff] }
  0xba   : > { %8929 = vmatmul.mubr.f32.vlgmr.msra.gmra.mrb[0].mxu0 %v638_v22  ;;  %v7640_v22 = vld [vmem:[%s13840_s1 + $0x188] sm:$0xff] }
  0xbb   : > { %10403 = vmatpush3.bf16.msra.mxu0 %v10400_v3  ;;  %8931 = vmatprep.mubr.f32.mxu0 %v12179_v23  ;;  %v12259_v3 = vld [vmem:[%s11962_s15 + $0x99] sm:$0xff]  ;;  %v10432_v26 = vpack.c.bf16 %v7640_v22, %v7639_v21  ;;  %v7641_v21 = vld [vmem:[%s13840_s1 + $0x190] sm:$0xff] }
  0xbc   : > { %10405 = vmatprep.subr.bf16.mxu0 %v10404_v24  ;;  %v7642_v22 = vld [vmem:[%s13840_s1 + $0x198] sm:$0xff] }
  0xbe   : > { %8932 = vmatmul.mubr.f32.gmra.mrb[2].mxu0 %v12189_v27 }
  0xbf   : > { %8934 = vmatprep.mubr.f32.mxu0 %v12192_v28  ;;  %10407 = vmatpush3.bf16.msra.mxu0 %v10404_v24  ;;  %v12273_v24 = vld [vmem:[%s11962_s15 + $0xb1] sm:$0xff] }
  0xc0   : > { %10409 = vmatprep.subr.bf16.mxu0 %v10408_v29 }
  0xc2   : > { %8935 = vmatmul.mubr.f32.gmra.mrb[4].mxu0 %v12203_v33 }
  0xc3   : > { %8937 = vmatprep.mubr.f32.mxu0 %v12206_v34  ;;  %10411 = vmatpush3.bf16.msra.mxu0 %v10408_v29  ;;  %v12281_v29 = vld [vmem:[%s11962_s15 + $0xc9] sm:$0xff] }
  0xc4   : > { %10413 = vmatprep.subr.bf16.mxu0 %v10412_v37 }
  0xc6   : > { %8938 = vmatmul.mubr.f32.gmra.mrb[6].mxu0 %v12217_v42 }
  0xc7   : > { %8940 = vmatprep.mubr.f32.mxu0 %v12220_v43  ;;  %10415 = vmatpush3.bf16.msra.mxu0 %v10412_v37  ;;  %v12292_v37 = vld [vmem:[%s11962_s15 + $0xf1] sm:$0xff] }
  0xc8   : > { %10417 = vmatprep.subr.bf16.mxu0 %v10416_v44 }
  0xca   : > { %8941 = vmatmul.mubr.f32.gmra.mrb[8].mxu0 %v12231_v49 }
  0xcb   : > { %8943 = vmatprep.mubr.f32.mxu0 %v12234_v52  ;;  %10419 = vmatpush3.bf16.msra.mxu0 %v10416_v44  ;;  %v12305_v44 = vld [vmem:[%s11962_s15 + $0x111] sm:$0xff] }
  0xcc   : > { %10421 = vmatprep.subr.bf16.mxu0 %v10420_v53 }
  0xce   : > { %8944 = vmatmul.mubr.f32.gmra.mrb[10].mxu0 %v12245_v58 }
  0xcf   : > { %8946 = vmatprep.mubr.f32.mxu0 %v12248_v59  ;;  %10423 = vmatpush3.bf16.msra.mxu0 %v10420_v53  ;;  %v12316_v53 = vld [vmem:[%s11962_s15 + $0x139] sm:$0xff] }
  0xd0   : > { %10425 = vmatprep.subr.bf16.mxu0 %v10424_v62  ;;  %13940 = vst [vmem:[#allocation15_spill] sm:$0xff] %v12316_v53 }
  0xd2   : > { %8947 = vmatmul.mubr.f32.gmra.mrb[12].mxu0 %v12259_v3 }
  0xd3   : > { %8949 = vmatprep.mubr.f32.mxu0 %v12262_v19  ;;  %10427 = vmatpush3.bf16.msra.mxu0 %v10424_v62  ;;  %v12329_v62 = vld [vmem:[%s11962_s15 + $0x159] sm:$0xff] }
  0xd4   : > { %10429 = vmatprep.subr.bf16.mxu0 %v10428_v20  ;;  %13943 = vst [vmem:[#allocation18_spill] sm:$0xff] %v12329_v62 }
  0xd6   : > { %8950 = vmatmul.mubr.f32.gmra.mrb[14].mxu0 %v12273_v24 }
  0xd7   : > { %8952 = vmatprep.mubr.f32.mxu0 %v12276_v25  ;;  %10431 = vmatpush3.bf16.msra.mxu0 %v10428_v20  ;;  %v1007_v20 = vld [vmem:[%s11962_s15 + $0x2] sm:$0xff] }
  0xd8   : > { %10433 = vmatprep.subr.bf16.mxu0 %v10432_v26 }
  0xda   : > { %8953 = vmatmul.mubr.f32.gmra.mrb[16].mxu0 %v12281_v29 }
  0xdb   : > { %8955 = vmatprep.mubr.f32.mxu0 %v12284_v30 }
  0xde   : > { %8956 = vmatmul.mubr.f32.gmra.mrb[18].mxu0 %v12289_v32 }
  0xdf   : > { %8958 = vmatprep.mubr.f32.mxu0 %v12292_v37 }
  0xe2   : > { %8959 = vmatmul.mubr.f32.gmra.mrb[20].mxu0 %v12297_v38 }
  0xe3   : > { %8961 = vmatprep.mubr.f32.mxu0 %v12300_v39 }
  0xe6   : > { %8962 = vmatmul.mubr.f32.gmra.mrb[22].mxu0 %v12305_v44 }
  0xe7   : > { %8964 = vmatprep.mubr.f32.mxu0 %v12308_v47 }
  0xea   : > { %8965 = vmatmul.mubr.f32.gmra.mrb[24].mxu0 %v12313_v48  ;;  %v7646_v48 = vld [vmem:[%s13840_s1 + $0x1b8] sm:$0xff] }
  0xeb   : > { %8967 = vmatprep.mubr.f32.mxu0 %v12316_v53  ;;  %v7644_v53 = vld [vmem:[%s13840_s1 + $0x1a8] sm:$0xff] }
  0xee   : > { %8968 = vmatmul.mubr.f32.gmra.mrb[26].mxu0 %v12321_v54  ;;  %v7643_v54 = vld [vmem:[%s13840_s1 + $0x1a0] sm:$0xff] }
  0xef   : > { %8970 = vmatprep.mubr.f32.mxu0 %v12324_v57  ;;  %v1008_v57 = vld [vmem:[%s11962_s15 + $0xa] sm:$0xff] }
  0xf2   : > { %8971 = vmatmul.mubr.f32.gmra.mrb[28].mxu0 %v12329_v62  ;;  %v12349_v62 = vld [vmem:[%s11962_s15 + $0x1a] sm:$0xff] }
  0xf3   : > { %8973 = vmatprep.mubr.f32.mxu0 %v12332_v63  ;;  %13946 = vst [vmem:[#allocation21_spill] sm:$0xff] %v12349_v62  ;;  %v10436_v63 = vpack.c.bf16 %v7642_v22, %v7641_v21  ;;  %v10440_v21 = vpack.c.bf16 %v7644_v53, %v7643_v54  ;;  %v7645_v22 = vld [vmem:[%s13840_s1 + $0x1b0] sm:$0xff]  ;;  %v7647_v54 = vld [vmem:[%s13840_s1 + $0x1c0] sm:$0xff] }
  0xf4   : > { %v10444_v53 = vpack.c.bf16 %v7646_v48, %v7645_v22  ;;  %v7649_v22 = vld [vmem:[%s13840_s1 + $0x1d0] sm:$0xff] }
  0xf6   : > { %8974 = vmatmul.mubr.f32.gmra.mrb[30].mxu0 %v12337_v0  ;;  %v12359_v0 = vld [vmem:[%s11962_s15 + $0x22] sm:$0xff] }
  0xf7   : > { %9008 = vmatprep.mubr.f32.mxu0 %v1007_v20  ;;  %13947 = vst [vmem:[#allocation22_spill] sm:$0xff] %v12359_v0  ;;  %v12362_v20 = vld [vmem:[%s11962_s15 + $0x32] sm:$0xff] }
  0xf8   : > { %13948 = vst [vmem:[#allocation23_spill] sm:$0xff] %v12362_v20 }
  0xfa   : > { %9009 = vmatmul.mubr.f32.vlgmr.msra.gmra.mrb[0].mxu0 %v1008_v57  ;;  %v12376_v57 = vld [vmem:[%s11962_s15 + $0x4a] sm:$0xff] }
  0xfb   : > { %10435 = vmatpush3.bf16.msra.mxu0 %v10432_v26  ;;  %9011 = vmatprep.mubr.f32.mxu0 %v12349_v62  ;;  %v12373_v26 = vld [vmem:[%s11962_s15 + $0x3a] sm:$0xff]  ;;  %13950 = vst [vmem:[#allocation25_spill] sm:$0xff] %v12376_v57  ;;  %v7648_v62 = vld [vmem:[%s13840_s1 + $0x1c8] sm:$0xff] }
  0xfc   : > { %10437 = vmatprep.subr.bf16.mxu0 %v10436_v63  ;;  %13949 = vst [vmem:[#allocation24_spill] sm:$0xff] %v12373_v26  ;;  %v10448_v48 = vpack.c.bf16 %v7648_v62, %v7647_v54  ;;  %v7651_v54 = vld [vmem:[%s13840_s1 + $0x1e0] sm:$0xff] }
  0xfe   : > { %9012 = vmatmul.mubr.f32.gmra.mrb[2].mxu0 %v12359_v0  ;;  %v7650_v0 = vld [vmem:[%s13840_s1 + $0x1d8] sm:$0xff] }
  0xff   : > { %9014 = vmatprep.mubr.f32.mxu0 %v12362_v20  ;;  %10439 = vmatpush3.bf16.msra.mxu0 %v10436_v63  ;;  %v12387_v20 = vld [vmem:[%s11962_s15 + $0x52] sm:$0xff]  ;;  %v12390_v63 = vld [vmem:[%s11962_s15 + $0x62] sm:$0xff]  ;;  %v10452_v62 = vpack.c.bf16 %v7650_v0, %v7649_v22 }
 0x100   : > { %10441 = vmatprep.subr.bf16.mxu0 %v10440_v21  ;;  %13951 = vst [vmem:[#allocation26_spill] sm:$0xff] %v12387_v20  ;;  %13952 = vst [vmem:[#allocation27_spill] sm:$0xff] %v12390_v63  ;;  %v7653_v22 = vld [vmem:[%s13840_s1 + $0x1f0] sm:$0xff] }
 0x102   : > { %9015 = vmatmul.mubr.f32.gmra.mrb[4].mxu0 %v12373_v26  ;;  %v7652_v26 = vld [vmem:[%s13840_s1 + $0x1e8] sm:$0xff] }
 0x103   : > { %9017 = vmatprep.mubr.f32.mxu0 %v12376_v57  ;;  %10443 = vmatpush3.bf16.msra.mxu0 %v10440_v21  ;;  %v12401_v57 = vld [vmem:[%s11962_s15 + $0x6a] sm:$0xff]  ;;  %v12404_v21 = vld [vmem:[%s11962_s15 + $0x7a] sm:$0xff]  ;;  %v10456_v0 = vpack.c.bf16 %v7652_v26, %v7651_v54 }
 0x104   : > { %10445 = vmatprep.subr.bf16.mxu0 %v10444_v53  ;;  %13953 = vst [vmem:[#allocation28_spill] sm:$0xff] %v12401_v57  ;;  %13954 = vst [vmem:[#allocation29_spill] sm:$0xff] %v12404_v21  ;;  %v7687_v54 = vld [vmem:[%s13840_s1 + $0x200] sm:$0xff] }
 0x106   : > { %9018 = vmatmul.mubr.f32.gmra.mrb[6].mxu0 %v12387_v20  ;;  %v7654_v20 = vld [vmem:[%s13840_s1 + $0x1f8] sm:$0xff] }
 0x107   : > { %9020 = vmatprep.mubr.f32.mxu0 %v12390_v63  ;;  %10447 = vmatpush3.bf16.msra.mxu0 %v10444_v53  ;;  %v12415_v63 = vld [vmem:[%s11962_s15 + $0x82] sm:$0xff]  ;;  %v12418_v53 = vld [vmem:[%s11962_s15 + $0x92] sm:$0xff]  ;;  %v10460_v26 = vpack.c.bf16 %v7654_v20, %v7653_v22  ;;  %v12451_v22 = vld [vmem:[%s11962_s15 + $0xca] sm:$0xff] }
 0x108   : > { %10449 = vmatprep.subr.bf16.mxu0 %v10448_v48  ;;  %13955 = vst [vmem:[#allocation30_spill] sm:$0xff] %v12418_v53  ;;  %13958 = vst [vmem:[#allocation33_spill] sm:$0xff] %v12451_v22 }
 0x10a   : > { %9021 = vmatmul.mubr.f32.gmra.mrb[8].mxu0 %v12401_v57  ;;  %v7688_v57 = vld [vmem:[%s13840_s1 + $0x208] sm:$0xff] }
 0x10b   : > { %9023 = vmatprep.mubr.f32.mxu0 %v12404_v21  ;;  %10451 = vmatpush3.bf16.msra.mxu0 %v10448_v48  ;;  %v12429_v21 = vld [vmem:[%s11962_s15 + $0x9a] sm:$0xff]  ;;  %v12432_v48 = vld [vmem:[%s11962_s15 + $0xaa] sm:$0xff]  ;;  %v10464_v20 = vpack.c.bf16 %v7688_v57, %v7687_v54  ;;  %v12462_v57 = vld [vmem:[%s11962_s15 + $0xf2] sm:$0xff] }
 0x10c   : > { %10453 = vmatprep.subr.bf16.mxu0 %v10452_v62  ;;  %13956 = vst [vmem:[#allocation31_spill] sm:$0xff] %v12429_v21  ;;  %13961 = vst [vmem:[#allocation36_spill] sm:$0xff] %v12462_v57  ;;  %v12470_v54 = vld [vmem:[%s11962_s15 + $0x10a] sm:$0xff] }
 0x10d   : > { %13963 = vst [vmem:[#allocation38_spill] sm:$0xff] %v12470_v54 }
 0x10e   : > { %9024 = vmatmul.mubr.f32.gmra.mrb[10].mxu0 %v12415_v63 }
 0x10f   : > { %9026 = vmatprep.mubr.f32.mxu0 %v12418_v53  ;;  %10455 = vmatpush3.bf16.msra.mxu0 %v10452_v62  ;;  %v12443_v62 = vld [vmem:[%s11962_s15 + $0xb2] sm:$0xff]  ;;  %v12446_v53 = vld [vmem:[%s11962_s15 + $0xc2] sm:$0xff] }
 0x110   : > { %10457 = vmatprep.subr.bf16.mxu0 %v10456_v0  ;;  %13957 = vst [vmem:[#allocation32_spill] sm:$0xff] %v12446_v53 }
 0x112   : > { %9027 = vmatmul.mubr.f32.gmra.mrb[12].mxu0 %v12429_v21  ;;  %v12454_v21 = vld [vmem:[%s11962_s15 + $0xda] sm:$0xff] }
 0x113   : > { %9029 = vmatprep.mubr.f32.mxu0 %v12432_v48  ;;  %10459 = vmatpush3.bf16.msra.mxu0 %v10456_v0  ;;  %13959 = vst [vmem:[#allocation34_spill] sm:$0xff] %v12454_v21  ;;  %v12459_v0 = vld [vmem:[%s11962_s15 + $0xe2] sm:$0xff] }
 0x114   : > { %10461 = vmatprep.subr.bf16.mxu0 %v10460_v26  ;;  %13960 = vst [vmem:[#allocation35_spill] sm:$0xff] %v12459_v0 }
 0x116   : > { %9030 = vmatmul.mubr.f32.gmra.mrb[14].mxu0 %v12443_v62 }
 0x117   : > { %9032 = vmatprep.mubr.f32.mxu0 %v12446_v53  ;;  %10463 = vmatpush3.bf16.msra.mxu0 %v10460_v26  ;;  %v12467_v26 = vld [vmem:[%s11962_s15 + $0xfa] sm:$0xff] }
 0x118   : > { %10465 = vmatprep.subr.bf16.mxu0 %v10464_v20  ;;  %13962 = vst [vmem:[#allocation37_spill] sm:$0xff] %v12467_v26  ;;  %v12499_v53 = vld [vmem:[%s11962_s15 + $0x15a] sm:$0xff] }
 0x119   : > { %13970 = vst [vmem:[#allocation45_spill] sm:$0xff] %v12499_v53 }
 0x11a   : > { %9033 = vmatmul.mubr.f32.gmra.mrb[16].mxu0 %v12451_v22  ;;  %v12478_v22 = vld [vmem:[%s11962_s15 + $0x122] sm:$0xff] }
 0x11b   : > { %9035 = vmatprep.mubr.f32.mxu0 %v12454_v21  ;;  %v12475_v21 = vld [vmem:[%s11962_s15 + $0x112] sm:$0xff]  ;;  %13965 = vst [vmem:[#allocation40_spill] sm:$0xff] %v12478_v22 }
 0x11c   : > { %13964 = vst [vmem:[#allocation39_spill] sm:$0xff] %v12475_v21 }
 0x11e   : > { %9036 = vmatmul.mubr.f32.gmra.mrb[18].mxu0 %v12459_v0  ;;  %v12486_v0 = vld [vmem:[%s11962_s15 + $0x13a] sm:$0xff] }
 0x11f   : > { %9038 = vmatprep.mubr.f32.mxu0 %v12462_v57  ;;  %v12483_v57 = vld [vmem:[%s11962_s15 + $0x12a] sm:$0xff]  ;;  %13967 = vst [vmem:[#allocation42_spill] sm:$0xff] %v12486_v0 }
 0x120   : > { %13966 = vst [vmem:[#allocation41_spill] sm:$0xff] %v12483_v57 }
 0x122   : > { %9039 = vmatmul.mubr.f32.gmra.mrb[20].mxu0 %v12467_v26  ;;  %v12491_v26 = vld [vmem:[%s11962_s15 + $0x142] sm:$0xff] }
 0x123   : > { %9041 = vmatprep.mubr.f32.mxu0 %v12470_v54  ;;  %13968 = vst [vmem:[#allocation43_spill] sm:$0xff] %v12491_v26  ;;  %v12494_v54 = vld [vmem:[%s11962_s15 + $0x152] sm:$0xff] }
 0x124   : > { %13969 = vst [vmem:[#allocation44_spill] sm:$0xff] %v12494_v54 }
 0x126   : > { %9042 = vmatmul.mubr.f32.gmra.mrb[22].mxu0 %v12475_v21  ;;  %v12502_v21 = vld [vmem:[%s11962_s15 + $0x16a] sm:$0xff] }
 0x127   : > { %9044 = vmatprep.mubr.f32.mxu0 %v12478_v22  ;;  %13971 = vst [vmem:[#allocation46_spill] sm:$0xff] %v12502_v21  ;;  %v12507_v22 = vld [vmem:[%s11962_s15 + $0x172] sm:$0xff] }
 0x12a   : > { %9045 = vmatmul.mubr.f32.gmra.mrb[24].mxu0 %v12483_v57 }
 0x12b   : > { %9047 = vmatprep.mubr.f32.mxu0 %v12486_v0  ;;  %v7689_v0 = vld [vmem:[%s13840_s1 + $0x210] sm:$0xff] }
 0x12e   : > { %9048 = vmatmul.mubr.f32.gmra.mrb[26].mxu0 %v12491_v26  ;;  %v7690_v26 = vld [vmem:[%s13840_s1 + $0x218] sm:$0xff] }
 0x12f   : > { %9050 = vmatprep.mubr.f32.mxu0 %v12494_v54  ;;  %v10468_v54 = vpack.c.bf16 %v7690_v26, %v7689_v0  ;;  %v7694_v0 = vld [vmem:[%s13840_s1 + $0x238] sm:$0xff]  ;;  %v7736_v26 = vld [vmem:[%s13840_s1 + $0x288] sm:$0xff] }
 0x132   : > { %9051 = vmatmul.mubr.f32.gmra.mrb[28].mxu0 %v12499_v53  ;;  %v7691_v53 = vld [vmem:[%s13840_s1 + $0x220] sm:$0xff] }
 0x133   : > { %9053 = vmatprep.mubr.f32.mxu0 %v12502_v21  ;;  %v7692_v21 = vld [vmem:[%s13840_s1 + $0x228] sm:$0xff] }
 0x134   : > { %v10472_v57 = vpack.c.bf16 %v7692_v21, %v7691_v53  ;;  %v7696_v21 = vld [vmem:[%s13840_s1 + $0x248] sm:$0xff]  ;;  %v7698_v53 = vld [vmem:[%s13840_s1 + $0x258] sm:$0xff] }
 0x136   : > { %9054 = vmatmul.mubr.f32.gmra.mrb[30].mxu0 %v12507_v22 }
 0x137   : > { %9088 = vmatprep.mubr.f32.mxu0 %v12009_v31  ;;  %v7693_v31 = vld [vmem:[%s13840_s1 + $0x230] sm:$0xff] }
 0x13a   : > { %9089 = vmatmul.mubr.f32.vlgmr.msra.gmra.mrb[0].mxu0 %v12019_v35  ;;  %v10476_v35 = vpack.c.bf16 %v7694_v0, %v7693_v31  ;;  %v13981_v31 = vld [vmem:[#allocation23_spill] sm:$0xff] }
 0x13b   : > { %10467 = vmatpush3.bf16.msra.mxu0 %v10464_v20  ;;  %9091 = vmatprep.mubr.f32.mxu0 %v12022_v36  ;;  %v7695_v36 = vld [vmem:[%s13840_s1 + $0x240] sm:$0xff]  ;;  %v7700_v20 = vld [vmem:[%s13840_s1 + $0x268] sm:$0xff] }
 0x13c   : > { %10469 = vmatprep.subr.bf16.mxu0 %v10468_v54 }
 0x13e   : > { %9092 = vmatmul.mubr.f32.gmra.mrb[2].mxu0 %v12033_v40  ;;  %v10480_v40 = vpack.c.bf16 %v7696_v21, %v7695_v36  ;;  %v7790_v36 = vld [vmem:[%s13840_s1 + $0x338] sm:$0xff]  ;;  %v13982_v21 = vld [vmem:[#allocation24_spill] sm:$0xff] }
 0x13f   : > { %9094 = vmatprep.mubr.f32.mxu0 %v12036_v41  ;;  %10471 = vmatpush3.bf16.msra.mxu0 %v10468_v54  ;;  %v7697_v41 = vld [vmem:[%s13840_s1 + $0x250] sm:$0xff] }
 0x140   : > { %10473 = vmatprep.subr.bf16.mxu0 %v10472_v57  ;;  %v13980_v54 = vld [vmem:[#allocation22_spill] sm:$0xff] }
 0x142   : > { %9095 = vmatmul.mubr.f32.gmra.mrb[4].mxu0 %v12047_v45  ;;  %v10484_v45 = vpack.c.bf16 %v7698_v53, %v7697_v41  ;;  %v7791_v53 = vld [vmem:[%s13840_s1 + $0x340] sm:$0xff] }
 0x143   : > { %9097 = vmatprep.mubr.f32.mxu0 %v12050_v46  ;;  %10475 = vmatpush3.bf16.msra.mxu0 %v10472_v57  ;;  %v7699_v46 = vld [vmem:[%s13840_s1 + $0x260] sm:$0xff]  ;;  %v7702_v57 = vld [vmem:[%s13840_s1 + $0x278] sm:$0xff] }
 0x144   : > { %10477 = vmatprep.subr.bf16.mxu0 %v10476_v35 }
 0x146   : > { %9098 = vmatmul.mubr.f32.gmra.mrb[6].mxu0 %v12061_v50  ;;  %v10488_v50 = vpack.c.bf16 %v7700_v20, %v7699_v46  ;;  %v13984_v46 = vld [vmem:[#allocation26_spill] sm:$0xff]  ;;  %v13985_v20 = vld [vmem:[#allocation27_spill] sm:$0xff] }
 0x147   : > { %9100 = vmatprep.mubr.f32.mxu0 %v12064_v51  ;;  %10479 = vmatpush3.bf16.msra.mxu0 %v10476_v35  ;;  %v7701_v51 = vld [vmem:[%s13840_s1 + $0x270] sm:$0xff] }
 0x148   : > { %10481 = vmatprep.subr.bf16.mxu0 %v10480_v40  ;;  %v7789_v35 = vld [vmem:[%s13840_s1 + $0x330] sm:$0xff] }
 0x149   : > { %v10540_v41 = vpack.c.bf16 %v7790_v36, %v7789_v35  ;;  %v7840_v35 = vld [vmem:[%s13840_s1 + $0x3c8] sm:$0xff]  ;;  %v7758_v36 = vld [vmem:[%s11962_s15 + $0x80] sm:$0xff] }
 0x14a   : > { %9101 = vmatmul.mubr.f32.gmra.mrb[8].mxu0 %v12075_v55  ;;  %v10492_v55 = vpack.c.bf16 %v7702_v57, %v7701_v51  ;;  %v7793_v51 = vld [vmem:[%s13840_s1 + $0x350] sm:$0xff]  ;;  %v7794_v57 = vld [vmem:[%s13840_s1 + $0x358] sm:$0xff] }
 0x14b   : > { %9103 = vmatprep.mubr.f32.mxu0 %v12078_v56  ;;  %10483 = vmatpush3.bf16.msra.mxu0 %v10480_v40  ;;  %v7735_v56 = vld [vmem:[%s13840_s1 + $0x280] sm:$0xff]  ;;  %v13983_v40 = vld [vmem:[#allocation25_spill] sm:$0xff] }
 0x14c   : > { %10485 = vmatprep.subr.bf16.mxu0 %v10484_v45 }
 0x14e   : > { %9104 = vmatmul.mubr.f32.gmra.mrb[10].mxu0 %v12089_v60  ;;  %v10496_v60 = vpack.c.bf16 %v7736_v26, %v7735_v56  ;;  %v13987_v56 = vld [vmem:[#allocation29_spill] sm:$0xff]  ;;  %v10548_v26 = vpack.c.bf16 %v7794_v57, %v7793_v51  ;;  %v7762_v57 = vld [vmem:[%s11962_s15 + $0xb0] sm:$0xff] }
 0x14f   : > { %9106 = vmatprep.mubr.f32.mxu0 %v12092_v61  ;;  %10487 = vmatpush3.bf16.msra.mxu0 %v10484_v45  ;;  %v12588_v61 = vld [vmem:[%s11962_s15 + $0x180] sm:$0xff]  ;;  %v7792_v45 = vld [vmem:[%s13840_s1 + $0x348] sm:$0xff] }
 0x150   : > { %10489 = vmatprep.subr.bf16.mxu0 %v10488_v50  ;;  %v7844_v51 = vld [vmem:[%s13840_s1 + $0x3e8] sm:$0xff] }
 0x152   : > { %9107 = vmatmul.mubr.f32.gmra.mrb[12].mxu0 %v12103_v1  ;;  %v12593_v1 = vld [vmem:[%s11962_s15 + $0x188] sm:$0xff] }
 0x153   : > { %9109 = vmatprep.mubr.f32.mxu0 %v12106_v2  ;;  %10491 = vmatpush3.bf16.msra.mxu0 %v10488_v50  ;;  %v7737_v2 = vld [vmem:[%s13840_s1 + $0x290] sm:$0xff]  ;;  %v10544_v50 = vpack.c.bf16 %v7792_v45, %v7791_v53  ;;  %v7842_v53 = vld [vmem:[%s13840_s1 + $0x3d8] sm:$0xff] }
 0x154   : > { %10493 = vmatprep.subr.bf16.mxu0 %v10492_v55  ;;  %v7760_v45 = vld [vmem:[%s11962_s15 + $0x98] sm:$0xff] }
 0x156   : > { %9110 = vmatmul.mubr.f32.gmra.mrb[14].mxu0 %v12111_v4  ;;  %v7738_v4 = vld [vmem:[%s13840_s1 + $0x298] sm:$0xff] }
 0x157   : > { %9112 = vmatprep.mubr.f32.mxu0 %v12114_v5  ;;  %10495 = vmatpush3.bf16.msra.mxu0 %v10492_v55  ;;  %v10500_v5 = vpack.c.bf16 %v7738_v4, %v7737_v2  ;;  %v13986_v55 = vld [vmem:[#allocation28_spill] sm:$0xff]  ;;  %v7796_v2 = vld [vmem:[%s13840_s1 + $0x368] sm:$0xff]  ;;  %v13988_v4 = vld [vmem:[#allocation30_spill] sm:$0xff] }
 0x158   : > { %10497 = vmatprep.subr.bf16.mxu0 %v10496_v60 }
 0x15a   : > { %9113 = vmatmul.mubr.f32.gmra.mrb[16].mxu0 %v12119_v6  ;;  %v7739_v6 = vld [vmem:[%s13840_s1 + $0x2a0] sm:$0xff] }
 0x15b   : > { %9115 = vmatprep.mubr.f32.mxu0 %v12122_v7  ;;  %v7740_v7 = vld [vmem:[%s13840_s1 + $0x2a8] sm:$0xff] }
 0x15e   : > { %9116 = vmatmul.mubr.f32.gmra.mrb[18].mxu0 %v12127_v8  ;;  %v10504_v8 = vpack.c.bf16 %v7740_v7, %v7739_v6  ;;  %v7797_v6 = vld [vmem:[%s13840_s1 + $0x370] sm:$0xff]  ;;  %v7798_v7 = vld [vmem:[%s13840_s1 + $0x378] sm:$0xff] }
 0x15f   : > { %9118 = vmatprep.mubr.f32.mxu0 %v12130_v9  ;;  %v7741_v9 = vld [vmem:[%s13840_s1 + $0x2b0] sm:$0xff] }
 0x162   : > { %9119 = vmatmul.mubr.f32.gmra.mrb[20].mxu0 %v12135_v10  ;;  %v7742_v10 = vld [vmem:[%s13840_s1 + $0x2b8] sm:$0xff] }
 0x163   : > { %9121 = vmatprep.mubr.f32.mxu0 %v12138_v11  ;;  %v10508_v11 = vpack.c.bf16 %v7742_v10, %v7741_v9  ;;  %v7831_v9 = vld [vmem:[%s13840_s1 + $0x380] sm:$0xff]  ;;  %v7832_v10 = vld [vmem:[%s13840_s1 + $0x388] sm:$0xff] }
 0x166   : > { %9122 = vmatmul.mubr.f32.gmra.mrb[22].mxu0 %v12143_v12  ;;  %v7743_v12 = vld [vmem:[%s13840_s1 + $0x2c0] sm:$0xff] }
 0x167   : > { %9124 = vmatprep.mubr.f32.mxu0 %v12146_v13  ;;  %v7744_v13 = vld [vmem:[%s13840_s1 + $0x2c8] sm:$0xff] }
 0x16a   : > { %9125 = vmatmul.mubr.f32.gmra.mrb[24].mxu0 %v12151_v14  ;;  %v10512_v14 = vpack.c.bf16 %v7744_v13, %v7743_v12  ;;  %v10560_v12 = vpack.c.bf16 %v7832_v10, %v7831_v9  ;;  %v13991_v13 = vld [vmem:[#allocation33_spill] sm:$0xff]  ;;  %v7768_v10 = vld [vmem:[%s11962_s15 + $0xf8] sm:$0xff] }
 0x16b   : > { %9127 = vmatprep.mubr.f32.mxu0 %v12154_v15  ;;  %v7745_v15 = vld [vmem:[%s13840_s1 + $0x2d0] sm:$0xff] }
 0x16e   : > { %9128 = vmatmul.mubr.f32.gmra.mrb[26].mxu0 %v12159_v16  ;;  %v7746_v16 = vld [vmem:[%s13840_s1 + $0x2d8] sm:$0xff] }
 0x16f   : > { %9130 = vmatprep.mubr.f32.mxu0 %v12162_v17  ;;  %v10516_v17 = vpack.c.bf16 %v7746_v16, %v7745_v15  ;;  %v13994_v15 = vld [vmem:[#allocation36_spill] sm:$0xff]  ;;  %v13995_v16 = vld [vmem:[#allocation37_spill] sm:$0xff] }
 0x172   : > { %9131 = vmatmul.mubr.f32.gmra.mrb[28].mxu0 %v12167_v18  ;;  %v7747_v18 = vld [vmem:[%s13840_s1 + $0x2e0] sm:$0xff] }
 0x173   : > { %9133 = vmatprep.mubr.f32.mxu0 %v12588_v61 }
 0x176   : > { %9134 = vmatmul.mubr.f32.gmra.mrb[30].mxu0 %v12593_v1 }
 0x177   : > { %9168 = vmatprep.mubr.f32.mxu0 %v12179_v23  ;;  %v7748_v23 = vld [vmem:[%s13840_s1 + $0x2e8] sm:$0xff] }
 0x17a   : > { %9169 = vmatmul.mubr.f32.vlgmr.msra.gmra.mrb[0].mxu0 %v12189_v27  ;;  %v10520_v27 = vpack.c.bf16 %v7748_v23, %v7747_v18  ;;  %v13998_v18 = vld [vmem:[#allocation40_spill] sm:$0xff]  ;;  %v13999_v23 = vld [vmem:[#allocation41_spill] sm:$0xff] }
 0x17b   : > { %10499 = vmatpush3.bf16.msra.mxu0 %v10496_v60  ;;  %9171 = vmatprep.mubr.f32.mxu0 %v12192_v28  ;;  %v7749_v28 = vld [vmem:[%s13840_s1 + $0x2f0] sm:$0xff]  ;;  %v7795_v60 = vld [vmem:[%s13840_s1 + $0x360] sm:$0xff] }
 0x17c   : > { %10501 = vmatprep.subr.bf16.mxu0 %v10500_v5 }
 0x17e   : > { %9172 = vmatmul.mubr.f32.gmra.mrb[2].mxu0 %v12203_v33  ;;  %v7750_v33 = vld [vmem:[%s13840_s1 + $0x2f8] sm:$0xff] }
 0x17f   : > { %9174 = vmatprep.mubr.f32.mxu0 %v12206_v34  ;;  %10503 = vmatpush3.bf16.msra.mxu0 %v10500_v5  ;;  %v10524_v34 = vpack.c.bf16 %v7750_v33, %v7749_v28  ;;  %v10552_v5 = vpack.c.bf16 %v7796_v2, %v7795_v60  ;;  %v14001_v28 = vld [vmem:[#allocation43_spill] sm:$0xff]  ;;  %v14002_v33 = vld [vmem:[#allocation44_spill] sm:$0xff]  ;;  %v7764_v2 = vld [vmem:[%s11962_s15 + $0xc8] sm:$0xff] }
 0x180   : > { %10505 = vmatprep.subr.bf16.mxu0 %v10504_v8  ;;  %v7846_v60 = vld [vmem:[%s13840_s1 + $0x3f8] sm:$0xff] }
 0x182   : > { %9175 = vmatmul.mubr.f32.gmra.mrb[4].mxu0 %v12217_v42  ;;  %v7783_v42 = vld [vmem:[%s13840_s1 + $0x300] sm:$0xff] }
 0x183   : > { %9177 = vmatprep.mubr.f32.mxu0 %v12220_v43  ;;  %10507 = vmatpush3.bf16.msra.mxu0 %v10504_v8  ;;  %v7784_v43 = vld [vmem:[%s13840_s1 + $0x308] sm:$0xff]  ;;  %v13989_v8 = vld [vmem:[#allocation31_spill] sm:$0xff] }
 0x184   : > { %10509 = vmatprep.subr.bf16.mxu0 %v10508_v11 }
 0x186   : > { %9178 = vmatmul.mubr.f32.gmra.mrb[6].mxu0 %v12231_v49  ;;  %v10528_v49 = vpack.c.bf16 %v7784_v43, %v7783_v42  ;;  %v14004_v42 = vld [vmem:[#allocation46_spill] sm:$0xff]  ;;  %v12760_v43 = vld [vmem:[%s11962_s15 + $0x182] sm:$0xff] }
 0x187   : > { %9180 = vmatprep.mubr.f32.mxu0 %v12234_v52  ;;  %10511 = vmatpush3.bf16.msra.mxu0 %v10508_v11  ;;  %v13972_v52 = vld [vmem:[#allocation14_spill] sm:$0xff]  ;;  %v13990_v11 = vld [vmem:[#allocation32_spill] sm:$0xff] }
 0x188   : > { %10513 = vmatprep.subr.bf16.mxu0 %v10512_v14 }
 0x18a   : > { %9181 = vmatmul.mubr.f32.gmra.mrb[8].mxu0 %v12245_v58  ;;  %v13973_v58 = vld [vmem:[#allocation15_spill] sm:$0xff] }
 0x18b   : > { %9183 = vmatprep.mubr.f32.mxu0 %v12248_v59  ;;  %10515 = vmatpush3.bf16.msra.mxu0 %v10512_v14  ;;  %v13974_v59 = vld [vmem:[#allocation16_spill] sm:$0xff]  ;;  %v13993_v14 = vld [vmem:[#allocation35_spill] sm:$0xff] }
 0x18c   : > { %10517 = vmatprep.subr.bf16.mxu0 %v10516_v17 }
 0x18e   : > { %9184 = vmatmul.mubr.f32.gmra.mrb[10].mxu0 %v12259_v3  ;;  %v13975_v3 = vld [vmem:[#allocation17_spill] sm:$0xff] }
 0x18f   : > { %9186 = vmatprep.mubr.f32.mxu0 %v12262_v19  ;;  %10519 = vmatpush3.bf16.msra.mxu0 %v10516_v17  ;;  %v13976_v19 = vld [vmem:[#allocation18_spill] sm:$0xff]  ;;  %v13997_v17 = vld [vmem:[#allocation39_spill] sm:$0xff] }
 0x190   : > { %10521 = vmatprep.subr.bf16.mxu0 %v10520_v27 }
 0x192   : > { %9187 = vmatmul.mubr.f32.gmra.mrb[12].mxu0 %v12273_v24  ;;  %v13977_v24 = vld [vmem:[#allocation19_spill] sm:$0xff] }
 0x193   : > { %9189 = vmatprep.mubr.f32.mxu0 %v12276_v25  ;;  %10523 = vmatpush3.bf16.msra.mxu0 %v10520_v27  ;;  %v12674_v25 = vld [vmem:[%s11962_s15 + $0x181] sm:$0xff]  ;;  %v14000_v27 = vld [vmem:[#allocation42_spill] sm:$0xff] }
 0x194   : > { %10525 = vmatprep.subr.bf16.mxu0 %v10524_v34 }
 0x196   : > { %9190 = vmatmul.mubr.f32.gmra.mrb[14].mxu0 %v12281_v29  ;;  %v13978_v29 = vld [vmem:[#allocation20_spill] sm:$0xff] }
 0x197   : > { %9192 = vmatprep.mubr.f32.mxu0 %v12284_v30  ;;  %10527 = vmatpush3.bf16.msra.mxu0 %v10524_v34  ;;  %v12679_v30 = vld [vmem:[%s11962_s15 + $0x189] sm:$0xff] }
 0x198   : > { %10529 = vmatprep.subr.bf16.mxu0 %v10528_v49  ;;  %v14003_v34 = vld [vmem:[#allocation45_spill] sm:$0xff] }
 0x19a   : > { %9193 = vmatmul.mubr.f32.gmra.mrb[16].mxu0 %v12289_v32  ;;  %v7785_v32 = vld [vmem:[%s13840_s1 + $0x310] sm:$0xff] }
 0x19b   : > { %9195 = vmatprep.mubr.f32.mxu0 %v12292_v37  ;;  %v7786_v37 = vld [vmem:[%s13840_s1 + $0x318] sm:$0xff] }
 0x19e   : > { %9196 = vmatmul.mubr.f32.gmra.mrb[18].mxu0 %v12297_v38  ;;  %v13979_v38 = vld [vmem:[#allocation21_spill] sm:$0xff] }
 0x19f   : > { %9198 = vmatprep.mubr.f32.mxu0 %v12300_v39  ;;  %v10532_v39 = vpack.c.bf16 %v7786_v37, %v7785_v32  ;;  %v7754_v32 = vld [vmem:[%s11962_s15 + $0x50] sm:$0xff]  ;;  %v7755_v37 = vld [vmem:[%s11962_s15 + $0x60] sm:$0xff] }
 0x1a2   : > { %9199 = vmatmul.mubr.f32.gmra.mrb[20].mxu0 %v12305_v44  ;;  %v7787_v44 = vld [vmem:[%s13840_s1 + $0x320] sm:$0xff] }
 0x1a3   : > { %9201 = vmatprep.mubr.f32.mxu0 %v12308_v47  ;;  %v7788_v47 = vld [vmem:[%s13840_s1 + $0x328] sm:$0xff] }
 0x1a4   : > { %v10536_v0 = vpack.c.bf16 %v7788_v47, %v7787_v44  ;;  %v7838_v44 = vld [vmem:[%s13840_s1 + $0x3b8] sm:$0xff]  ;;  %v7756_v47 = vld [vmem:[%s11962_s15 + $0x68] sm:$0xff] }
 0x1a6   : > { %9202 = vmatmul.mubr.f32.gmra.mrb[22].mxu0 %v13972_v52  ;;  %v7751_v52 = vld [vmem:[%s11962_s15 + $0x30] sm:$0xff] }
 0x1a7   : > { %9204 = vmatprep.mubr.f32.mxu0 %v13973_v58  ;;  %v7833_v58 = vld [vmem:[%s13840_s1 + $0x390] sm:$0xff] }
 0x1aa   : > { %9205 = vmatmul.mubr.f32.gmra.mrb[24].mxu0 %v13974_v59  ;;  %v7834_v59 = vld [vmem:[%s13840_s1 + $0x398] sm:$0xff] }
 0x1ab   : > { %9207 = vmatprep.mubr.f32.mxu0 %v13975_v3  ;;  %v7752_v3 = vld [vmem:[%s11962_s15 + $0x38] sm:$0xff] }
 0x1ae   : > { %9208 = vmatmul.mubr.f32.gmra.mrb[26].mxu0 %v13976_v19  ;;  %v10564_v19 = vpack.c.bf16 %v7834_v59, %v7833_v58  ;;  %v3813_v59 = vld [vmem:[#allocation5 + $0x18] sm:$0xff] }
 0x1af   : > { %9210 = vmatprep.mubr.f32.mxu0 %v13977_v24  ;;  %v7835_v24 = vld [vmem:[%s13840_s1 + $0x3a0] sm:$0xff] }
 0x1b2   : > { %9211 = vmatmul.mubr.f32.gmra.mrb[28].mxu0 %v13978_v29  ;;  %v7836_v29 = vld [vmem:[%s13840_s1 + $0x3a8] sm:$0xff] }
 0x1b3   : > { %9213 = vmatprep.mubr.f32.mxu0 %v12674_v25 }
 0x1b6   : > { %9214 = vmatmul.mubr.f32.gmra.mrb[30].mxu0 %v12679_v30 }
 0x1b7   : > { %9248 = vmatprep.mubr.f32.mxu0 %v13979_v38  ;;  %v10568_v38 = vpack.c.bf16 %v7836_v29, %v7835_v24  ;;  %v7884_v24 = vld [vmem:[%s13840_s1 + $0x428] sm:$0xff] }
 0x1ba   : > { %9249 = vmatmul.mubr.f32.vlgmr.msra.gmra.mrb[0].mxu0 %v13980_v54  ;;  %v7757_v54 = vld [vmem:[%s11962_s15 + $0x78] sm:$0xff] }
 0x1bb   : > { %10531 = vmatpush3.bf16.msra.mxu0 %v10528_v49  ;;  %9251 = vmatprep.mubr.f32.mxu0 %v13981_v31  ;;  %v12765_v49 = vld [vmem:[%s11962_s15 + $0x18a] sm:$0xff] }
 0x1bc   : > { %10533 = vmatprep.subr.bf16.mxu0 %v10532_v39 }
 0x1be   : > { %9252 = vmatmul.mubr.f32.gmra.mrb[2].mxu0 %v13982_v21  ;;  %v7759_v21 = vld [vmem:[%s11962_s15 + $0x90] sm:$0xff] }
 0x1bf   : > { %9254 = vmatprep.mubr.f32.mxu0 %v13983_v40  ;;  %10535 = vmatpush3.bf16.msra.mxu0 %v10532_v39  ;;  %v7837_v39 = vld [vmem:[%s13840_s1 + $0x3b0] sm:$0xff] }
 0x1c0   : > { %10537 = vmatprep.subr.bf16.mxu0 %v10536_v0  ;;  %v10572_v31 = vpack.c.bf16 %v7838_v44, %v7837_v39  ;;  %v7803_v39 = vld [vmem:[%s11962_s15 + $0x61] sm:$0xff] }
 0x1c2   : > { %9255 = vmatmul.mubr.f32.gmra.mrb[4].mxu0 %v13984_v46  ;;  %v7761_v46 = vld [vmem:[%s11962_s15 + $0xa8] sm:$0xff] }
 0x1c3   : > { %9257 = vmatprep.mubr.f32.mxu0 %v13985_v20  ;;  %10539 = vmatpush3.bf16.msra.mxu0 %v10536_v0  ;;  %v7839_v0 = vld [vmem:[%s13840_s1 + $0x3c0] sm:$0xff] }
 0x1c4   : > { %10541 = vmatprep.subr.bf16.mxu0 %v10540_v41  ;;  %v10576_v40 = vpack.c.bf16 %v7840_v35, %v7839_v0  ;;  %v7804_v0 = vld [vmem:[%s11962_s15 + $0x69] sm:$0xff]  ;;  %v3816_v35 = vld [vmem:[#allocation5 + $0x30] sm:$0xff] }
 0x1c6   : > { %9258 = vmatmul.mubr.f32.gmra.mrb[6].mxu0 %v13986_v55  ;;  %v7763_v55 = vld [vmem:[%s11962_s15 + $0xc0] sm:$0xff] }
 0x1c7   : > { %9260 = vmatprep.mubr.f32.mxu0 %v13987_v56  ;;  %10543 = vmatpush3.bf16.msra.mxu0 %v10540_v41  ;;  %v7841_v41 = vld [vmem:[%s13840_s1 + $0x3d0] sm:$0xff] }
 0x1c8   : > { %10545 = vmatprep.subr.bf16.mxu0 %v10544_v50  ;;  %v10580_v20 = vpack.c.bf16 %v7842_v53, %v7841_v41  ;;  %v7887_v41 = vld [vmem:[%s13840_s1 + $0x440] sm:$0xff]  ;;  %v7888_v53 = vld [vmem:[%s13840_s1 + $0x448] sm:$0xff] }
 0x1ca   : > { %9261 = vmatmul.mubr.f32.gmra.mrb[8].mxu0 %v12415_v63  ;;  %v10556_v63 = vpack.c.bf16 %v7798_v7, %v7797_v6  ;;  %v7879_v6 = vld [vmem:[%s13840_s1 + $0x400] sm:$0xff]  ;;  %v7880_v7 = vld [vmem:[%s13840_s1 + $0x408] sm:$0xff] }
 0x1cb   : > { %9263 = vmatprep.mubr.f32.mxu0 %v13988_v4  ;;  %10547 = vmatpush3.bf16.msra.mxu0 %v10544_v50  ;;  %v7843_v50 = vld [vmem:[%s13840_s1 + $0x3e0] sm:$0xff]  ;;  %v7765_v4 = vld [vmem:[%s11962_s15 + $0xd8] sm:$0xff]  ;;  %v10592_v9 = vpack.c.bf16 %v7880_v7, %v7879_v6 }
 0x1cc   : > { %10549 = vmatprep.subr.bf16.mxu0 %v10548_v26  ;;  %v10584_v56 = vpack.c.bf16 %v7844_v51, %v7843_v50  ;;  %v3819_v50 = vld [vmem:[#allocation5 + $0x48] sm:$0xff]  ;;  %v7891_v7 = vld [vmem:[%s13840_s1 + $0x460] sm:$0xff] }
 0x1cd   : > { %v7807_v51 = vld [vmem:[%s11962_s15 + $0x91] sm:$0xff] }
 0x1ce   : > { %9264 = vmatmul.mubr.f32.gmra.mrb[10].mxu0 %v13989_v8  ;;  %v7766_v8 = vld [vmem:[%s11962_s15 + $0xe0] sm:$0xff] }
 0x1cf   : > { %9266 = vmatprep.mubr.f32.mxu0 %v12432_v48  ;;  %10551 = vmatpush3.bf16.msra.mxu0 %v10548_v26  ;;  %v13992_v48 = vld [vmem:[#allocation34_spill] sm:$0xff] }
 0x1d0   : > { %10553 = vmatprep.subr.bf16.mxu0 %v10552_v5  ;;  %v7845_v26 = vld [vmem:[%s13840_s1 + $0x3f0] sm:$0xff] }
 0x1d2   : > { %9267 = vmatmul.mubr.f32.gmra.mrb[12].mxu0 %v12443_v62  ;;  %v13996_v62 = vld [vmem:[#allocation38_spill] sm:$0xff] }
 0x1d3   : > { %9269 = vmatprep.mubr.f32.mxu0 %v13990_v11  ;;  %10555 = vmatpush3.bf16.msra.mxu0 %v10552_v5  ;;  %v10588_v5 = vpack.c.bf16 %v7846_v60, %v7845_v26  ;;  %v7769_v11 = vld [vmem:[%s11962_s15 + $0x108] sm:$0xff]  ;;  %v7808_v60 = vld [vmem:[%s11962_s15 + $0x99] sm:$0xff] }
 0x1d4   : > { %10557 = vmatprep.subr.bf16.mxu0 %v10556_v63 }
 0x1d6   : > { %9270 = vmatmul.mubr.f32.gmra.mrb[14].mxu0 %v13991_v13  ;;  %v7771_v13 = vld [vmem:[%s11962_s15 + $0x120] sm:$0xff] }
 0x1d7   : > { %9272 = vmatprep.mubr.f32.mxu0 %v13992_v48  ;;  %10559 = vmatpush3.bf16.msra.mxu0 %v10556_v63  ;;  %v7767_v63 = vld [vmem:[%s11962_s15 + $0xf0] sm:$0xff]  ;;  %v7772_v48 = vld [vmem:[%s11962_s15 + $0x128] sm:$0xff] }
 0x1d8   : > { %10561 = vmatprep.subr.bf16.mxu0 %v10560_v12 }
 0x1da   : > { %9273 = vmatmul.mubr.f32.gmra.mrb[16].mxu0 %v13993_v14  ;;  %v7773_v14 = vld [vmem:[%s11962_s15 + $0x138] sm:$0xff] }
 0x1db   : > { %9275 = vmatprep.mubr.f32.mxu0 %v13994_v15  ;;  %v7774_v15 = vld [vmem:[%s11962_s15 + $0x140] sm:$0xff] }
 0x1de   : > { %9276 = vmatmul.mubr.f32.gmra.mrb[18].mxu0 %v13995_v16  ;;  %v7775_v16 = vld [vmem:[%s11962_s15 + $0x150] sm:$0xff] }
 0x1df   : > { %9278 = vmatprep.mubr.f32.mxu0 %v13996_v62  ;;  %v7776_v62 = vld [vmem:[%s11962_s15 + $0x158] sm:$0xff] }
 0x1e2   : > { %9279 = vmatmul.mubr.f32.gmra.mrb[20].mxu0 %v13997_v17  ;;  %v7777_v17 = vld [vmem:[%s11962_s15 + $0x168] sm:$0xff] }
 0x1e3   : > { %9281 = vmatprep.mubr.f32.mxu0 %v13998_v18  ;;  %v7778_v18 = vld [vmem:[%s11962_s15 + $0x170] sm:$0xff] }
 0x1e6   : > { %9282 = vmatmul.mubr.f32.gmra.mrb[22].mxu0 %v13999_v23  ;;  %v7781_v23 = vld [vmem:[%s11962_s15 + $0x198] sm:$0xff] }
 0x1e7   : > { %9284 = vmatprep.mubr.f32.mxu0 %v14000_v27  ;;  %v7782_v27 = vld [vmem:[%s11962_s15 + $0x1a0] sm:$0xff] }
 0x1ea   : > { %9285 = vmatmul.mubr.f32.gmra.mrb[24].mxu0 %v14001_v28  ;;  %v7799_v28 = vld [vmem:[%s11962_s15 + $0x31] sm:$0xff] }
 0x1eb   : > { %9287 = vmatprep.mubr.f32.mxu0 %v14002_v33  ;;  %v7881_v33 = vld [vmem:[%s13840_s1 + $0x410] sm:$0xff] }
 0x1ee   : > { %9288 = vmatmul.mubr.f32.gmra.mrb[26].mxu0 %v14003_v34  ;;  %v7882_v34 = vld [vmem:[%s13840_s1 + $0x418] sm:$0xff] }
 0x1ef   : > { %9290 = vmatprep.mubr.f32.mxu0 %v14004_v42  ;;  %v3810_v42 = vld [vmem:[#allocation5] sm:$0xff] }
 0x1f2   : > { %9291 = vmatmul.mubr.f32.gmra.mrb[28].mxu0 %v12507_v22  ;;  %v7753_v22 = vld [vmem:[%s11962_s15 + $0x48] sm:$0xff] }
 0x1f3   : > { %9293 = vmatprep.mubr.f32.mxu0 %v12760_v43 }
 0x1f6   : > { %9294 = vmatmul.mubr.f32.gmra.mrb[30].mxu0 %v12765_v49 }
 0x1f7   : > { %9328 = vmatprep.mubr.f32.mxu0 %v7751_v52  ;;  %v3811_v52 = vld [vmem:[#allocation5 + $0x8] sm:$0xff] }
 0x1f8   : > { %v12856_v58 = vpack.c.bf16 %v3811_v52, %v3810_v42  ;;  %v7823_v42 = vld [vmem:[%s11962_s15 + $0x151] sm:$0xff]  ;;  %v7824_v52 = vld [vmem:[%s11962_s15 + $0x159] sm:$0xff] }
 0x1fa   : > { %9329 = vmatmul.mubr.f32.vlgmr.msra.gmra.mrb[0].mxu0 %v7752_v3  ;;  %v7801_v3 = vld [vmem:[%s11962_s15 + $0x49] sm:$0xff]  ;;  %10944 = vmatprep.subr.bf16.mxu1 %v12856_v58 }
 0x1fb   : > { %10563 = vmatpush3.bf16.msra.mxu0 %v10560_v12  ;;  %9331 = vmatprep.mubr.f32.mxu0 %v7753_v22  ;;  %v7770_v12 = vld [vmem:[%s11962_s15 + $0x110] sm:$0xff]  ;;  %v10596_v22 = vpack.c.bf16 %v7882_v34, %v7881_v33  ;;  %v7821_v33 = vld [vmem:[%s11962_s15 + $0x139] sm:$0xff]  ;;  %v7822_v34 = vld [vmem:[%s11962_s15 + $0x141] sm:$0xff] }
 0x1fc   : > { %10565 = vmatprep.subr.bf16.mxu0 %v10564_v19  ;;  %10952 = vmatpush3.bf16.msra.mxu1 %v12856_v58 }
 0x1fe   : > { %9332 = vmatmul.mubr.f32.gmra.mrb[2].mxu0 %v7754_v32  ;;  %v7802_v32 = vld [vmem:[%s11962_s15 + $0x51] sm:$0xff] }
 0x1ff   : > { %9334 = vmatprep.mubr.f32.mxu0 %v7755_v37  ;;  %10567 = vmatpush3.bf16.msra.mxu0 %v10564_v19  ;;  %v7883_v19 = vld [vmem:[%s13840_s1 + $0x420] sm:$0xff]  ;;  %v3814_v37 = vld [vmem:[#allocation5 + $0x20] sm:$0xff] }
 0x200   : > { %10569 = vmatprep.subr.bf16.mxu0 %v10568_v38  ;;  %v10600_v44 = vpack.c.bf16 %v7884_v24, %v7883_v19  ;;  %v7848_v19 = vld [vmem:[%s11962_s15 + $0x3a] sm:$0xff]  ;;  %v7849_v24 = vld [vmem:[%s11962_s15 + $0x4a] sm:$0xff] }
 0x202   : > { %9335 = vmatmul.mubr.f32.gmra.mrb[4].mxu0 %v7756_v47  ;;  %v7885_v47 = vld [vmem:[%s13840_s1 + $0x430] sm:$0xff] }
 0x203   : > { %9337 = vmatprep.mubr.f32.mxu0 %v7757_v54  ;;  %10571 = vmatpush3.bf16.msra.mxu0 %v10568_v38  ;;  %v3815_v38 = vld [vmem:[#allocation5 + $0x28] sm:$0xff] }
 0x204   : > { %10573 = vmatprep.subr.bf16.mxu0 %v10572_v31  ;;  %v7886_v54 = vld [vmem:[%s13840_s1 + $0x438] sm:$0xff] }
 0x206   : > { %9338 = vmatmul.mubr.f32.gmra.mrb[6].mxu0 %v7758_v36  ;;  %v3817_v36 = vld [vmem:[#allocation5 + $0x38] sm:$0xff] }
 0x207   : > { %9340 = vmatprep.mubr.f32.mxu0 %v7759_v21  ;;  %10575 = vmatpush3.bf16.msra.mxu0 %v10572_v31  ;;  %v12878_v31 = vpack.c.bf16 %v3815_v38, %v3814_v37  ;;  %v7805_v21 = vld [vmem:[%s11962_s15 + $0x79] sm:$0xff]  ;;  %v7854_v38 = vld [vmem:[%s11962_s15 + $0x82] sm:$0xff] }
 0x208   : > { %10577 = vmatprep.subr.bf16.mxu0 %v10576_v40  ;;  %v7853_v37 = vld [vmem:[%s11962_s15 + $0x7a] sm:$0xff] }
 0x20a   : > { %9341 = vmatmul.mubr.f32.gmra.mrb[8].mxu0 %v7760_v45  ;;  %v12890_v45 = vpack.c.bf16 %v3817_v36, %v3816_v35  ;;  %v7863_v35 = vld [vmem:[%s11962_s15 + $0xf2] sm:$0xff]  ;;  %v7864_v36 = vld [vmem:[%s11962_s15 + $0xfa] sm:$0xff] }
 0x20b   : > { %9343 = vmatprep.mubr.f32.mxu0 %v7761_v46  ;;  %10579 = vmatpush3.bf16.msra.mxu0 %v10576_v40  ;;  %v10604_v40 = vpack.c.bf16 %v7886_v54, %v7885_v47  ;;  %v7806_v46 = vld [vmem:[%s11962_s15 + $0x81] sm:$0xff]  ;;  %v7860_v54 = vld [vmem:[%s11962_s15 + $0xca] sm:$0xff] }
 0x20c   : > { %10581 = vmatprep.subr.bf16.mxu0 %v10580_v20  ;;  %v7859_v47 = vld [vmem:[%s11962_s15 + $0xc2] sm:$0xff] }
 0x20e   : > { %9344 = vmatmul.mubr.f32.gmra.mrb[10].mxu0 %v7762_v57  ;;  %v10608_v57 = vpack.c.bf16 %v7888_v53, %v7887_v41  ;;  %v7867_v41 = vld [vmem:[%s11962_s15 + $0x122] sm:$0xff]  ;;  %v7868_v53 = vld [vmem:[%s11962_s15 + $0x12a] sm:$0xff] }
 0x20f   : > { %9346 = vmatprep.mubr.f32.mxu0 %v7763_v55  ;;  %10583 = vmatpush3.bf16.msra.mxu0 %v10580_v20  ;;  %v3818_v20 = vld [vmem:[#allocation5 + $0x40] sm:$0xff] }
 0x210   : > { %10585 = vmatprep.subr.bf16.mxu0 %v10584_v56  ;;  %v7889_v55 = vld [vmem:[%s13840_s1 + $0x450] sm:$0xff]  ;;  %v12902_v26 = vpack.c.bf16 %v3819_v50, %v3818_v20  ;;  %v7872_v50 = vld [vmem:[%s11962_s15 + $0x15a] sm:$0xff] }
 0x211   : > { %v7871_v20 = vld [vmem:[%s11962_s15 + $0x152] sm:$0xff] }
 0x212   : > { %9347 = vmatmul.mubr.f32.gmra.mrb[12].mxu0 %v7764_v2  ;;  %v3820_v2 = vld [vmem:[#allocation5 + $0x50] sm:$0xff] }
 0x213   : > { %9349 = vmatprep.mubr.f32.mxu0 %v7765_v4  ;;  %10587 = vmatpush3.bf16.msra.mxu0 %v10584_v56  ;;  %v7890_v56 = vld [vmem:[%s13840_s1 + $0x458] sm:$0xff]  ;;  %v3821_v4 = vld [vmem:[#allocation5 + $0x58] sm:$0xff] }
 0x214   : > { %10589 = vmatprep.subr.bf16.mxu0 %v10588_v5  ;;  %v10612_v6 = vpack.c.bf16 %v7890_v56, %v7889_v55  ;;  %v7877_v55 = vld [vmem:[%s11962_s15 + $0x19a] sm:$0xff]  ;;  %v7878_v56 = vld [vmem:[%s11962_s15 + $0x1a2] sm:$0xff] }
 0x216   : > { %9350 = vmatmul.mubr.f32.gmra.mrb[14].mxu0 %v7766_v8  ;;  %v7892_v8 = vld [vmem:[%s13840_s1 + $0x468] sm:$0xff] }
 0x217   : > { %9352 = vmatprep.mubr.f32.mxu0 %v7767_v63  ;;  %10591 = vmatpush3.bf16.msra.mxu0 %v10588_v5  ;;  %v7809_v5 = vld [vmem:[%s11962_s15 + $0xa9] sm:$0xff]  ;;  %v12914_v63 = vpack.c.bf16 %v3821_v4, %v3820_v2  ;;  %v11734_v4 = vmov 0.0  }
 0x218   : > { %10593 = vmatprep.subr.bf16.mxu0 %v10592_v9  ;;  %3702 = vst [vmem:[#allocation2] sm:$0xff] %v11734_v4  ;;  %3703 = vst [vmem:[#allocation2 + $0x8] sm:$0xff] %v11734_v4 }
 0x219   : > { %3704 = vst [vmem:[#allocation2 + $0x10] sm:$0x3] %v11734_v4  ;;  %3706 = vst [vmem:[#allocation2 + $0x198] sm:$0xff] %v11734_v4 }
 0x21a   : > { %9353 = vmatmul.mubr.f32.gmra.mrb[16].mxu0 %v7768_v10  ;;  %v7811_v10 = vld [vmem:[%s11962_s15 + $0xc1] sm:$0xff]  ;;  %3707 = vst [vmem:[#allocation2 + $0x1a0] sm:$0xff] %v11734_v4  ;;  %3708 = vst [vmem:[#allocation2 + $0x1a8] sm:$0x3] %v11734_v4 }
 0x21b   : > { %9355 = vmatprep.mubr.f32.mxu0 %v7769_v11  ;;  %v10616_v11 = vpack.c.bf16 %v7892_v8, %v7891_v7  ;;  %3710 = vst [vmem:[#allocation2 + $0x18] sm:$0x1] %v11734_v4  ;;  %3711 = vst [vmem:[#allocation2 + $0x30] sm:$0x1] %v11734_v4  ;;  %v4116_v7 = vld [vmem:[#allocation5 + $0x80] sm:$0xff]  ;;  %v4117_v8 = vld [vmem:[#allocation5 + $0x88] sm:$0xff] }
 0x21c   : > { %3712 = vst [vmem:[#allocation2 + $0x48] sm:$0x1] %v11734_v4  ;;  %3713 = vst [vmem:[#allocation2 + $0x60] sm:$0x1] %v11734_v4 }
 0x21d   : > { %3714 = vst [vmem:[#allocation2 + $0x78] sm:$0x1] %v11734_v4  ;;  %3715 = vst [vmem:[#allocation2 + $0x90] sm:$0x1] %v11734_v4 }
 0x21e   : > { %9356 = vmatmul.mubr.f32.gmra.mrb[18].mxu0 %v7770_v12  ;;  %v7893_v12 = vld [vmem:[%s13840_s1 + $0x470] sm:$0xff]  ;;  %3716 = vst [vmem:[#allocation2 + $0xa8] sm:$0x1] %v11734_v4  ;;  %3717 = vst [vmem:[#allocation2 + $0xc0] sm:$0x1] %v11734_v4 }
 0x21f   : > { %9358 = vmatprep.mubr.f32.mxu0 %v7771_v13  ;;  %v7894_v13 = vld [vmem:[%s13840_s1 + $0x478] sm:$0xff]  ;;  %3718 = vst [vmem:[#allocation2 + $0xd8] sm:$0x1] %v11734_v4  ;;  %3719 = vst [vmem:[#allocation2 + $0xf0] sm:$0x1] %v11734_v4 }
 0x220   : > { %3720 = vst [vmem:[#allocation2 + $0x108] sm:$0x1] %v11734_v4  ;;  %3721 = vst [vmem:[#allocation2 + $0x120] sm:$0x1] %v11734_v4 }
 0x221   : > { %3722 = vst [vmem:[#allocation2 + $0x138] sm:$0x1] %v11734_v4  ;;  %3723 = vst [vmem:[#allocation2 + $0x150] sm:$0x1] %v11734_v4 }
 0x222   : > { %9359 = vmatmul.mubr.f32.gmra.mrb[20].mxu0 %v7772_v48  ;;  %v7812_v48 = vld [vmem:[%s11962_s15 + $0xc9] sm:$0xff]  ;;  %3724 = vst [vmem:[#allocation2 + $0x168] sm:$0x1] %v11734_v4  ;;  %3725 = vst [vmem:[#allocation2 + $0x180] sm:$0x1] %v11734_v4 }
 0x223   : > { %9361 = vmatprep.mubr.f32.mxu0 %v7773_v14  ;;  %v7813_v14 = vld [vmem:[%s11962_s15 + $0xd9] sm:$0xff]  ;;  %3728 = vst [vmem:[#allocation2 + $0x29] sm:$0x1] %v11734_v4  ;;  %3729 = vst [vmem:[#allocation2 + $0x41] sm:$0x1] %v11734_v4 }
 0x224   : > { %3730 = vst [vmem:[#allocation2 + $0x59] sm:$0x1] %v11734_v4  ;;  %3731 = vst [vmem:[#allocation2 + $0x71] sm:$0x1] %v11734_v4 }
 0x225   : > { %3732 = vst [vmem:[#allocation2 + $0x89] sm:$0x1] %v11734_v4  ;;  %3733 = vst [vmem:[#allocation2 + $0xa1] sm:$0x1] %v11734_v4 }
 0x226   : > { %9362 = vmatmul.mubr.f32.gmra.mrb[22].mxu0 %v7774_v15  ;;  %v10620_v15 = vpack.c.bf16 %v7894_v13, %v7893_v12  ;;  %3734 = vst [vmem:[#allocation2 + $0xb9] sm:$0x1] %v11734_v4  ;;  %3735 = vst [vmem:[#allocation2 + $0xd1] sm:$0x1] %v11734_v4 }
 0x227   : > { %9364 = vmatprep.mubr.f32.mxu0 %v7775_v16  ;;  %v7814_v16 = vld [vmem:[%s11962_s15 + $0xe1] sm:$0xff]  ;;  %3736 = vst [vmem:[#allocation2 + $0xe9] sm:$0x1] %v11734_v4  ;;  %3737 = vst [vmem:[#allocation2 + $0x101] sm:$0x1] %v11734_v4 }
 0x228   : > { %3738 = vst [vmem:[#allocation2 + $0x119] sm:$0x1] %v11734_v4  ;;  %3739 = vst [vmem:[#allocation2 + $0x131] sm:$0x1] %v11734_v4 }
 0x229   : > { %3740 = vst [vmem:[#allocation2 + $0x149] sm:$0x1] %v11734_v4  ;;  %3741 = vst [vmem:[#allocation2 + $0x161] sm:$0x1] %v11734_v4 }
 0x22a   : > { %9365 = vmatmul.mubr.f32.gmra.mrb[24].mxu0 %v7776_v62  ;;  %v7815_v62 = vld [vmem:[%s11962_s15 + $0xf1] sm:$0xff]  ;;  %3742 = vst [vmem:[#allocation2 + $0x179] sm:$0x1] %v11734_v4  ;;  %3743 = vst [vmem:[#allocation2 + $0x191] sm:$0x1] %v11734_v4 }
 0x22b   : > { %9367 = vmatprep.mubr.f32.mxu0 %v7777_v17  ;;  %v7816_v17 = vld [vmem:[%s11962_s15 + $0xf9] sm:$0xff]  ;;  %3709 = vst [vmem:[#allocation2] sm:$0x1] %v11734_v4  ;;  %3726 = vst [vmem:[#allocation2 + $0x198] sm:$0x1] %v11734_v4 }
 0x22c   : > { %3727 = vst [vmem:[#allocation2 + $0x11] sm:$0x1] %v11734_v4  ;;  %3744 = vst [vmem:[#allocation2 + $0x1a9] sm:$0x1] %v11734_v4 }
 0x22e   : > { %9368 = vmatmul.mubr.f32.gmra.mrb[26].mxu0 %v7778_v18  ;;  %v7817_v18 = vld [vmem:[%s11962_s15 + $0x109] sm:$0xff] }
 0x22f   : > { %9370 = vmatprep.mubr.f32.mxu0 %v12588_v61  ;;  %v7800_v61 = vld [vmem:[%s11962_s15 + $0x39] sm:$0xff] }
 0x232   : > { %9371 = vmatmul.mubr.f32.gmra.mrb[28].mxu0 %v12593_v1  ;;  %v3812_v1 = vld [vmem:[#allocation5 + $0x10] sm:$0xff] }
 0x233   : > { %9373 = vmatprep.mubr.f32.mxu0 %v7781_v23  ;;  %v12866_v29 = vpack.c.bf16 %v3813_v59, %v3812_v1  ;;  %v7818_v23 = vld [vmem:[%s11962_s15 + $0x111] sm:$0xff]  ;;  %v7829_v59 = vld [vmem:[%s11962_s15 + $0x199] sm:$0xff] }
 0x234   : > { %v7826_v1 = vld [vmem:[%s11962_s15 + $0x171] sm:$0xff] }
 0x235   : > { %10945 = vmatprep.subr.bf16.mxu1 %v12866_v29 }
 0x236   : > { %9374 = vmatmul.mubr.f32.gmra.mrb[30].mxu0 %v7782_v27  ;;  %10953 = vmatpush3.bf16.msra.mxu1 %v12866_v29  ;;  %v7819_v27 = vld [vmem:[%s11962_s15 + $0x121] sm:$0xff] }
 0x237   : > { %9408 = vmatprep.mubr.f32.mxu0 %v7799_v28  ;;  %10946 = vmatprep.subr.bf16.mxu1 %v12878_v31  ;;  %v7820_v28 = vld [vmem:[%s11962_s15 + $0x129] sm:$0xff] }
 0x23a   : > { %9409 = vmatmul.mubr.f32.vlgmr.msra.gmra.mrb[0].mxu0 %v7800_v61  ;;  %10954 = vmatpush3.bf16.msra.mxu1 %v12878_v31  ;;  %v7825_v61 = vld [vmem:[%s11962_s15 + $0x169] sm:$0xff] }
 0x23b   : > { %10595 = vmatpush3.bf16.msra.mxu0 %v10592_v9  ;;  %9411 = vmatprep.mubr.f32.mxu0 %v7801_v3  ;;  %v7810_v9 = vld [vmem:[%s11962_s15 + $0xb1] sm:$0xff]  ;;  %v7830_v3 = vld [vmem:[%s11962_s15 + $0x1a1] sm:$0xff] }
 0x23c   : > { %10597 = vmatprep.subr.bf16.mxu0 %v10596_v22  ;;  %10947 = vmatprep.subr.bf16.mxu1 %v12890_v45 }
 0x23e   : > { %9412 = vmatmul.mubr.f32.gmra.mrb[2].mxu0 %v7802_v32  ;;  %10955 = vmatpush3.bf16.msra.mxu1 %v12890_v45  ;;  %v7850_v32 = vld [vmem:[%s11962_s15 + $0x52] sm:$0xff] }
 0x23f   : > { %9414 = vmatprep.mubr.f32.mxu0 %v7803_v39  ;;  %10599 = vmatpush3.bf16.msra.mxu0 %v10596_v22  ;;  %v7847_v22 = vld [vmem:[%s11962_s15 + $0x32] sm:$0xff]  ;;  %v7856_v39 = vld [vmem:[%s11962_s15 + $0x9a] sm:$0xff] }
 0x240   : > { %10601 = vmatprep.subr.bf16.mxu0 %v10600_v44  ;;  %10948 = vmatprep.subr.bf16.mxu1 %v12902_v26 }
 0x242   : > { %9415 = vmatmul.mubr.f32.gmra.mrb[4].mxu0 %v7804_v0  ;;  %10956 = vmatpush3.bf16.msra.mxu1 %v12902_v26  ;;  %v7862_v0 = vld [vmem:[%s11962_s15 + $0xe2] sm:$0xff] }
 0x243   : > { %9417 = vmatprep.mubr.f32.mxu0 %v7805_v21  ;;  %10603 = vmatpush3.bf16.msra.mxu0 %v10600_v44  ;;  %v7858_v44 = vld [vmem:[%s11962_s15 + $0xb2] sm:$0xff]  ;;  %v7865_v21 = vld [vmem:[%s11962_s15 + $0x10a] sm:$0xff] }
 0x244   : > { %10605 = vmatprep.subr.bf16.mxu0 %v10604_v40  ;;  %10949 = vmatprep.subr.bf16.mxu1 %v12914_v63 }
 0x246   : > { %9418 = vmatmul.mubr.f32.gmra.mrb[6].mxu0 %v7806_v46  ;;  %10957 = vmatpush3.bf16.msra.mxu1 %v12914_v63  ;;  %v7870_v46 = vld [vmem:[%s11962_s15 + $0x142] sm:$0xff] }
 0x247   : > { %9420 = vmatprep.mubr.f32.mxu0 %v7807_v51  ;;  %10607 = vmatpush3.bf16.msra.mxu0 %v10604_v40  ;;  %v7866_v40 = vld [vmem:[%s11962_s15 + $0x112] sm:$0xff]  ;;  %v7873_v51 = vld [vmem:[%s11962_s15 + $0x16a] sm:$0xff] }
 0x248   : > { %10609 = vmatprep.subr.bf16.mxu0 %v10608_v57 }
 0x24a   : > { %9421 = vmatmul.mubr.f32.gmra.mrb[8].mxu0 %v7808_v60  ;;  %v3823_v60 = vld [vmem:[#allocation5 + $0x68] sm:$0xff] }
 0x24b   : > { %9423 = vmatprep.mubr.f32.mxu0 %v7809_v5  ;;  %10611 = vmatpush3.bf16.msra.mxu0 %v10608_v57  ;;  %v7874_v57 = vld [vmem:[%s11962_s15 + $0x172] sm:$0xff] }
 0x24c   : > { %10613 = vmatprep.subr.bf16.mxu0 %v10612_v6 }
 0x24e   : > { %9424 = vmatmul.mubr.f32.gmra.mrb[10].mxu0 %v7810_v9  ;;  %v12996_v9 = vld [vmem:[%s13841_s2] ss:$0 sm:$0xff] }
 0x24f   : > { %9426 = vmatprep.mubr.f32.mxu0 %v7811_v10  ;;  %10615 = vmatpush3.bf16.msra.mxu0 %v10612_v6  ;;  %v3778_v6 = vld [vmem:[#allocation2] sm:$0xff] }
 0x250   : > { %10617 = vmatprep.subr.bf16.mxu0 %v10616_v11 }
 0x252   : > { %9427 = vmatmul.mubr.f32.gmra.mrb[12].mxu0 %v7812_v48 }
 0x253   : > { %9429 = vmatprep.mubr.f32.mxu0 %v7813_v14  ;;  %10619 = vmatpush3.bf16.msra.mxu0 %v10616_v11 }
 0x254   : > { %10621 = vmatprep.subr.bf16.mxu0 %v10620_v15 }
 0x256   : > { %9430 = vmatmul.mubr.f32.gmra.mrb[14].mxu0 %v7814_v16 }
 0x257   : > { %9432 = vmatprep.mubr.f32.mxu0 %v7815_v62  ;;  %10623 = vmatpush3.bf16.msra.mxu0 %v10620_v15 }
 0x258   : > { %10625 = vmatprep.subr.bf16.mxu0 %v12856_v58 }
 0x25a   : > { %9433 = vmatmul.mubr.f32.gmra.mrb[16].mxu0 %v7816_v17 }
 0x25b   : > { %9435 = vmatprep.mubr.f32.mxu0 %v7817_v18 }
 0x25e   : > { %9436 = vmatmul.mubr.f32.gmra.mrb[18].mxu0 %v7818_v23 }
 0x25f   : > { %9438 = vmatprep.mubr.f32.mxu0 %v7819_v27 }
 0x262   : > { %9439 = vmatmul.mubr.f32.gmra.mrb[20].mxu0 %v7820_v28 }
 0x263   : > { %9441 = vmatprep.mubr.f32.mxu0 %v7821_v33 }
 0x266   : > { %9442 = vmatmul.mubr.f32.gmra.mrb[22].mxu0 %v7822_v34 }
 0x267   : > { %9444 = vmatprep.mubr.f32.mxu0 %v7823_v42 }
 0x26a   : > { %9445 = vmatmul.mubr.f32.gmra.mrb[24].mxu0 %v7824_v52 }
 0x26b   : > { %9447 = vmatprep.mubr.f32.mxu0 %v7825_v61 }
 0x26e   : > { %9448 = vmatmul.mubr.f32.gmra.mrb[26].mxu0 %v7826_v1 }
 0x26f   : > { %9450 = vmatprep.mubr.f32.mxu0 %v12674_v25  ;;  %v7851_v25 = vld [vmem:[%s11962_s15 + $0x62] sm:$0xff] }
 0x272   : > { %9451 = vmatmul.mubr.f32.gmra.mrb[28].mxu0 %v12679_v30  ;;  %v7852_v30 = vld [vmem:[%s11962_s15 + $0x6a] sm:$0xff] }
 0x273   : > { %9453 = vmatprep.mubr.f32.mxu0 %v7829_v59 }
 0x276   : > { %9454 = vmatmul.mubr.f32.gmra.mrb[30].mxu0 %v7830_v3 }
 0x277   : > { %9488 = vmatprep.mubr.f32.mxu0 %v7847_v22 }
 0x27a   : > { %9489 = vmatmul.mubr.f32.vlgmr.msra.gmra.mrb[0].mxu0 %v7848_v19 }
 0x27b   : > { %9491 = vmatprep.mubr.f32.mxu0 %v7849_v24  ;;  %10627 = vmatpush3.bf16.msra.mxu0 %v12856_v58  ;;  %v7855_v58 = vld [vmem:[%s11962_s15 + $0x92] sm:$0xff] }
 0x27c   : > { %10629 = vmatprep.subr.bf16.mxu0 %v12866_v29 }
 0x27e   : > { %9492 = vmatmul.mubr.f32.gmra.mrb[2].mxu0 %v7850_v32 }
 0x27f   : > { %9494 = vmatprep.mubr.f32.mxu0 %v7851_v25  ;;  %10631 = vmatpush3.bf16.msra.mxu0 %v12866_v29  ;;  %v7857_v29 = vld [vmem:[%s11962_s15 + $0xaa] sm:$0xff] }
 0x280   : > { %10633 = vmatprep.subr.bf16.mxu0 %v12878_v31 }
 0x282   : > { %9495 = vmatmul.mubr.f32.gmra.mrb[4].mxu0 %v7852_v30 }
 0x283   : > { %9497 = vmatprep.mubr.f32.mxu0 %v7853_v37  ;;  %10635 = vmatpush3.bf16.msra.mxu0 %v12878_v31  ;;  %v7861_v31 = vld [vmem:[%s11962_s15 + $0xda] sm:$0xff] }
 0x284   : > { %10637 = vmatprep.subr.bf16.mxu0 %v12890_v45 }
 0x286   : > { %9498 = vmatmul.mubr.f32.gmra.mrb[6].mxu0 %v7854_v38 }
 0x287   : > { %9500 = vmatprep.mubr.f32.mxu0 %v7855_v58  ;;  %10639 = vmatpush3.bf16.msra.mxu0 %v12890_v45  ;;  %v7869_v45 = vld [vmem:[%s11962_s15 + $0x13a] sm:$0xff] }
 0x288   : > { %10641 = vmatprep.subr.bf16.mxu0 %v12902_v26 }
 0x28a   : > { %9501 = vmatmul.mubr.f32.gmra.mrb[8].mxu0 %v7856_v39 }
 0x28b   : > { %9503 = vmatprep.mubr.f32.mxu0 %v7857_v29  ;;  %10643 = vmatpush3.bf16.msra.mxu0 %v12902_v26  ;;  %v3822_v26 = vld [vmem:[#allocation5 + $0x60] sm:$0xff] }
 0x28c   : > { %10645 = vmatprep.subr.bf16.mxu0 %v12914_v63  ;;  %v10648_v2 = vpack.c.bf16 %v3823_v60, %v3822_v26 }
 0x28e   : > { %9504 = vmatmul.mubr.f32.gmra.mrb[10].mxu0 %v7858_v44  ;;  %10950 = vmatprep.subr.bf16.mxu1 %v10648_v2 }
 0x28f   : > { %9506 = vmatprep.mubr.f32.mxu0 %v7859_v47  ;;  %10647 = vmatpush3.bf16.msra.mxu0 %v12914_v63  ;;  %v12990_v63 = vpack.c.bf16 %v4117_v8, %v4116_v7 }
 0x290   : > { %10649 = vmatprep.subr.bf16.mxu0 %v10648_v2  ;;  %10958 = vmatpush3.bf16.msra.mxu1 %v10648_v2 }
 0x292   : > { %9507 = vmatmul.mubr.f32.gmra.mrb[12].mxu0 %v7860_v54 }
 0x293   : > { %9509 = vmatprep.mubr.f32.mxu0 %v7861_v31  ;;  %10651 = vmatpush3.bf16.msra.mxu0 %v10648_v2 }
 0x296   : > { %9510 = vmatmul.mubr.f32.gmra.mrb[14].mxu0 %v7862_v0 }
 0x297   : > { %9512 = vmatprep.mubr.f32.mxu0 %v7863_v35 }
 0x29a   : > { %9513 = vmatmul.mubr.f32.gmra.mrb[16].mxu0 %v7864_v36 }
 0x29b   : > { %9515 = vmatprep.mubr.f32.mxu0 %v7865_v21 }
 0x29e   : > { %9516 = vmatmul.mubr.f32.gmra.mrb[18].mxu0 %v7866_v40 }
 0x29f   : > { %9518 = vmatprep.mubr.f32.mxu0 %v7867_v41 }
 0x2a2   : > { %9519 = vmatmul.mubr.f32.gmra.mrb[20].mxu0 %v7868_v53 }
 0x2a3   : > { %9521 = vmatprep.mubr.f32.mxu0 %v7869_v45 }
 0x2a6   : > { %9522 = vmatmul.mubr.f32.gmra.mrb[22].mxu0 %v7870_v46 }
 0x2a7   : > { %9524 = vmatprep.mubr.f32.mxu0 %v7871_v20 }
 0x2aa   : > { %9525 = vmatmul.mubr.f32.gmra.mrb[24].mxu0 %v7872_v50 }
 0x2ab   : > { %9527 = vmatprep.mubr.f32.mxu0 %v7873_v51 }
 0x2ae   : > { %9528 = vmatmul.mubr.f32.gmra.mrb[26].mxu0 %v7874_v57 }
 0x2af   : > { %9530 = vmatprep.mubr.f32.mxu0 %v12760_v43  ;;  %v3824_v43 = vld [vmem:[#allocation5 + $0x70] sm:$0xff] }
 0x2b2   : > { %9531 = vmatmul.mubr.f32.gmra.mrb[28].mxu0 %v12765_v49  ;;  %v3825_v49 = vld [vmem:[#allocation5 + $0x78] sm:$0xff] }
 0x2b3   : > { %9533 = vmatprep.mubr.f32.mxu0 %v7877_v55  ;;  %v10652_v5 = vpack.c.bf16 %v3825_v49, %v3824_v43 }
 0x2b5   : > { %10653 = vmatprep.subr.bf16.mxu0 %v10652_v5  ;;  %10951 = vmatprep.subr.bf16.mxu1 %v10652_v5 }
 0x2b6   : > { %9534 = vmatmul.mubr.f32.gmra.mrb[30].mxu0 %v7878_v56  ;;  %10959 = vmatpush3.bf16.msra.mxu1 %v10652_v5 }
 0x2b7   : > { %10655 = vmatpush3.bf16.msra.mxu0 %v10652_v5  ;;  %9568 = vmatprep.mubr.f32.mxu0 %v3778_v6 }
 0x2b8   : > { %10657 = vmatprep.subr.bf16.mxu1 %v12990_v63 }
 0x2ba   : > { %9569 = vmatmul.mubr.f32.vlgmr.msra.gmra.mrb[32].mxu0 %v11734_v4 }
 0x34d   : > { %v9490_v10 = vpop.f32.mrb[0].mxu0 }
 0x34e   : > { %v12999_v11 = vadd.f32 %v9490_v10, %v12996_v9  ;;  %v3344_v12 = vpop.f32.mrb[1].mxu0 }
 0x34f   : > { %v13002_v13 = vadd.f32 %v12996_v9, %v3344_v12 }
 0x350   : > { %v13907_v48 = vmax.f32 %v12999_v11, 0.0 }
 0x351   : > { %v13908_v14 = vmax.f32 %v13002_v13, 0.0  ;;  %v9493_v15 = vpop.f32.mrb[2].mxu0 }
 0x352   : > { %3747 = vst [vmem:[#allocation2 + $0x21] sm:$0xff] %v13907_v48  ;;  %v13009_v16 = vadd.f32 %v9493_v15, %v12996_v9  ;;  %v3354_v62 = vpop.f32.mrb[3].mxu0 }
 0x353   : > { %3746 = vst [vmem:[#allocation2 + $0x19] sm:$0xff] %v13908_v14  ;;  %v13014_v17 = vadd.f32 %v12996_v9, %v3354_v62  ;;  %v4129_v14 = vld [vmem:[#allocation5 + $0xe8] sm:$0xff] }
 0x354   : > { %v13905_v18 = vmax.f32 %v13009_v16, 0.0 }
 0x355   : > { %v13906_v23 = vmax.f32 %v13014_v17, 0.0  ;;  %v9496_v27 = vpop.f32.mrb[4].mxu0 }
 0x356   : > { %3749 = vst [vmem:[#allocation2 + $0x39] sm:$0xff] %v13905_v18  ;;  %v13021_v28 = vadd.f32 %v9496_v27, %v12996_v9  ;;  %v3364_v33 = vpop.f32.mrb[5].mxu0 }
 0x357   : > { %3748 = vst [vmem:[#allocation2 + $0x31] sm:$0xff] %v13906_v23  ;;  %v13026_v34 = vadd.f32 %v12996_v9, %v3364_v33 }
 0x358   : > { %v13903_v42 = vmax.f32 %v13021_v28, 0.0 }
 0x359   : > { %v13904_v52 = vmax.f32 %v13026_v34, 0.0  ;;  %v9499_v61 = vpop.f32.mrb[6].mxu0 }
 0x35a   : > { %3751 = vst [vmem:[#allocation2 + $0x51] sm:$0xff] %v13903_v42  ;;  %v13033_v1 = vadd.f32 %v9499_v61, %v12996_v9  ;;  %v3374_v59 = vpop.f32.mrb[7].mxu0  ;;  %v13035_v3 = vld [vmem:[#allocation2 + $0x18] sm:$0xff]  ;;  %v13037_v22 = vld [vmem:[#allocation2 + $0x20] sm:$0xff] }
 0x35b   : > { %3750 = vst [vmem:[#allocation2 + $0x49] sm:$0xff] %v13904_v52  ;;  %v13042_v19 = vadd.f32 %v12996_v9, %v3374_v59  ;;  %9571 = vmatprep.mubr.f32.mxu0 %v13035_v3  ;;  %v4127_v52 = vld [vmem:[#allocation5 + $0xd8] sm:$0xff] }
 0x35c   : > { %v13899_v24 = vmax.f32 %v13033_v1, 0.0  ;;  %9572 = vmatmul.mubr.f32.gmra.mrb[34].mxu0 %v13037_v22 }
 0x35d   : > { %v13900_v32 = vmax.f32 %v13042_v19, 0.0  ;;  %v9502_v25 = vpop.f32.mrb[8].mxu0 }
 0x35e   : > { %3753 = vst [vmem:[#allocation2 + $0x69] sm:$0xff] %v13899_v24  ;;  %v13051_v30 = vadd.f32 %v9502_v25, %v12996_v9  ;;  %v3384_v37 = vpop.f32.mrb[9].mxu0  ;;  %v13053_v38 = vld [vmem:[#allocation2 + $0x30] sm:$0xff]  ;;  %v13055_v58 = vld [vmem:[#allocation2 + $0x38] sm:$0xff] }
 0x35f   : > { %3752 = vst [vmem:[#allocation2 + $0x61] sm:$0xff] %v13900_v32  ;;  %v13060_v39 = vadd.f32 %v12996_v9, %v3384_v37  ;;  %9574 = vmatprep.mubr.f32.mxu0 %v13053_v38  ;;  %v4125_v24 = vld [vmem:[#allocation5 + $0xc8] sm:$0xff] }
 0x360   : > { %v13897_v29 = vmax.f32 %v13051_v30, 0.0  ;;  %9575 = vmatmul.mubr.f32.gmra.mrb[36].mxu0 %v13055_v58 }
 0x361   : > { %v13898_v44 = vmax.f32 %v13060_v39, 0.0  ;;  %v9505_v47 = vpop.f32.mrb[10].mxu0 }
 0x362   : > { %3755 = vst [vmem:[#allocation2 + $0x81] sm:$0xff] %v13897_v29  ;;  %v13069_v54 = vadd.f32 %v9505_v47, %v12996_v9  ;;  %v3394_v31 = vpop.f32.mrb[11].mxu0  ;;  %v13071_v0 = vld [vmem:[#allocation2 + $0x48] sm:$0xff]  ;;  %v13073_v35 = vld [vmem:[#allocation2 + $0x50] sm:$0xff]  ;;  %v4118_v47 = vld [vmem:[#allocation5 + $0x90] sm:$0xff] }
 0x363   : > { %3754 = vst [vmem:[#allocation2 + $0x79] sm:$0xff] %v13898_v44  ;;  %v13078_v36 = vadd.f32 %v12996_v9, %v3394_v31  ;;  %9577 = vmatprep.mubr.f32.mxu0 %v13071_v0  ;;  %v4119_v31 = vld [vmem:[#allocation5 + $0x98] sm:$0xff] }
 0x364   : > { %v13894_v21 = vmax.f32 %v13069_v54, 0.0  ;;  %9578 = vmatmul.mubr.f32.gmra.mrb[38].mxu0 %v13073_v35 }
 0x365   : > { %v13895_v40 = vmax.f32 %v13078_v36, 0.0  ;;  %v9508_v41 = vpop.f32.mrb[12].mxu0 }
 0x366   : > { %3757 = vst [vmem:[#allocation2 + $0x99] sm:$0xff] %v13894_v21  ;;  %v13087_v53 = vadd.f32 %v9508_v41, %v12996_v9  ;;  %v3404_v45 = vpop.f32.mrb[13].mxu0  ;;  %v13089_v46 = vld [vmem:[#allocation2 + $0x60] sm:$0xff]  ;;  %v13091_v20 = vld [vmem:[#allocation2 + $0x68] sm:$0xff] }
 0x367   : > { %3756 = vst [vmem:[#allocation2 + $0x91] sm:$0xff] %v13895_v40  ;;  %v13096_v50 = vadd.f32 %v12996_v9, %v3404_v45  ;;  %9580 = vmatprep.mubr.f32.mxu0 %v13089_v46 }
 0x368   : > { %v13891_v51 = vmax.f32 %v13087_v53, 0.0  ;;  %9581 = vmatmul.mubr.f32.gmra.mrb[40].mxu0 %v13091_v20 }
 0x369   : > { %v13892_v57 = vmax.f32 %v13096_v50, 0.0  ;;  %v9511_v55 = vpop.f32.mrb[14].mxu0 }
 0x36a   : > { %3759 = vst [vmem:[#allocation2 + $0xb1] sm:$0xff] %v13891_v51  ;;  %v13105_v56 = vadd.f32 %v9511_v55, %v12996_v9  ;;  %v3414_v26 = vpop.f32.mrb[15].mxu0  ;;  %v13107_v60 = vld [vmem:[#allocation2 + $0x78] sm:$0xff]  ;;  %v13109_v2 = vld [vmem:[#allocation2 + $0x80] sm:$0xff] }
 0x36b   : > { %3758 = vst [vmem:[#allocation2 + $0xa9] sm:$0xff] %v13892_v57  ;;  %v13114_v4 = vadd.f32 %v12996_v9, %v3414_v26  ;;  %9583 = vmatprep.mubr.f32.mxu0 %v13107_v60 }
 0x36c   : > { %v13887_v43 = vmax.f32 %v13105_v56, 0.0  ;;  %9584 = vmatmul.mubr.f32.gmra.mrb[42].mxu0 %v13109_v2 }
 0x36d   : > { %v13889_v49 = vmax.f32 %v13114_v4, 0.0  ;;  %v9514_v5 = vpop.f32.mrb[16].mxu0 }
 0x36e   : > { %3761 = vst [vmem:[#allocation2 + $0xc9] sm:$0xff] %v13887_v43  ;;  %v13123_v6 = vadd.f32 %v9514_v5, %v12996_v9  ;;  %v3424_v7 = vpop.f32.mrb[17].mxu0  ;;  %v13125_v8 = vld [vmem:[#allocation2 + $0x90] sm:$0xff]  ;;  %v13127_v10 = vld [vmem:[#allocation2 + $0x98] sm:$0xff] }
 0x36f   : > { %3760 = vst [vmem:[#allocation2 + $0xc1] sm:$0xff] %v13889_v49  ;;  %v13132_v12 = vadd.f32 %v12996_v9, %v3424_v7  ;;  %9586 = vmatprep.mubr.f32.mxu0 %v13125_v8  ;;  %v4121_v43 = vld [vmem:[#allocation5 + $0xa8] sm:$0xff] }
 0x370   : > { %v13885_v15 = vmax.f32 %v13123_v6, 0.0  ;;  %9587 = vmatmul.mubr.f32.gmra.mrb[44].mxu0 %v13127_v10 }
 0x371   : > { %v13886_v62 = vmax.f32 %v13132_v12, 0.0  ;;  %v9517_v27 = vpop.f32.mrb[18].mxu0 }
 0x372   : > { %3763 = vst [vmem:[#allocation2 + $0xe1] sm:$0xff] %v13885_v15  ;;  %v13141_v33 = vadd.f32 %v9517_v27, %v12996_v9  ;;  %v3434_v61 = vpop.f32.mrb[19].mxu0  ;;  %v13143_v59 = vld [vmem:[#allocation2 + $0xa8] sm:$0xff]  ;;  %v13145_v25 = vld [vmem:[#allocation2 + $0xb0] sm:$0xff] }
 0x373   : > { %3762 = vst [vmem:[#allocation2 + $0xd9] sm:$0xff] %v13886_v62  ;;  %v13150_v37 = vadd.f32 %v12996_v9, %v3434_v61  ;;  %9589 = vmatprep.mubr.f32.mxu0 %v13143_v59  ;;  %v10660_v61 = vpack.c.bf16 %v4119_v31, %v4118_v47  ;;  %v4120_v62 = vld [vmem:[#allocation5 + $0xa0] sm:$0xff] }
 0x374   : > { %v13888_v41 = vmax.f32 %v13141_v33, 0.0  ;;  %9590 = vmatmul.mubr.f32.gmra.mrb[46].mxu0 %v13145_v25  ;;  %v10664_v51 = vpack.c.bf16 %v4121_v43, %v4120_v62 }
 0x375   : > { %v13890_v45 = vmax.f32 %v13150_v37, 0.0  ;;  %v9520_v55 = vpop.f32.mrb[20].mxu0 }
 0x376   : > { %3765 = vst [vmem:[#allocation2 + $0xf9] sm:$0xff] %v13888_v41  ;;  %v13159_v26 = vadd.f32 %v9520_v55, %v12996_v9  ;;  %v3444_v5 = vpop.f32.mrb[21].mxu0  ;;  %v13161_v7 = vld [vmem:[#allocation2 + $0xc0] sm:$0xff]  ;;  %v13163_v27 = vld [vmem:[#allocation2 + $0xc8] sm:$0xff] }
 0x377   : > { %3764 = vst [vmem:[#allocation2 + $0xf1] sm:$0xff] %v13890_v45  ;;  %v13168_v15 = vadd.f32 %v12996_v9, %v3444_v5  ;;  %9592 = vmatprep.mubr.f32.mxu1 %v13161_v7 }
 0x378   : > { %v13893_v41 = vmax.f32 %v13159_v26, 0.0  ;;  %9593 = vmatmul.mubr.f32.vlgmr.msra.gmra.mrb[0].mxu1 %v13163_v27 }
 0x379   : > { %v13896_v55 = vmax.f32 %v13168_v15, 0.0  ;;  %v9523_v49 = vpop.f32.mrb[22].mxu0  ;;  %10659 = vmatpush3.bf16.msra.mxu1 %v12990_v63  ;;  %v4122_v63 = vld [vmem:[#allocation5 + $0xb0] sm:$0xff] }
 0x37a   : > { %3767 = vst [vmem:[#allocation2 + $0x111] sm:$0xff] %v13893_v41  ;;  %v13178_v47 = vadd.f32 %v9523_v49, %v12996_v9  ;;  %v3454_v31 = vpop.f32.mrb[23].mxu0  ;;  %v13180_v5 = vld [vmem:[#allocation2 + $0xd8] sm:$0xff]  ;;  %v13182_v45 = vld [vmem:[#allocation2 + $0xe0] sm:$0xff]  ;;  %10661 = vmatprep.subr.bf16.mxu1 %v10660_v61  ;;  %v4123_v41 = vld [vmem:[#allocation5 + $0xb8] sm:$0xff] }
 0x37b   : > { %3766 = vst [vmem:[#allocation2 + $0x109] sm:$0xff] %v13896_v55  ;;  %v13187_v57 = vadd.f32 %v12996_v9, %v3454_v31  ;;  %9595 = vmatprep.mubr.f32.mxu1 %v13180_v5  ;;  %v10668_v29 = vpack.c.bf16 %v4123_v41, %v4122_v63 }
 0x37c   : > { %v13901_v49 = vmax.f32 %v13178_v47, 0.0  ;;  %9596 = vmatmul.mubr.f32.gmra.mrb[2].mxu1 %v13182_v45 }
 0x37d   : > { %v13902_v21 = vmax.f32 %v13187_v57, 0.0  ;;  %v9526_v40 = vpop.f32.mrb[24].mxu0  ;;  %10663 = vmatpush3.bf16.msra.mxu1 %v10660_v61  ;;  %v4124_v61 = vld [vmem:[#allocation5 + $0xc0] sm:$0xff] }
 0x37e   : > { %3769 = vst [vmem:[#allocation2 + $0x129] sm:$0xff] %v13901_v49  ;;  %v3663_v43 = vadd.f32 %v9526_v40, %v12996_v9  ;;  %v3464_v62 = vpop.f32.mrb[25].mxu0  ;;  %v13196_v31 = vld [vmem:[#allocation2 + $0xf0] sm:$0xff]  ;;  %v13198_v55 = vld [vmem:[#allocation2 + $0xf8] sm:$0xff]  ;;  %10665 = vmatprep.subr.bf16.mxu1 %v10664_v51  ;;  %v10672_v42 = vpack.c.bf16 %v4125_v24, %v4124_v61 }
 0x37f   : > { %14005 = vst [vmem:[#allocation14_spill] sm:$0xff] %v13198_v55  ;;  %3768 = vst [vmem:[#allocation2 + $0x121] sm:$0xff] %v13902_v21  ;;  %v3662_v44 = vadd.f32 %v12996_v9, %v3464_v62  ;;  %9598 = vmatprep.mubr.f32.mxu1 %v13196_v31 }
 0x380   : > { %v13204_v32 = vmax.f32 %v3663_v43, 0.0  ;;  %9599 = vmatmul.mubr.f32.gmra.mrb[4].mxu1 %v13198_v55  ;;  %v14018_v55 = vmax.f32 %v12999_v11, 0.0  ;;  %v4497_v11 = vld [vmem:[#allocation5 + $0x158] sm:$0xff] }
 0x381   : > { %v13207_v40 = vmax.f32 %v3662_v44, 0.0  ;;  %v9529_v49 = vpop.f32.mrb[26].mxu0  ;;  %10667 = vmatpush3.bf16.msra.mxu1 %v10664_v51  ;;  %v4126_v44 = vld [vmem:[#allocation5 + $0xd0] sm:$0xff] }
 0x382   : > { %3771 = vst [vmem:[#allocation2 + $0x141] sm:$0xff] %v13204_v32  ;;  %v3665_v41 = vadd.f32 %v9529_v49, %v12996_v9  ;;  %v3474_v63 = vpop.f32.mrb[27].mxu0  ;;  %v13211_v21 = vld [vmem:[#allocation2 + $0x108] sm:$0xff]  ;;  %v13213_v62 = vld [vmem:[#allocation2 + $0x110] sm:$0xff]  ;;  %10669 = vmatprep.subr.bf16.mxu1 %v10668_v29  ;;  %v10676_v48 = vpack.c.bf16 %v4127_v52, %v4126_v44 }
 0x383   : > { %14006 = vst [vmem:[#allocation15_spill] sm:$0xff] %v13211_v21  ;;  %14007 = vst [vmem:[#allocation16_spill] sm:$0xff] %v13213_v62  ;;  %v3664_v43 = vadd.f32 %v12996_v9, %v3474_v63  ;;  %9601 = vmatprep.mubr.f32.mxu1 %v13211_v21 }
 0x384   : > { %3770 = vst [vmem:[#allocation2 + $0x139] sm:$0xff] %v13207_v40  ;;  %v13218_v51 = vmax.f32 %v3665_v41, 0.0  ;;  %9602 = vmatmul.mubr.f32.gmra.mrb[6].mxu1 %v13213_v62 }
 0x385   : > { %v13221_v49 = vmax.f32 %v3664_v43, 0.0  ;;  %v9532_v18 = vpop.f32.mrb[28].mxu0  ;;  %10671 = vmatpush3.bf16.msra.mxu1 %v10668_v29  ;;  %v4128_v43 = vld [vmem:[#allocation5 + $0xe0] sm:$0xff] }
 0x386   : > { %3773 = vst [vmem:[#allocation2 + $0x159] sm:$0xff] %v13218_v51  ;;  %v3667_v24 = vadd.f32 %v9532_v18, %v12996_v9  ;;  %v3484_v61 = vpop.f32.mrb[29].mxu0  ;;  %v13225_v23 = vld [vmem:[#allocation2 + $0x120] sm:$0xff]  ;;  %v13227_v63 = vld [vmem:[#allocation2 + $0x128] sm:$0xff]  ;;  %10673 = vmatprep.subr.bf16.mxu1 %v10672_v42 }
 0x387   : > { %14008 = vst [vmem:[#allocation17_spill] sm:$0xff] %v13225_v23  ;;  %14009 = vst [vmem:[#allocation18_spill] sm:$0xff] %v13227_v63  ;;  %v3666_v41 = vadd.f32 %v12996_v9, %v3484_v61  ;;  %9604 = vmatprep.mubr.f32.mxu1 %v13225_v23  ;;  %v10680_v23 = vpack.c.bf16 %v4129_v14, %v4128_v43 }
 0x388   : > { %3772 = vst [vmem:[#allocation2 + $0x151] sm:$0xff] %v13221_v49  ;;  %v13232_v29 = vmax.f32 %v3667_v24, 0.0  ;;  %9605 = vmatmul.mubr.f32.gmra.mrb[8].mxu1 %v13227_v63 }
 0x389   : > { %v13235_v18 = vmax.f32 %v3666_v41, 0.0  ;;  %v9535_v62 = vpop.f32.mrb[30].mxu0  ;;  %10675 = vmatpush3.bf16.msra.mxu1 %v10672_v42  ;;  %v4130_v42 = vld [vmem:[#allocation5 + $0xf0] sm:$0xff]  ;;  %v4131_v41 = vld [vmem:[#allocation5 + $0xf8] sm:$0xff] }
 0x38a   : > { %3775 = vst [vmem:[#allocation2 + $0x171] sm:$0xff] %v13232_v29  ;;  %v13239_v52 = vadd.f32 %v9535_v62, %v12996_v9  ;;  %v3494_v44 = vpop.f32.mrb[31].mxu0  ;;  %10677 = vmatprep.subr.bf16.mxu1 %v10676_v48 }
 0x38b   : > { %v13241_v21 = vld [vmem:[#allocation2 + $0x138] sm:$0xff]  ;;  %v13243_v61 = vld [vmem:[#allocation2 + $0x140] sm:$0xff]  ;;  %3774 = vst [vmem:[#allocation2 + $0x169] sm:$0xff] %v13235_v18  ;;  %v13247_v24 = vadd.f32 %v12996_v9, %v3494_v44  ;;  %v10684_v9 = vpack.c.bf16 %v4131_v41, %v4130_v42  ;;  %v4486_v44 = vld [vmem:[#allocation5 + $0x100] sm:$0xff] }
 0x38c   : > { %14010 = vst [vmem:[#allocation19_spill] sm:$0xff] %v13239_v52  ;;  %14011 = vst [vmem:[#allocation20_spill] sm:$0xff] %v13241_v21  ;;  %9607 = vmatprep.mubr.f32.mxu1 %v13241_v21  ;;  %v13915_v63 = vmax.f32 %v13239_v52, 0.0  ;;  %v4487_v21 = vld [vmem:[#allocation5 + $0x108] sm:$0xff]  ;;  %v4488_v42 = vld [vmem:[#allocation5 + $0x110] sm:$0xff] }
 0x38d   : > { %14012 = vst [vmem:[#allocation21_spill] sm:$0xff] %v13243_v61  ;;  %14013 = vst [vmem:[#allocation22_spill] sm:$0xff] %v13247_v24  ;;  %9608 = vmatmul.mubr.f32.gmra.mrb[10].mxu1 %v13243_v61  ;;  %v13917_v62 = vmax.f32 %v13247_v24, 0.0  ;;  %v10688_v61 = vpack.c.bf16 %v4487_v21, %v4486_v44  ;;  %v4489_v41 = vld [vmem:[#allocation5 + $0x118] sm:$0xff]  ;;  %v4492_v44 = vld [vmem:[#allocation5 + $0x130] sm:$0xff] }
 0x38e   : > { %10679 = vmatpush3.bf16.msra.mxu1 %v10676_v48  ;;  %3777 = vst [vmem:[#allocation2 + $0x189] sm:$0xff] %v13915_v63  ;;  %v4083_v63 = vld [vmem:[#allocation2 + $0x1] sm:$0xff]  ;;  %v10692_v24 = vpack.c.bf16 %v4489_v41, %v4488_v42  ;;  %v4494_v42 = vld [vmem:[#allocation5 + $0x140] sm:$0xff]  ;;  %v4495_v41 = vld [vmem:[#allocation5 + $0x148] sm:$0xff] }
 0x38f   : > { %v13255_v14 = vld [vmem:[#allocation2 + $0x150] sm:$0xff]  ;;  %v13257_v43 = vld [vmem:[#allocation2 + $0x158] sm:$0xff]  ;;  %10681 = vmatprep.subr.bf16.mxu1 %v10680_v23  ;;  %3776 = vst [vmem:[#allocation2 + $0x181] sm:$0xff] %v13917_v62 }
 0x390   : > { %14014 = vst [vmem:[#allocation23_spill] sm:$0xff] %v13255_v14  ;;  %14015 = vst [vmem:[#allocation24_spill] sm:$0xff] %v13257_v43  ;;  %9610 = vmatprep.mubr.f32.mxu1 %v13255_v14  ;;  %v4084_v62 = vld [vmem:[#allocation2 + $0x9] sm:$0xff]  ;;  %v14017_v14 = vmax.f32 %v13002_v13, 0.0  ;;  %v14021_v13 = vmax.f32 %v13026_v34, 0.0  ;;  %v14025_v34 = vmax.f32 %v13060_v39, 0.0 }
 0x391   : > { %9611 = vmatmul.mubr.f32.gmra.mrb[12].mxu1 %v13257_v43  ;;  %v4490_v43 = vld [vmem:[#allocation5 + $0x120] sm:$0xff] }
 0x392   : > { %10683 = vmatpush3.bf16.msra.mxu1 %v10680_v23  ;;  %v13263_v48 = vld [vmem:[#allocation2 + $0x168] sm:$0xff]  ;;  %v13265_v52 = vld [vmem:[#allocation2 + $0x170] sm:$0xff]  ;;  %v4491_v23 = vld [vmem:[#allocation5 + $0x128] sm:$0xff] }
 0x393   : > { %14016 = vst [vmem:[#allocation25_spill] sm:$0xff] %v13263_v48  ;;  %10685 = vmatprep.subr.bf16.mxu1 %v10684_v9  ;;  %9613 = vmatprep.mubr.f32.mxu1 %v13263_v48  ;;  %v10696_v21 = vpack.c.bf16 %v4491_v23, %v4490_v43  ;;  %v4493_v48 = vld [vmem:[#allocation5 + $0x138] sm:$0xff]  ;;  %v4498_v43 = vld [vmem:[#allocation5 + $0x160] sm:$0xff] }
 0x394   : > { %v4856_v39 = vld [vmem:[#allocation5 + $0x180] sm:$0xff] }
 0x395   : > { %9614 = vmatmul.mubr.f32.gmra.mrb[14].mxu1 %v13265_v52 }
 0x396   : > { %10687 = vmatpush3.bf16.msra.mxu1 %v10684_v9  ;;  %9648 = vmatprep.mubr.f32.mxu1 %v4083_v63  ;;  %v14019_v9 = vmax.f32 %v13014_v17, 0.0  ;;  %v10700_v63 = vpack.c.bf16 %v4493_v48, %v4492_v44  ;;  %v14023_v17 = vmax.f32 %v13042_v19, 0.0  ;;  %v14024_v48 = vmax.f32 %v13033_v1, 0.0  ;;  %v13289_v19 = vpop.f32.mrb[32].mxu0 }
 0x397   : > { %10689 = vmatprep.subr.bf16.mxu1 %v10688_v61  ;;  %v14026_v44 = vmax.f32 %v13051_v30, 0.0  ;;  %14027 = vst [vmem:[#allocation26_spill] sm:$0xff] %v13289_v19  ;;  %v5232_v19 = vld [vmem:[#allocation5 + $0x230] sm:$0xff] }
 0x399   : > { %9649 = vmatmul.mubr.f32.vlgmr.msra.gmra.mrb[16].mxu1 %v4084_v62  ;;  %v14020_v62 = vmax.f32 %v13009_v16, 0.0  ;;  %v4499_v16 = vld [vmem:[#allocation5 + $0x168] sm:$0xff] }
 0x39a   : > { %9651 = vmatprep.mubr.f32.mxu1 %v14017_v14  ;;  %10691 = vmatpush3.bf16.msra.mxu1 %v10688_v61  ;;  %v10704_v61 = vpack.c.bf16 %v4495_v41, %v4494_v42  ;;  %v4496_v14 = vld [vmem:[#allocation5 + $0x150] sm:$0xff]  ;;  %v10712_v23 = vpack.c.bf16 %v4499_v16, %v4498_v43  ;;  %v4857_v42 = vld [vmem:[#allocation5 + $0x188] sm:$0xff]  ;;  %v14030_v41 = vmax.f32 %v13069_v54, 0.0  ;;  %v14035_v54 = vmax.f32 %v13132_v12, 0.0  ;;  %v4863_v16 = vld [vmem:[#allocation5 + $0x1b8] sm:$0xff] }
 0x39b   : > { %10693 = vmatprep.subr.bf16.mxu1 %v10692_v24  ;;  %v10720_v30 = vpack.c.bf16 %v4857_v42, %v4856_v39  ;;  %v14042_v12 = vmax.f32 %v13178_v47, 0.0  ;;  %v4861_v47 = vld [vmem:[#allocation5 + $0x1a8] sm:$0xff]  ;;  %v4862_v43 = vld [vmem:[#allocation5 + $0x1b0] sm:$0xff]  ;;  %v4867_v42 = vld [vmem:[#allocation5 + $0x1d8] sm:$0xff] }
 0x39c   : > { %v4866_v39 = vld [vmem:[#allocation5 + $0x1d0] sm:$0xff] }
 0x39d   : > { %9652 = vmatmul.mubr.f32.gmra.mrb[18].mxu1 %v14018_v55  ;;  %v14022_v55 = vmax.f32 %v13021_v28, 0.0  ;;  %v4501_v28 = vld [vmem:[#allocation5 + $0x178] sm:$0xff] }
 0x39e   : > { %9654 = vmatprep.mubr.f32.mxu1 %v14019_v9  ;;  %10695 = vmatpush3.bf16.msra.mxu1 %v10692_v24  ;;  %v10708_v24 = vpack.c.bf16 %v4497_v11, %v4496_v14  ;;  %v14028_v9 = vmax.f32 %v13078_v36, 0.0  ;;  %v14033_v36 = vmax.f32 %v13114_v4, 0.0  ;;  %v14037_v14 = vmax.f32 %v13150_v37, 0.0 }
 0x39f   : > { %10697 = vmatprep.subr.bf16.mxu1 %v10696_v21  ;;  %v14039_v4 = vmax.f32 %v13168_v15, 0.0  ;;  %v14040_v11 = vmax.f32 %v13159_v26, 0.0  ;;  %v4858_v15 = vld [vmem:[#allocation5 + $0x190] sm:$0xff]  ;;  %v4860_v26 = vld [vmem:[#allocation5 + $0x1a0] sm:$0xff] }
 0x3a1   : > { %9655 = vmatmul.mubr.f32.gmra.mrb[20].mxu1 %v14020_v62  ;;  %v14031_v62 = vmax.f32 %v13096_v50, 0.0  ;;  %v14036_v50 = vmax.f32 %v13123_v6, 0.0  ;;  %v4453_v6 = vld [vmem:[#allocation2 + $0x2] sm:$0xff] }
 0x3a2   : > { %9657 = vmatprep.mubr.f32.mxu1 %v14021_v13  ;;  %10699 = vmatpush3.bf16.msra.mxu1 %v10696_v21  ;;  %v4500_v21 = vld [vmem:[#allocation5 + $0x170] sm:$0xff]  ;;  %v14032_v13 = vmax.f32 %v13087_v53, 0.0  ;;  %v14038_v53 = vmax.f32 %v13141_v33, 0.0  ;;  %v4859_v33 = vld [vmem:[#allocation5 + $0x198] sm:$0xff] }
 0x3a3   : > { %10701 = vmatprep.subr.bf16.mxu1 %v10700_v63  ;;  %v10716_v1 = vpack.c.bf16 %v4501_v28, %v4500_v21  ;;  %v10724_v37 = vpack.c.bf16 %v4859_v33, %v4858_v15  ;;  %v4864_v21 = vld [vmem:[#allocation5 + $0x1c0] sm:$0xff]  ;;  %v4865_v28 = vld [vmem:[#allocation5 + $0x1c8] sm:$0xff] }
 0x3a4   : > { %v13363_v15 = vld [vmem:[#allocation2 + $0xaa] sm:$0xff] }
 0x3a5   : > { %9658 = vmatmul.mubr.f32.gmra.mrb[22].mxu1 %v14022_v55  ;;  %v13327_v55 = vld [vmem:[#allocation2 + $0x1a] sm:$0xff] }
 0x3a6   : > { %9660 = vmatprep.mubr.f32.mxu1 %v14023_v17  ;;  %10703 = vmatpush3.bf16.msra.mxu1 %v10700_v63  ;;  %v13293_v63 = vpop.f32.mrb[33].mxu0  ;;  %v10728_v17 = vpack.c.bf16 %v4861_v47, %v4860_v26  ;;  %v13372_v26 = vld [vmem:[#allocation2 + $0xca] sm:$0xff]  ;;  %v13375_v47 = vld [vmem:[#allocation2 + $0xda] sm:$0xff] }
 0x3a7   : > { %10705 = vmatprep.subr.bf16.mxu1 %v10704_v61  ;;  %14029 = vst [vmem:[#allocation27_spill] sm:$0xff] %v13293_v63 }
 0x3a9   : > { %9661 = vmatmul.mubr.f32.gmra.mrb[24].mxu1 %v14024_v48  ;;  %v13333_v48 = vld [vmem:[#allocation2 + $0x32] sm:$0xff] }
 0x3aa   : > { %9663 = vmatprep.mubr.f32.mxu1 %v14025_v34  ;;  %10707 = vmatpush3.bf16.msra.mxu1 %v10704_v61  ;;  %v14034_v61 = vmax.f32 %v13105_v56, 0.0  ;;  %v14041_v56 = vmax.f32 %v13187_v57, 0.0  ;;  %v4454_v57 = vld [vmem:[#allocation2 + $0xa] sm:$0xff]  ;;  %v10732_v34 = vpack.c.bf16 %v4863_v16, %v4862_v43  ;;  %v13381_v43 = vld [vmem:[#allocation2 + $0xf2] sm:$0xff]  ;;  %v13384_v16 = vld [vmem:[#allocation2 + $0xfa] sm:$0xff] }
 0x3ab   : > { %10709 = vmatprep.subr.bf16.mxu1 %v10708_v24 }
 0x3ad   : > { %9664 = vmatmul.mubr.f32.gmra.mrb[26].mxu1 %v14026_v44  ;;  %v13339_v44 = vld [vmem:[#allocation2 + $0x4a] sm:$0xff] }
 0x3ae   : > { %9666 = vmatprep.mubr.f32.mxu1 %v14028_v9  ;;  %10711 = vmatpush3.bf16.msra.mxu1 %v10708_v24  ;;  %v13330_v24 = vld [vmem:[#allocation2 + $0x22] sm:$0xff]  ;;  %v10736_v9 = vpack.c.bf16 %v4865_v28, %v4864_v21  ;;  %v13390_v21 = vld [vmem:[#allocation2 + $0x112] sm:$0xff] }
 0x3af   : > { %10713 = vmatprep.subr.bf16.mxu1 %v10712_v23  ;;  %v13393_v28 = vld [vmem:[#allocation2 + $0x122] sm:$0xff] }
 0x3b1   : > { %9667 = vmatmul.mubr.f32.gmra.mrb[28].mxu1 %v14030_v41  ;;  %v13345_v41 = vld [vmem:[#allocation2 + $0x62] sm:$0xff] }
 0x3b2   : > { %9669 = vmatprep.mubr.f32.mxu1 %v14031_v62  ;;  %10715 = vmatpush3.bf16.msra.mxu1 %v10712_v23  ;;  %v13336_v23 = vld [vmem:[#allocation2 + $0x3a] sm:$0xff]  ;;  %v10740_v62 = vpack.c.bf16 %v4867_v42, %v4866_v39  ;;  %v13402_v42 = vld [vmem:[#allocation2 + $0x142] sm:$0xff] }
 0x3b3   : > { %10717 = vmatprep.subr.bf16.mxu1 %v10716_v1  ;;  %v13399_v39 = vld [vmem:[#allocation2 + $0x13a] sm:$0xff] }
 0x3b5   : > { %9670 = vmatmul.mubr.f32.gmra.mrb[30].mxu1 %v14032_v13  ;;  %v4868_v13 = vld [vmem:[#allocation5 + $0x1e0] sm:$0xff] }
 0x3b6   : > { %9672 = vmatprep.mubr.f32.mxu1 %v14033_v36  ;;  %10719 = vmatpush3.bf16.msra.mxu1 %v10716_v1  ;;  %v13342_v1 = vld [vmem:[#allocation2 + $0x52] sm:$0xff] }
 0x3b7   : > { %10721 = vmatprep.subr.bf16.mxu1 %v10720_v30  ;;  %v4869_v36 = vld [vmem:[#allocation5 + $0x1e8] sm:$0xff] }
 0x3b9   : > { %9673 = vmatmul.mubr.f32.gmra.mrb[0].mxu1 %v14034_v61  ;;  %v13351_v61 = vld [vmem:[#allocation2 + $0x7a] sm:$0xff] }
 0x3ba   : > { %9675 = vmatprep.mubr.f32.mxu1 %v14035_v54  ;;  %v10744_v54 = vpack.c.bf16 %v4869_v36, %v4868_v13  ;;  %v13408_v13 = vld [vmem:[#allocation2 + $0x15a] sm:$0xff]  ;;  %v13411_v36 = vld [vmem:[#allocation2 + $0x16a] sm:$0xff] }
 0x3bb   : > { %14043 = vst [vmem:[#allocation28_spill] sm:$0xff] %v13411_v36 }
 0x3bd   : > { %9676 = vmatmul.mubr.f32.gmra.mrb[2].mxu1 %v14036_v50  ;;  %v13354_v50 = vld [vmem:[#allocation2 + $0x82] sm:$0xff] }
 0x3be   : > { %9678 = vmatprep.mubr.f32.mxu1 %v14037_v14  ;;  %v4870_v14 = vld [vmem:[#allocation5 + $0x1f0] sm:$0xff] }
 0x3c1   : > { %9679 = vmatmul.mubr.f32.gmra.mrb[4].mxu1 %v14038_v53  ;;  %v4871_v53 = vld [vmem:[#allocation5 + $0x1f8] sm:$0xff] }
 0x3c2   : > { %9681 = vmatprep.mubr.f32.mxu1 %v14039_v4  ;;  %v13357_v4 = vld [vmem:[#allocation2 + $0x92] sm:$0xff] }
 0x3c5   : > { %9682 = vmatmul.mubr.f32.gmra.mrb[6].mxu1 %v14040_v11  ;;  %v10748_v11 = vpack.c.bf16 %v4871_v53, %v4870_v14  ;;  %v5228_v14 = vld [vmem:[#allocation5 + $0x210] sm:$0xff]  ;;  %v5229_v53 = vld [vmem:[#allocation5 + $0x218] sm:$0xff] }
 0x3c6   : > { %9684 = vmatprep.mubr.f32.mxu1 %v14041_v56  ;;  %v13360_v56 = vld [vmem:[#allocation2 + $0x9a] sm:$0xff] }
 0x3c9   : > { %9685 = vmatmul.mubr.f32.gmra.mrb[8].mxu1 %v14042_v12  ;;  %v5226_v12 = vld [vmem:[#allocation5 + $0x200] sm:$0xff] }
 0x3ca   : > { %9687 = vmatprep.mubr.f32.mxu1 %v13207_v40 }
 0x3cd   : > { %9688 = vmatmul.mubr.f32.gmra.mrb[10].mxu1 %v13204_v32 }
 0x3ce   : > { %9690 = vmatprep.mubr.f32.mxu1 %v13221_v49 }
 0x3d1   : > { %9691 = vmatmul.mubr.f32.gmra.mrb[12].mxu1 %v13218_v51 }
 0x3d2   : > { %9693 = vmatprep.mubr.f32.mxu1 %v13235_v18 }
 0x3d5   : > { %9694 = vmatmul.mubr.f32.gmra.mrb[14].mxu1 %v13232_v29 }
 0x3d6   : > { %9728 = vmatprep.mubr.f32.mxu1 %v4453_v6  ;;  %v5227_v6 = vld [vmem:[#allocation5 + $0x208] sm:$0xff] }
 0x3d7   : > { %v10752_v33 = vpack.c.bf16 %v5227_v6, %v5226_v12  ;;  %v5230_v12 = vld [vmem:[#allocation5 + $0x220] sm:$0xff]  ;;  %v5231_v6 = vld [vmem:[#allocation5 + $0x228] sm:$0xff] }
 0x3d8   : > { %v10760_v63 = vpack.c.bf16 %v5231_v6, %v5230_v12  ;;  %v14053_v12 = vld [vmem:[#allocation14_spill] sm:$0xff]  ;;  %v14054_v6 = vld [vmem:[#allocation15_spill] sm:$0xff] }
 0x3d9   : > { %9729 = vmatmul.mubr.f32.vlgmr.msra.gmra.mrb[16].mxu1 %v4454_v57  ;;  %v13366_v57 = vld [vmem:[#allocation2 + $0xb2] sm:$0xff] }
 0x3da   : > { %9731 = vmatprep.mubr.f32.mxu1 %v13327_v55  ;;  %10723 = vmatpush3.bf16.msra.mxu1 %v10720_v30  ;;  %v13348_v30 = vld [vmem:[#allocation2 + $0x6a] sm:$0xff] }
 0x3db   : > { %10725 = vmatprep.subr.bf16.mxu1 %v10724_v37 }
 0x3dd   : > { %9732 = vmatmul.mubr.f32.gmra.mrb[18].mxu1 %v13330_v24 }
 0x3de   : > { %9734 = vmatprep.mubr.f32.mxu1 %v13333_v48  ;;  %10727 = vmatpush3.bf16.msra.mxu1 %v10724_v37  ;;  %v13369_v37 = vld [vmem:[#allocation2 + $0xc2] sm:$0xff] }
 0x3df   : > { %10729 = vmatprep.subr.bf16.mxu1 %v10728_v17 }
 0x3e1   : > { %9735 = vmatmul.mubr.f32.gmra.mrb[20].mxu1 %v13336_v23 }
 0x3e2   : > { %9737 = vmatprep.mubr.f32.mxu1 %v13339_v44  ;;  %10731 = vmatpush3.bf16.msra.mxu1 %v10728_v17  ;;  %v13378_v17 = vld [vmem:[#allocation2 + $0xe2] sm:$0xff] }
 0x3e3   : > { %10733 = vmatprep.subr.bf16.mxu1 %v10732_v34 }
 0x3e5   : > { %9738 = vmatmul.mubr.f32.gmra.mrb[22].mxu1 %v13342_v1 }
 0x3e6   : > { %9740 = vmatprep.mubr.f32.mxu1 %v13345_v41  ;;  %10735 = vmatpush3.bf16.msra.mxu1 %v10732_v34  ;;  %v13387_v34 = vld [vmem:[#allocation2 + $0x10a] sm:$0xff] }
 0x3e7   : > { %10737 = vmatprep.subr.bf16.mxu1 %v10736_v9 }
 0x3e9   : > { %9741 = vmatmul.mubr.f32.gmra.mrb[24].mxu1 %v13348_v30 }
 0x3ea   : > { %9743 = vmatprep.mubr.f32.mxu1 %v13351_v61  ;;  %10739 = vmatpush3.bf16.msra.mxu1 %v10736_v9  ;;  %v13396_v9 = vld [vmem:[#allocation2 + $0x12a] sm:$0xff] }
 0x3eb   : > { %10741 = vmatprep.subr.bf16.mxu1 %v10740_v62 }
 0x3ed   : > { %9744 = vmatmul.mubr.f32.gmra.mrb[26].mxu1 %v13354_v50 }
 0x3ee   : > { %9746 = vmatprep.mubr.f32.mxu1 %v13357_v4  ;;  %10743 = vmatpush3.bf16.msra.mxu1 %v10740_v62  ;;  %v13405_v62 = vld [vmem:[#allocation2 + $0x152] sm:$0xff] }
 0x3ef   : > { %10745 = vmatprep.subr.bf16.mxu1 %v10744_v54 }
 0x3f1   : > { %9747 = vmatmul.mubr.f32.gmra.mrb[28].mxu1 %v13360_v56 }
 0x3f2   : > { %9749 = vmatprep.mubr.f32.mxu1 %v13363_v15  ;;  %10747 = vmatpush3.bf16.msra.mxu1 %v10744_v54  ;;  %v13414_v54 = vld [vmem:[#allocation2 + $0x172] sm:$0xff] }
 0x3f3   : > { %10749 = vmatprep.subr.bf16.mxu1 %v10748_v11  ;;  %14044 = vst [vmem:[#allocation29_spill] sm:$0xff] %v13414_v54 }
 0x3f5   : > { %9750 = vmatmul.mubr.f32.gmra.mrb[30].mxu1 %v13366_v57 }
 0x3f6   : > { %9752 = vmatprep.mubr.f32.mxu1 %v13369_v37  ;;  %10751 = vmatpush3.bf16.msra.mxu1 %v10748_v11  ;;  %v10756_v11 = vpack.c.bf16 %v5229_v53, %v5228_v14  ;;  %v5235_v14 = vld [vmem:[#allocation5 + $0x248] sm:$0xff] }
 0x3f7   : > { %10753 = vmatprep.subr.bf16.mxu1 %v10752_v33 }
 0x3f9   : > { %9753 = vmatmul.mubr.f32.gmra.mrb[0].mxu1 %v13372_v26 }
 0x3fa   : > { %9755 = vmatprep.mubr.f32.mxu1 %v13375_v47 }
 0x3fd   : > { %9756 = vmatmul.mubr.f32.gmra.mrb[2].mxu1 %v13378_v17 }
 0x3fe   : > { %9758 = vmatprep.mubr.f32.mxu1 %v13381_v43 }
 0x401   : > { %9759 = vmatmul.mubr.f32.gmra.mrb[4].mxu1 %v13384_v16 }
 0x402   : > { %9761 = vmatprep.mubr.f32.mxu1 %v13387_v34 }
 0x405   : > { %9762 = vmatmul.mubr.f32.gmra.mrb[6].mxu1 %v13390_v21 }
 0x406   : > { %9764 = vmatprep.mubr.f32.mxu1 %v13393_v28 }
 0x409   : > { %9765 = vmatmul.mubr.f32.gmra.mrb[8].mxu1 %v13396_v9 }
 0x40a   : > { %9767 = vmatprep.mubr.f32.mxu1 %v13399_v39 }
 0x40d   : > { %9768 = vmatmul.mubr.f32.gmra.mrb[10].mxu1 %v13402_v42 }
 0x40e   : > { %9770 = vmatprep.mubr.f32.mxu1 %v13405_v62 }
 0x411   : > { %9771 = vmatmul.mubr.f32.gmra.mrb[12].mxu1 %v13408_v13 }
 0x412   : > { %9773 = vmatprep.mubr.f32.mxu1 %v13411_v36  ;;  %v5233_v36 = vld [vmem:[#allocation5 + $0x238] sm:$0xff] }
 0x415   : > { %9774 = vmatmul.mubr.f32.gmra.mrb[14].mxu1 %v13414_v54  ;;  %v10764_v54 = vpack.c.bf16 %v5233_v36, %v5232_v19  ;;  %v5239_v19 = vld [vmem:[#allocation5 + $0x268] sm:$0xff]  ;;  %v5596_v36 = vld [vmem:[#allocation5 + $0x280] sm:$0xff] }
 0x416   : > { %9808 = vmatprep.mubr.f32.mxu1 %v13035_v3  ;;  %v5234_v3 = vld [vmem:[#allocation5 + $0x240] sm:$0xff] }
 0x419   : > { %9809 = vmatmul.mubr.f32.vlgmr.msra.gmra.mrb[16].mxu1 %v13037_v22  ;;  %v10768_v22 = vpack.c.bf16 %v5235_v14, %v5234_v3  ;;  %v14057_v3 = vld [vmem:[#allocation16_spill] sm:$0xff]  ;;  %v14058_v14 = vld [vmem:[#allocation17_spill] sm:$0xff] }
 0x41a   : > { %9811 = vmatprep.mubr.f32.mxu1 %v13053_v38  ;;  %10755 = vmatpush3.bf16.msra.mxu1 %v10752_v33  ;;  %v5236_v38 = vld [vmem:[#allocation5 + $0x250] sm:$0xff]  ;;  %v5237_v33 = vld [vmem:[#allocation5 + $0x258] sm:$0xff] }
 0x41b   : > { %10757 = vmatprep.subr.bf16.mxu1 %v10756_v11 }
 0x41d   : > { %9812 = vmatmul.mubr.f32.gmra.mrb[18].mxu1 %v13055_v58  ;;  %v10772_v58 = vpack.c.bf16 %v5237_v33, %v5236_v38  ;;  %v14062_v38 = vld [vmem:[#allocation20_spill] sm:$0xff] }
 0x41e   : > { %9814 = vmatprep.mubr.f32.mxu1 %v13071_v0  ;;  %10759 = vmatpush3.bf16.msra.mxu1 %v10756_v11  ;;  %v5238_v0 = vld [vmem:[#allocation5 + $0x260] sm:$0xff] }
 0x41f   : > { %10761 = vmatprep.subr.bf16.mxu1 %v10760_v63 }
 0x421   : > { %9815 = vmatmul.mubr.f32.gmra.mrb[20].mxu1 %v13073_v35  ;;  %v10776_v35 = vpack.c.bf16 %v5239_v19, %v5238_v0  ;;  %v14065_v0 = vld [vmem:[#allocation21_spill] sm:$0xff]  ;;  %v14066_v19 = vld [vmem:[#allocation23_spill] sm:$0xff] }
 0x422   : > { %9817 = vmatprep.mubr.f32.mxu1 %v13089_v46  ;;  %10763 = vmatpush3.bf16.msra.mxu1 %v10760_v63  ;;  %v5240_v46 = vld [vmem:[#allocation5 + $0x270] sm:$0xff]  ;;  %v5241_v63 = vld [vmem:[#allocation5 + $0x278] sm:$0xff] }
 0x423   : > { %10765 = vmatprep.subr.bf16.mxu1 %v10764_v54 }
 0x425   : > { %9818 = vmatmul.mubr.f32.gmra.mrb[22].mxu1 %v13091_v20  ;;  %v10780_v20 = vpack.c.bf16 %v5241_v63, %v5240_v46  ;;  %v14068_v46 = vld [vmem:[#allocation25_spill] sm:$0xff]  ;;  %v13475_v63 = vld [vmem:[#allocation2 + $0x180] sm:$0xff] }
 0x426   : > { %9820 = vmatprep.mubr.f32.mxu1 %v13107_v60  ;;  %10767 = vmatpush3.bf16.msra.mxu1 %v10764_v54  ;;  %v5597_v54 = vld [vmem:[#allocation5 + $0x288] sm:$0xff] }
 0x427   : > { %10769 = vmatprep.subr.bf16.mxu1 %v10768_v22 }
 0x429   : > { %9821 = vmatmul.mubr.f32.gmra.mrb[24].mxu1 %v13109_v2  ;;  %v10784_v2 = vpack.c.bf16 %v5597_v54, %v5596_v36  ;;  %v5598_v36 = vld [vmem:[#allocation5 + $0x290] sm:$0xff]  ;;  %v5599_v54 = vld [vmem:[#allocation5 + $0x298] sm:$0xff] }
 0x42a   : > { %9823 = vmatprep.mubr.f32.mxu1 %v13125_v8  ;;  %10771 = vmatpush3.bf16.msra.mxu1 %v10768_v22 }
 0x42b   : > { %10773 = vmatprep.subr.bf16.mxu1 %v10772_v58 }
 0x42d   : > { %9824 = vmatmul.mubr.f32.gmra.mrb[26].mxu1 %v13127_v10 }
 0x42e   : > { %9826 = vmatprep.mubr.f32.mxu1 %v13143_v59  ;;  %10775 = vmatpush3.bf16.msra.mxu1 %v10772_v58 }
 0x42f   : > { %10777 = vmatprep.subr.bf16.mxu1 %v10776_v35  ;;  %v13430_v60 = vpop.f32.mrb[34].mxu0 }
 0x430   : > { %14045 = vst [vmem:[#allocation30_spill] sm:$0xff] %v13430_v60  ;;  %v13432_v53 = vpop.f32.mrb[35].mxu0  ;;  %v14073_v60 = vld [vmem:[#allocation19_spill] sm:$0xff] }
 0x431   : > { %14046 = vst [vmem:[#allocation31_spill] sm:$0xff] %v13432_v53  ;;  %9827 = vmatmul.mubr.f32.gmra.mrb[28].mxu1 %v13145_v25  ;;  %v5970_v53 = vld [vmem:[#allocation5 + $0x318] sm:$0xff] }
 0x432   : > { %9829 = vmatprep.mubr.f32.mxu1 %v13161_v7  ;;  %10779 = vmatpush3.bf16.msra.mxu1 %v10776_v35  ;;  %v14067_v35 = vld [vmem:[#allocation24_spill] sm:$0xff] }
 0x433   : > { %10781 = vmatprep.subr.bf16.mxu1 %v10780_v20  ;;  %v13436_v8 = vpop.f32.mrb[36].mxu0 }
 0x434   : > { %14047 = vst [vmem:[#allocation32_spill] sm:$0xff] %v13436_v8  ;;  %v13438_v10 = vpop.f32.mrb[37].mxu0  ;;  %v5969_v8 = vld [vmem:[#allocation5 + $0x310] sm:$0xff] }
 0x435   : > { %14048 = vst [vmem:[#allocation33_spill] sm:$0xff] %v13438_v10  ;;  %9830 = vmatmul.mubr.f32.gmra.mrb[30].mxu1 %v13163_v27 }
 0x436   : > { %9832 = vmatprep.mubr.f32.mxu1 %v13180_v5  ;;  %10783 = vmatpush3.bf16.msra.mxu1 %v10780_v20  ;;  %v13478_v20 = vld [vmem:[#allocation2 + $0x188] sm:$0xff] }
 0x437   : > { %10785 = vmatprep.subr.bf16.mxu1 %v10784_v2  ;;  %v13442_v59 = vpop.f32.mrb[38].mxu0 }
 0x438   : > { %14049 = vst [vmem:[#allocation34_spill] sm:$0xff] %v13442_v59  ;;  %v13444_v11 = vpop.f32.mrb[39].mxu0  ;;  %v14071_v59 = vld [vmem:[#allocation22_spill] sm:$0xff] }
 0x439   : > { %14050 = vst [vmem:[#allocation35_spill] sm:$0xff] %v13444_v11  ;;  %9833 = vmatmul.mubr.f32.gmra.mrb[0].mxu1 %v13182_v45  ;;  %v13544_v11 = vld [vmem:[#allocation2 + $0x129] sm:$0xff]  ;;  %v14072_v10 = vmax.f32 %v14071_v59, 0.0  ;;  %v6338_v59 = vld [vmem:[#allocation5 + $0x388] sm:$0xff] }
 0x43a   : > { %9835 = vmatprep.mubr.f32.mxu1 %v13196_v31  ;;  %v14061_v31 = vld [vmem:[#allocation18_spill] sm:$0xff]  ;;  %14070 = vst [vmem:[#allocation45_spill] sm:$0xff] %v13544_v11 }
 0x43b   : > { %v13448_v25 = vpop.f32.mrb[40].mxu0 }
 0x43c   : > { %14051 = vst [vmem:[#allocation36_spill] sm:$0xff] %v13448_v25  ;;  %v13450_v7 = vpop.f32.mrb[41].mxu0  ;;  %v5968_v25 = vld [vmem:[#allocation5 + $0x308] sm:$0xff] }
 0x43d   : > { %14052 = vst [vmem:[#allocation37_spill] sm:$0xff] %v13450_v7  ;;  %9836 = vmatmul.mubr.f32.gmra.mrb[2].mxu1 %v14053_v12  ;;  %v5193_v12 = vld [vmem:[#allocation2 + $0x19] sm:$0xff]  ;;  %v5967_v7 = vld [vmem:[#allocation5 + $0x300] sm:$0xff] }
 0x43e   : > { %9838 = vmatprep.mubr.f32.mxu1 %v14054_v6  ;;  %v10788_v6 = vpack.c.bf16 %v5599_v54, %v5598_v36  ;;  %v13490_v54 = vld [vmem:[#allocation2 + $0x51] sm:$0xff] }
 0x43f   : > { %v13454_v27 = vpop.f32.mrb[42].mxu0 }
 0x440   : > { %14055 = vst [vmem:[#allocation38_spill] sm:$0xff] %v13454_v27  ;;  %v13456_v5 = vpop.f32.mrb[43].mxu0  ;;  %v5611_v27 = vld [vmem:[#allocation5 + $0x2f8] sm:$0xff] }
 0x441   : > { %14056 = vst [vmem:[#allocation39_spill] sm:$0xff] %v13456_v5  ;;  %9839 = vmatmul.mubr.f32.gmra.mrb[4].mxu1 %v14057_v3  ;;  %v5194_v3 = vld [vmem:[#allocation2 + $0x21] sm:$0xff] }
 0x442   : > { %9841 = vmatprep.mubr.f32.mxu1 %v14058_v14  ;;  %v5600_v14 = vld [vmem:[#allocation5 + $0x2a0] sm:$0xff]  ;;  %v5610_v5 = vld [vmem:[#allocation5 + $0x2f0] sm:$0xff] }
 0x443   : > { %v13460_v22 = vpop.f32.mrb[44].mxu0 }
 0x444   : > { %14059 = vst [vmem:[#allocation40_spill] sm:$0xff] %v13460_v22  ;;  %v13462_v45 = vpop.f32.mrb[45].mxu0  ;;  %v5609_v22 = vld [vmem:[#allocation5 + $0x2e8] sm:$0xff] }
 0x445   : > { %14060 = vst [vmem:[#allocation41_spill] sm:$0xff] %v13462_v45  ;;  %9842 = vmatmul.mubr.f32.gmra.mrb[6].mxu1 %v14061_v31  ;;  %v5601_v31 = vld [vmem:[#allocation5 + $0x2a8] sm:$0xff]  ;;  %v5608_v45 = vld [vmem:[#allocation5 + $0x2e0] sm:$0xff] }
 0x446   : > { %9844 = vmatprep.mubr.f32.mxu1 %v14062_v38  ;;  %v13481_v38 = vld [vmem:[#allocation2 + $0x31] sm:$0xff] }
 0x447   : > { %v13466_v33 = vpop.f32.mrb[46].mxu0 }
 0x448   : > { %14063 = vst [vmem:[#allocation42_spill] sm:$0xff] %v13466_v33  ;;  %v13468_v58 = vpop.f32.mrb[47].mxu0  ;;  %v5607_v33 = vld [vmem:[#allocation5 + $0x2d8] sm:$0xff] }
 0x449   : > { %14064 = vst [vmem:[#allocation43_spill] sm:$0xff] %v13468_v58  ;;  %9845 = vmatmul.mubr.f32.gmra.mrb[8].mxu1 %v14065_v0  ;;  %v13484_v0 = vld [vmem:[#allocation2 + $0x39] sm:$0xff] }
 0x44a   : > { %9847 = vmatprep.mubr.f32.mxu1 %v14066_v19  ;;  %v5602_v19 = vld [vmem:[#allocation5 + $0x2b0] sm:$0xff] }
 0x44b   : > { %v5606_v58 = vld [vmem:[#allocation5 + $0x2d0] sm:$0xff] }
 0x44d   : > { %9848 = vmatmul.mubr.f32.gmra.mrb[10].mxu1 %v14067_v35  ;;  %v5603_v35 = vld [vmem:[#allocation5 + $0x2b8] sm:$0xff] }
 0x44e   : > { %9850 = vmatprep.mubr.f32.mxu1 %v14068_v46  ;;  %v13487_v46 = vld [vmem:[#allocation2 + $0x49] sm:$0xff]  ;;  %v10796_v36 = vpack.c.bf16 %v5603_v35, %v5602_v19  ;;  %v10804_v19 = vpack.c.bf16 %v5607_v33, %v5606_v58  ;;  %v13502_v35 = vld [vmem:[#allocation2 + $0x81] sm:$0xff]  ;;  %v10812_v58 = vpack.c.bf16 %v5611_v27, %v5610_v5  ;;  %v13529_v5 = vld [vmem:[#allocation2 + $0xf1] sm:$0xff] }
 0x44f   : > { %v13511_v33 = vld [vmem:[#allocation2 + $0xa9] sm:$0xff]  ;;  %v13526_v27 = vld [vmem:[#allocation2 + $0xe1] sm:$0xff] }
 0x451   : > { %9851 = vmatmul.mubr.f32.gmra.mrb[12].mxu1 %v13265_v52  ;;  %v10792_v52 = vpack.c.bf16 %v5601_v31, %v5600_v14  ;;  %v13496_v31 = vld [vmem:[#allocation2 + $0x69] sm:$0xff] }
 0x452   : > { %9853 = vmatprep.mubr.f32.mxu1 %v13475_v63 }
 0x455   : > { %9854 = vmatmul.mubr.f32.gmra.mrb[14].mxu1 %v13478_v20 }
 0x456   : > { %9888 = vmatprep.mubr.f32.mxu1 %v5193_v12  ;;  %v5604_v12 = vld [vmem:[#allocation5 + $0x2c0] sm:$0xff] }
 0x459   : > { %9889 = vmatmul.mubr.f32.vlgmr.msra.gmra.mrb[16].mxu1 %v5194_v3  ;;  %v5605_v3 = vld [vmem:[#allocation5 + $0x2c8] sm:$0xff] }
 0x45a   : > { %9891 = vmatprep.mubr.f32.mxu1 %v13481_v38  ;;  %10787 = vmatpush3.bf16.msra.mxu1 %v10784_v2  ;;  %v13493_v2 = vld [vmem:[#allocation2 + $0x61] sm:$0xff]  ;;  %v10800_v14 = vpack.c.bf16 %v5605_v3, %v5604_v12  ;;  %v10808_v12 = vpack.c.bf16 %v5609_v22, %v5608_v45  ;;  %v13508_v3 = vld [vmem:[#allocation2 + $0x99] sm:$0xff]  ;;  %v10816_v45 = vpack.c.bf16 %v5968_v25, %v5967_v7  ;;  %v13535_v25 = vld [vmem:[#allocation2 + $0x109] sm:$0xff] }
 0x45b   : > { %10789 = vmatprep.subr.bf16.mxu1 %v10788_v6  ;;  %v13517_v22 = vld [vmem:[#allocation2 + $0xc1] sm:$0xff]  ;;  %v13538_v7 = vld [vmem:[#allocation2 + $0x111] sm:$0xff] }
 0x45d   : > { %9892 = vmatmul.mubr.f32.gmra.mrb[18].mxu1 %v13484_v0 }
 0x45e   : > { %9894 = vmatprep.mubr.f32.mxu1 %v13487_v46  ;;  %10791 = vmatpush3.bf16.msra.mxu1 %v10788_v6  ;;  %v13499_v6 = vld [vmem:[#allocation2 + $0x79] sm:$0xff] }
 0x45f   : > { %10793 = vmatprep.subr.bf16.mxu1 %v10792_v52 }
 0x461   : > { %9895 = vmatmul.mubr.f32.gmra.mrb[20].mxu1 %v13490_v54 }
 0x462   : > { %9897 = vmatprep.mubr.f32.mxu1 %v13493_v2  ;;  %10795 = vmatpush3.bf16.msra.mxu1 %v10792_v52  ;;  %v13505_v52 = vld [vmem:[#allocation2 + $0x91] sm:$0xff] }
 0x463   : > { %10797 = vmatprep.subr.bf16.mxu1 %v10796_v36 }
 0x465   : > { %9898 = vmatmul.mubr.f32.gmra.mrb[22].mxu1 %v13496_v31 }
 0x466   : > { %9900 = vmatprep.mubr.f32.mxu1 %v13499_v6  ;;  %10799 = vmatpush3.bf16.msra.mxu1 %v10796_v36  ;;  %v13514_v36 = vld [vmem:[#allocation2 + $0xb1] sm:$0xff] }
 0x467   : > { %10801 = vmatprep.subr.bf16.mxu1 %v10800_v14 }
 0x469   : > { %9901 = vmatmul.mubr.f32.gmra.mrb[24].mxu1 %v13502_v35 }
 0x46a   : > { %9903 = vmatprep.mubr.f32.mxu1 %v13505_v52  ;;  %10803 = vmatpush3.bf16.msra.mxu1 %v10800_v14  ;;  %v13520_v14 = vld [vmem:[#allocation2 + $0xc9] sm:$0xff] }
 0x46b   : > { %10805 = vmatprep.subr.bf16.mxu1 %v10804_v19 }
 0x46d   : > { %9904 = vmatmul.mubr.f32.gmra.mrb[26].mxu1 %v13508_v3 }
 0x46e   : > { %9906 = vmatprep.mubr.f32.mxu1 %v13511_v33  ;;  %10807 = vmatpush3.bf16.msra.mxu1 %v10804_v19  ;;  %v13523_v19 = vld [vmem:[#allocation2 + $0xd9] sm:$0xff] }
 0x46f   : > { %10809 = vmatprep.subr.bf16.mxu1 %v10808_v12 }
 0x471   : > { %9907 = vmatmul.mubr.f32.gmra.mrb[28].mxu1 %v13514_v36 }
 0x472   : > { %9909 = vmatprep.mubr.f32.mxu1 %v13517_v22  ;;  %10811 = vmatpush3.bf16.msra.mxu1 %v10808_v12  ;;  %v13532_v12 = vld [vmem:[#allocation2 + $0xf9] sm:$0xff] }
 0x473   : > { %10813 = vmatprep.subr.bf16.mxu1 %v10812_v58 }
 0x475   : > { %9910 = vmatmul.mubr.f32.gmra.mrb[30].mxu1 %v13520_v14 }
 0x476   : > { %9912 = vmatprep.mubr.f32.mxu1 %v13523_v19  ;;  %10815 = vmatpush3.bf16.msra.mxu1 %v10812_v58  ;;  %v13541_v58 = vld [vmem:[#allocation2 + $0x121] sm:$0xff] }
 0x477   : > { %10817 = vmatprep.subr.bf16.mxu1 %v10816_v45  ;;  %14069 = vst [vmem:[#allocation44_spill] sm:$0xff] %v13541_v58 }
 0x479   : > { %9913 = vmatmul.mubr.f32.gmra.mrb[0].mxu1 %v13526_v27 }
 0x47a   : > { %9915 = vmatprep.mubr.f32.mxu1 %v13529_v5 }
 0x47d   : > { %9916 = vmatmul.mubr.f32.gmra.mrb[2].mxu1 %v13532_v12 }
 0x47e   : > { %9918 = vmatprep.mubr.f32.mxu1 %v13535_v25 }
 0x481   : > { %9919 = vmatmul.mubr.f32.gmra.mrb[4].mxu1 %v13538_v7 }
 0x482   : > { %9921 = vmatprep.mubr.f32.mxu1 %v13541_v58  ;;  %v14074_v58 = vmax.f32 %v14073_v60, 0.0  ;;  %v5976_v60 = vld [vmem:[#allocation5 + $0x348] sm:$0xff] }
 0x485   : > { %9922 = vmatmul.mubr.f32.gmra.mrb[6].mxu1 %v13544_v11  ;;  %v5972_v11 = vld [vmem:[#allocation5 + $0x328] sm:$0xff] }
 0x486   : > { %9924 = vmatprep.mubr.f32.mxu1 %v13207_v40  ;;  %v10820_v40 = vpack.c.bf16 %v5970_v53, %v5969_v8  ;;  %v5978_v53 = vld [vmem:[#allocation5 + $0x358] sm:$0xff]  ;;  %v5980_v8 = vld [vmem:[#allocation5 + $0x368] sm:$0xff] }
 0x489   : > { %9925 = vmatmul.mubr.f32.gmra.mrb[8].mxu1 %v13204_v32  ;;  %v5971_v32 = vld [vmem:[#allocation5 + $0x320] sm:$0xff] }
 0x48a   : > { %9927 = vmatprep.mubr.f32.mxu1 %v13221_v49  ;;  %v5973_v49 = vld [vmem:[#allocation5 + $0x330] sm:$0xff] }
 0x48d   : > { %9928 = vmatmul.mubr.f32.gmra.mrb[10].mxu1 %v13218_v51  ;;  %v10824_v51 = vpack.c.bf16 %v5972_v11, %v5971_v32  ;;  %v5939_v11 = vld [vmem:[#allocation2 + $0x68] sm:$0xff] }
 0x48e   : > { %9930 = vmatprep.mubr.f32.mxu1 %v13235_v18 }
 0x491   : > { %9931 = vmatmul.mubr.f32.gmra.mrb[12].mxu1 %v13232_v29  ;;  %v5974_v29 = vld [vmem:[#allocation5 + $0x338] sm:$0xff] }
 0x492   : > { %9933 = vmatprep.mubr.f32.mxu1 %v14072_v10  ;;  %v10828_v18 = vpack.c.bf16 %v5974_v29, %v5973_v49  ;;  %v5982_v10 = vld [vmem:[#allocation5 + $0x378] sm:$0xff]  ;;  %v6347_v49 = vld [vmem:[#allocation5 + $0x3d0] sm:$0xff] }
 0x493   : > { %v6348_v29 = vld [vmem:[#allocation5 + $0x3d8] sm:$0xff] }
 0x495   : > { %9934 = vmatmul.mubr.f32.gmra.mrb[14].mxu1 %v14074_v58  ;;  %v6346_v58 = vld [vmem:[#allocation5 + $0x3c8] sm:$0xff] }
 0x496   : > { %9968 = vmatprep.mubr.f32.mxu1 %v13327_v55  ;;  %v5975_v55 = vld [vmem:[#allocation5 + $0x340] sm:$0xff] }
 0x499   : > { %9969 = vmatmul.mubr.f32.vlgmr.msra.gmra.mrb[16].mxu1 %v13330_v24  ;;  %v10832_v24 = vpack.c.bf16 %v5976_v60, %v5975_v55  ;;  %v10868_v55 = vpack.c.bf16 %v6348_v29, %v6347_v49  ;;  %v5943_v60 = vld [vmem:[#allocation2 + $0x98] sm:$0xff]  ;;  %v6714_v49 = vld [vmem:[#allocation5 + $0x438] sm:$0xff] }
 0x49a   : > { %9971 = vmatprep.mubr.f32.mxu1 %v13333_v48  ;;  %10819 = vmatpush3.bf16.msra.mxu1 %v10816_v45  ;;  %v5977_v48 = vld [vmem:[#allocation5 + $0x350] sm:$0xff]  ;;  %v6345_v45 = vld [vmem:[#allocation5 + $0x3c0] sm:$0xff]  ;;  %v6716_v29 = vld [vmem:[#allocation5 + $0x448] sm:$0xff] }
 0x49b   : > { %10821 = vmatprep.subr.bf16.mxu1 %v10820_v40  ;;  %v10864_v32 = vpack.c.bf16 %v6346_v58, %v6345_v45  ;;  %v11599_v45 = vld [vmem:[#allocation2 + $0x8] sm:$0xff] }
 0x49d   : > { %9972 = vmatmul.mubr.f32.gmra.mrb[18].mxu1 %v13336_v23  ;;  %v10836_v23 = vpack.c.bf16 %v5978_v53, %v5977_v48  ;;  %v6350_v48 = vld [vmem:[#allocation5 + $0x3e8] sm:$0xff]  ;;  %v5944_v53 = vld [vmem:[#allocation2 + $0xa8] sm:$0xff] }
 0x49e   : > { %9974 = vmatprep.mubr.f32.mxu1 %v13339_v44  ;;  %10823 = vmatpush3.bf16.msra.mxu1 %v10820_v40  ;;  %v5979_v44 = vld [vmem:[#allocation5 + $0x360] sm:$0xff]  ;;  %v5940_v40 = vld [vmem:[#allocation2 + $0x78] sm:$0xff] }
 0x49f   : > { %10825 = vmatprep.subr.bf16.mxu1 %v10824_v51 }
 0x4a1   : > { %9975 = vmatmul.mubr.f32.gmra.mrb[20].mxu1 %v13342_v1  ;;  %v10840_v1 = vpack.c.bf16 %v5980_v8, %v5979_v44  ;;  %v5945_v44 = vld [vmem:[#allocation2 + $0xb0] sm:$0xff]  ;;  %v6351_v8 = vld [vmem:[#allocation5 + $0x3f0] sm:$0xff] }
 0x4a2   : > { %9977 = vmatprep.mubr.f32.mxu1 %v13345_v41  ;;  %10827 = vmatpush3.bf16.msra.mxu1 %v10824_v51  ;;  %v5981_v41 = vld [vmem:[#allocation5 + $0x370] sm:$0xff] }
 0x4a3   : > { %10829 = vmatprep.subr.bf16.mxu1 %v10828_v18  ;;  %v5941_v51 = vld [vmem:[#allocation2 + $0x80] sm:$0xff] }
 0x4a5   : > { %9978 = vmatmul.mubr.f32.gmra.mrb[22].mxu1 %v13348_v30  ;;  %v10844_v30 = vpack.c.bf16 %v5982_v10, %v5981_v41  ;;  %v5946_v41 = vld [vmem:[#allocation2 + $0xc0] sm:$0xff] }
 0x4a6   : > { %9980 = vmatprep.mubr.f32.mxu1 %v13351_v61  ;;  %10831 = vmatpush3.bf16.msra.mxu1 %v10828_v18  ;;  %v6337_v61 = vld [vmem:[#allocation5 + $0x380] sm:$0xff] }
 0x4a7   : > { %10833 = vmatprep.subr.bf16.mxu1 %v10832_v24  ;;  %v5942_v18 = vld [vmem:[#allocation2 + $0x90] sm:$0xff] }
 0x4a9   : > { %9981 = vmatmul.mubr.f32.gmra.mrb[24].mxu1 %v13354_v50  ;;  %v10848_v50 = vpack.c.bf16 %v6338_v59, %v6337_v61  ;;  %v6707_v61 = vld [vmem:[#allocation5 + $0x400] sm:$0xff]  ;;  %v6708_v59 = vld [vmem:[#allocation5 + $0x408] sm:$0xff] }
 0x4aa   : > { %9983 = vmatprep.mubr.f32.mxu1 %v13357_v4  ;;  %10835 = vmatpush3.bf16.msra.mxu1 %v10832_v24  ;;  %v14075_v4 = vld [vmem:[#allocation28_spill] sm:$0xff]  ;;  %v6349_v24 = vld [vmem:[#allocation5 + $0x3e0] sm:$0xff] }
 0x4ab   : > { %10837 = vmatprep.subr.bf16.mxu1 %v10836_v23 }
 0x4ad   : > { %9984 = vmatmul.mubr.f32.gmra.mrb[26].mxu1 %v13360_v56  ;;  %v14076_v56 = vld [vmem:[#allocation29_spill] sm:$0xff] }
 0x4ae   : > { %9986 = vmatprep.mubr.f32.mxu1 %v13363_v15  ;;  %10839 = vmatpush3.bf16.msra.mxu1 %v10836_v23  ;;  %v13587_v15 = vld [vmem:[#allocation2 + $0x182] sm:$0xff]  ;;  %v10872_v23 = vpack.c.bf16 %v6350_v48, %v6349_v24  ;;  %v6328_v24 = vld [vmem:[#allocation2 + $0x151] sm:$0xff] }
 0x4af   : > { %10841 = vmatprep.subr.bf16.mxu1 %v10840_v1  ;;  %v6331_v48 = vld [vmem:[#allocation2 + $0x171] sm:$0xff] }
 0x4b1   : > { %9987 = vmatmul.mubr.f32.gmra.mrb[28].mxu1 %v13366_v57  ;;  %v13590_v57 = vld [vmem:[#allocation2 + $0x18a] sm:$0xff] }
 0x4b2   : > { %9989 = vmatprep.mubr.f32.mxu1 %v13369_v37  ;;  %10843 = vmatpush3.bf16.msra.mxu1 %v10840_v1  ;;  %v6339_v37 = vld [vmem:[#allocation5 + $0x390] sm:$0xff]  ;;  %v6352_v1 = vld [vmem:[#allocation5 + $0x3f8] sm:$0xff] }
 0x4b3   : > { %10845 = vmatprep.subr.bf16.mxu1 %v10844_v30  ;;  %v10876_v10 = vpack.c.bf16 %v6352_v1, %v6351_v8  ;;  %v6674_v8 = vld [vmem:[#allocation2 + $0x32] sm:$0xff] }
 0x4b5   : > { %9990 = vmatmul.mubr.f32.gmra.mrb[30].mxu1 %v13372_v26  ;;  %v6340_v26 = vld [vmem:[#allocation5 + $0x398] sm:$0xff] }
 0x4b6   : > { %9992 = vmatprep.mubr.f32.mxu1 %v13375_v47  ;;  %10847 = vmatpush3.bf16.msra.mxu1 %v10844_v30  ;;  %v5934_v47 = vld [vmem:[#allocation2 + $0x30] sm:$0xff]  ;;  %v5947_v30 = vld [vmem:[#allocation2 + $0xc8] sm:$0xff] }
 0x4b7   : > { %10849 = vmatprep.subr.bf16.mxu1 %v10848_v50 }
 0x4b9   : > { %9993 = vmatmul.mubr.f32.gmra.mrb[0].mxu1 %v13378_v17  ;;  %v10852_v17 = vpack.c.bf16 %v6340_v26, %v6339_v37  ;;  %v5950_v37 = vld [vmem:[#allocation2 + $0xf0] sm:$0xff]  ;;  %v5951_v26 = vld [vmem:[#allocation2 + $0xf8] sm:$0xff] }
 0x4ba   : > { %9995 = vmatprep.mubr.f32.mxu1 %v13381_v43  ;;  %v5935_v43 = vld [vmem:[#allocation2 + $0x38] sm:$0xff] }
 0x4bd   : > { %9996 = vmatmul.mubr.f32.gmra.mrb[2].mxu1 %v13384_v16  ;;  %v6341_v16 = vld [vmem:[#allocation5 + $0x3a0] sm:$0xff] }
 0x4be   : > { %9998 = vmatprep.mubr.f32.mxu1 %v13387_v34  ;;  %v6342_v34 = vld [vmem:[#allocation5 + $0x3a8] sm:$0xff] }
 0x4c1   : > { %9999 = vmatmul.mubr.f32.gmra.mrb[4].mxu1 %v13390_v21  ;;  %v5936_v21 = vld [vmem:[#allocation2 + $0x48] sm:$0xff] }
 0x4c2   : > { %10001 = vmatprep.mubr.f32.mxu1 %v13393_v28  ;;  %v10856_v28 = vpack.c.bf16 %v6342_v34, %v6341_v16  ;;  %v5955_v16 = vld [vmem:[#allocation2 + $0x128] sm:$0xff]  ;;  %v5956_v34 = vld [vmem:[#allocation2 + $0x138] sm:$0xff] }
 0x4c5   : > { %10002 = vmatmul.mubr.f32.gmra.mrb[6].mxu1 %v13396_v9  ;;  %v5937_v9 = vld [vmem:[#allocation2 + $0x50] sm:$0xff] }
 0x4c6   : > { %10004 = vmatprep.mubr.f32.mxu1 %v13399_v39  ;;  %v6343_v39 = vld [vmem:[#allocation5 + $0x3b0] sm:$0xff] }
 0x4c9   : > { %10005 = vmatmul.mubr.f32.gmra.mrb[8].mxu1 %v13402_v42  ;;  %v6344_v42 = vld [vmem:[#allocation5 + $0x3b8] sm:$0xff] }
 0x4ca   : > { %10007 = vmatprep.mubr.f32.mxu1 %v13405_v62  ;;  %v5938_v62 = vld [vmem:[#allocation2 + $0x60] sm:$0xff] }
 0x4cd   : > { %10008 = vmatmul.mubr.f32.gmra.mrb[10].mxu1 %v13408_v13  ;;  %v10860_v13 = vpack.c.bf16 %v6344_v42, %v6343_v39  ;;  %v5960_v39 = vld [vmem:[#allocation2 + $0x168] sm:$0xff]  ;;  %v5961_v42 = vld [vmem:[#allocation2 + $0x170] sm:$0xff] }
 0x4ce   : > { %10010 = vmatprep.mubr.f32.mxu1 %v14075_v4  ;;  %v10880_v4 = vpack.c.bf16 %v6708_v59, %v6707_v61  ;;  %v6676_v61 = vld [vmem:[#allocation2 + $0x4a] sm:$0xff] }
 0x4d1   : > { %10011 = vmatmul.mubr.f32.gmra.mrb[12].mxu1 %v14076_v56  ;;  %v5949_v56 = vld [vmem:[#allocation2 + $0xe0] sm:$0xff] }
 0x4d2   : > { %10013 = vmatprep.mubr.f32.mxu1 %v13587_v15 }
 0x4d5   : > { %10014 = vmatmul.mubr.f32.gmra.mrb[14].mxu1 %v13590_v57 }
 0x4d6   : > { %10048 = vmatprep.mubr.f32.mxu1 %v5934_v47  ;;  %v5952_v47 = vld [vmem:[#allocation2 + $0x108] sm:$0xff] }
 0x4d9   : > { %10049 = vmatmul.mubr.f32.vlgmr.msra.gmra.mrb[16].mxu1 %v5935_v43  ;;  %v5954_v43 = vld [vmem:[#allocation2 + $0x120] sm:$0xff] }
 0x4da   : > { %10051 = vmatprep.mubr.f32.mxu1 %v5936_v21  ;;  %10851 = vmatpush3.bf16.msra.mxu1 %v10848_v50  ;;  %v5948_v50 = vld [vmem:[#allocation2 + $0xd8] sm:$0xff]  ;;  %v5957_v21 = vld [vmem:[#allocation2 + $0x140] sm:$0xff] }
 0x4db   : > { %10853 = vmatprep.subr.bf16.mxu1 %v10852_v17 }
 0x4dd   : > { %10052 = vmatmul.mubr.f32.gmra.mrb[18].mxu1 %v5937_v9  ;;  %v5959_v9 = vld [vmem:[#allocation2 + $0x158] sm:$0xff] }
 0x4de   : > { %10054 = vmatprep.mubr.f32.mxu1 %v5938_v62  ;;  %10855 = vmatpush3.bf16.msra.mxu1 %v10852_v17  ;;  %v5953_v17 = vld [vmem:[#allocation2 + $0x110] sm:$0xff]  ;;  %v5964_v62 = vld [vmem:[#allocation2 + $0x198] sm:$0xff] }
 0x4df   : > { %10857 = vmatprep.subr.bf16.mxu1 %v10856_v28 }
 0x4e1   : > { %10055 = vmatmul.mubr.f32.gmra.mrb[20].mxu1 %v5939_v11  ;;  %v6710_v11 = vld [vmem:[#allocation5 + $0x418] sm:$0xff] }
 0x4e2   : > { %10057 = vmatprep.mubr.f32.mxu1 %v5940_v40  ;;  %10859 = vmatpush3.bf16.msra.mxu1 %v10856_v28  ;;  %v5958_v28 = vld [vmem:[#allocation2 + $0x150] sm:$0xff] }
 0x4e3   : > { %10861 = vmatprep.subr.bf16.mxu1 %v10860_v13  ;;  %v6711_v40 = vld [vmem:[#allocation5 + $0x420] sm:$0xff] }
 0x4e5   : > { %10058 = vmatmul.mubr.f32.gmra.mrb[22].mxu1 %v5941_v51  ;;  %v6713_v51 = vld [vmem:[#allocation5 + $0x430] sm:$0xff] }
 0x4e6   : > { %10060 = vmatprep.mubr.f32.mxu1 %v5942_v18  ;;  %10863 = vmatpush3.bf16.msra.mxu1 %v10860_v13  ;;  %v6709_v13 = vld [vmem:[#allocation5 + $0x410] sm:$0xff]  ;;  %v6718_v18 = vld [vmem:[#allocation5 + $0x458] sm:$0xff] }
 0x4e7   : > { %10865 = vmatprep.subr.bf16.mxu1 %v10864_v32  ;;  %v10884_v58 = vpack.c.bf16 %v6710_v11, %v6709_v13  ;;  %v7159_v13 = vld [vmem:[%s13845_s6 + $0x60] sm:$0xff]  ;;  %v7160_v11 = vld [vmem:[%s13845_s6 + $0x68] sm:$0xff] }
 0x4e9   : > { %10061 = vmatmul.mubr.f32.gmra.mrb[24].mxu1 %v5943_v60  ;;  %v6722_v60 = vld [vmem:[#allocation5 + $0x478] sm:$0xff] }
 0x4ea   : > { %10063 = vmatprep.mubr.f32.mxu1 %v5944_v53  ;;  %10867 = vmatpush3.bf16.msra.mxu1 %v10864_v32  ;;  %v6712_v32 = vld [vmem:[#allocation5 + $0x428] sm:$0xff]  ;;  %v6335_v53 = vld [vmem:[#allocation2 + $0x1a1] sm:$0xff] }
 0x4eb   : > { %10869 = vmatprep.subr.bf16.mxu1 %v10868_v55 }
 0x4ed   : > { %10064 = vmatmul.mubr.f32.gmra.mrb[26].mxu1 %v5945_v44  ;;  %v7150_v44 = vld [vmem:[%s13845_s6 + $0x18] sm:$0xff] }
 0x4ee   : > { %10066 = vmatprep.mubr.f32.mxu1 %v5946_v41  ;;  %10871 = vmatpush3.bf16.msra.mxu1 %v10868_v55  ;;  %v6720_v55 = vld [vmem:[#allocation5 + $0x468] sm:$0xff] }
 0x4ef   : > { %10873 = vmatprep.subr.bf16.mxu1 %v10872_v23  ;;  %v6675_v41 = vld [vmem:[#allocation2 + $0x3a] sm:$0xff] }
 0x4f1   : > { %10067 = vmatmul.mubr.f32.gmra.mrb[28].mxu1 %v5947_v30  ;;  %v7152_v30 = vld [vmem:[%s13845_s6 + $0x28] sm:$0xff] }
 0x4f2   : > { %10069 = vmatprep.mubr.f32.mxu1 %v5948_v50  ;;  %10875 = vmatpush3.bf16.msra.mxu1 %v10872_v23  ;;  %v7149_v23 = vld [vmem:[%s13845_s6 + $0x10] sm:$0xff] }
 0x4f3   : > { %10877 = vmatprep.subr.bf16.mxu1 %v10876_v10  ;;  %v10916_v1 = vpack.c.bf16 %v7150_v44, %v7149_v23  ;;  %v6677_v50 = vld [vmem:[#allocation2 + $0x52] sm:$0xff]  ;;  %v7129_v44 = vld [vmem:[%s11933_s10 + $0x70] sm:$0xff] }
 0x4f4   : > { %v7128_v23 = vld [vmem:[%s11933_s10 + $0x68] sm:$0xff] }
 0x4f5   : > { %10070 = vmatmul.mubr.f32.gmra.mrb[30].mxu1 %v5949_v56  ;;  %v7154_v56 = vld [vmem:[%s13845_s6 + $0x38] sm:$0xff] }
 0x4f6   : > { %10072 = vmatprep.mubr.f32.mxu1 %v5950_v37  ;;  %10879 = vmatpush3.bf16.msra.mxu1 %v10876_v10  ;;  %v7151_v10 = vld [vmem:[%s13845_s6 + $0x20] sm:$0xff] }
 0x4f7   : > { %10881 = vmatprep.subr.bf16.mxu1 %v10880_v4  ;;  %v10920_v59 = vpack.c.bf16 %v7152_v30, %v7151_v10  ;;  %v6678_v37 = vld [vmem:[#allocation2 + $0x62] sm:$0xff] }
 0x4f8   : > { %v7133_v10 = vld [vmem:[%s11933_s10 + $0x90] sm:$0xff]  ;;  %v7134_v30 = vld [vmem:[%s11933_s10 + $0x98] sm:$0xff] }
 0x4f9   : > { %10073 = vmatmul.mubr.f32.gmra.mrb[0].mxu1 %v5951_v26 }
 0x4fa   : > { %10075 = vmatprep.mubr.f32.mxu1 %v5952_v47  ;;  %v6679_v47 = vld [vmem:[#allocation2 + $0x6a] sm:$0xff] }
 0x4fd   : > { %10076 = vmatmul.mubr.f32.gmra.mrb[2].mxu1 %v5953_v17  ;;  %v7155_v17 = vld [vmem:[%s13845_s6 + $0x40] sm:$0xff] }
 0x4fe   : > { %10078 = vmatprep.mubr.f32.mxu1 %v5954_v43  ;;  %v7156_v43 = vld [vmem:[%s13845_s6 + $0x48] sm:$0xff] }
 0x501   : > { %10079 = vmatmul.mubr.f32.gmra.mrb[4].mxu1 %v5955_v16  ;;  %v6680_v16 = vld [vmem:[#allocation2 + $0x7a] sm:$0xff] }
 0x502   : > { %10081 = vmatprep.mubr.f32.mxu1 %v5956_v34  ;;  %v10928_v34 = vpack.c.bf16 %v7156_v43, %v7155_v17  ;;  %v7143_v17 = vld [vmem:[%s11933_s10 + $0xe0] sm:$0xff]  ;;  %v7144_v43 = vld [vmem:[%s11933_s10 + $0xe8] sm:$0xff] }
 0x505   : > { %10082 = vmatmul.mubr.f32.gmra.mrb[6].mxu1 %v5957_v21  ;;  %v6681_v21 = vld [vmem:[#allocation2 + $0x82] sm:$0xff] }
 0x506   : > { %10084 = vmatprep.mubr.f32.mxu1 %v5958_v28  ;;  %v7157_v28 = vld [vmem:[%s13845_s6 + $0x50] sm:$0xff] }
 0x509   : > { %10085 = vmatmul.mubr.f32.gmra.mrb[8].mxu1 %v5959_v9  ;;  %v7158_v9 = vld [vmem:[%s13845_s6 + $0x58] sm:$0xff] }
 0x50a   : > { %10087 = vmatprep.mubr.f32.mxu1 %v5960_v39  ;;  %v6682_v39 = vld [vmem:[#allocation2 + $0x92] sm:$0xff] }
 0x50d   : > { %10088 = vmatmul.mubr.f32.gmra.mrb[10].mxu1 %v5961_v42  ;;  %v10932_v42 = vpack.c.bf16 %v7158_v9, %v7157_v28  ;;  %v14079_v28 = vld [vmem:[#allocation26_spill] sm:$0xff] }
 0x50e   : > { %10090 = vmatprep.mubr.f32.mxu1 %v13475_v63  ;;  %v10888_v63 = vpack.c.bf16 %v6712_v32, %v6711_v40  ;;  %v6685_v40 = vld [vmem:[#allocation2 + $0xb2] sm:$0xff] }
 0x50f   : > { %v7161_v32 = vld [vmem:[%s13845_s6 + $0x70] sm:$0xff] }
 0x511   : > { %10091 = vmatmul.mubr.f32.gmra.mrb[12].mxu1 %v13478_v20  ;;  %v10892_v20 = vpack.c.bf16 %v6714_v49, %v6713_v51  ;;  %v6686_v51 = vld [vmem:[#allocation2 + $0xc2] sm:$0xff] }
 0x512   : > { %10093 = vmatprep.mubr.f32.mxu1 %v5964_v62  ;;  %v6683_v62 = vld [vmem:[#allocation2 + $0x9a] sm:$0xff] }
 0x515   : > { %10094 = vmatmul.mubr.f32.gmra.mrb[14].mxu1 %v11599_v45  ;;  %v6684_v45 = vld [vmem:[#allocation2 + $0xaa] sm:$0xff] }
 0x516   : > { %10128 = vmatprep.mubr.f32.mxu1 %v13481_v38  ;;  %v6715_v38 = vld [vmem:[#allocation5 + $0x440] sm:$0xff] }
 0x519   : > { %10129 = vmatmul.mubr.f32.vlgmr.msra.gmra.mrb[16].mxu1 %v13484_v0  ;;  %v10896_v0 = vpack.c.bf16 %v6716_v29, %v6715_v38  ;;  %v6688_v38 = vld [vmem:[#allocation2 + $0xda] sm:$0xff]  ;;  %v6689_v29 = vld [vmem:[#allocation2 + $0xe2] sm:$0xff] }
 0x51a   : > { %10131 = vmatprep.mubr.f32.mxu1 %v13487_v46  ;;  %10883 = vmatpush3.bf16.msra.mxu1 %v10880_v4  ;;  %v6717_v46 = vld [vmem:[#allocation5 + $0x450] sm:$0xff]  ;;  %v7153_v4 = vld [vmem:[%s13845_s6 + $0x30] sm:$0xff] }
 0x51b   : > { %10885 = vmatprep.subr.bf16.mxu1 %v10884_v58  ;;  %v10924_v26 = vpack.c.bf16 %v7154_v56, %v7153_v4  ;;  %v7138_v4 = vld [vmem:[%s11933_s10 + $0xb8] sm:$0xff]  ;;  %v7139_v56 = vld [vmem:[%s11933_s10 + $0xc0] sm:$0xff] }
 0x51d   : > { %10132 = vmatmul.mubr.f32.gmra.mrb[18].mxu1 %v13490_v54  ;;  %v10900_v54 = vpack.c.bf16 %v6718_v18, %v6717_v46  ;;  %v6691_v46 = vld [vmem:[#allocation2 + $0xfa] sm:$0xff]  ;;  %v6692_v18 = vld [vmem:[#allocation2 + $0x10a] sm:$0xff] }
 0x51e   : > { %10134 = vmatprep.mubr.f32.mxu1 %v13493_v2  ;;  %10887 = vmatpush3.bf16.msra.mxu1 %v10884_v58  ;;  %v6719_v2 = vld [vmem:[#allocation5 + $0x460] sm:$0xff]  ;;  %v10936_v58 = vpack.c.bf16 %v7160_v11, %v7159_v13 }
 0x51f   : > { %10889 = vmatprep.subr.bf16.mxu1 %v10888_v63 }
 0x521   : > { %10135 = vmatmul.mubr.f32.gmra.mrb[20].mxu1 %v13496_v31  ;;  %v10904_v31 = vpack.c.bf16 %v6720_v55, %v6719_v2  ;;  %v6694_v2 = vld [vmem:[#allocation2 + $0x122] sm:$0xff]  ;;  %v6695_v55 = vld [vmem:[#allocation2 + $0x12a] sm:$0xff] }
 0x522   : > { %10137 = vmatprep.mubr.f32.mxu1 %v13499_v6  ;;  %10891 = vmatpush3.bf16.msra.mxu1 %v10888_v63  ;;  %v6721_v6 = vld [vmem:[#allocation5 + $0x470] sm:$0xff]  ;;  %v7162_v63 = vld [vmem:[%s13845_s6 + $0x78] sm:$0xff] }
 0x523   : > { %10893 = vmatprep.subr.bf16.mxu1 %v10892_v20  ;;  %v10940_v49 = vpack.c.bf16 %v7162_v63, %v7161_v32  ;;  %v14083_v32 = vld [vmem:[#allocation31_spill] sm:$0xff] }
 0x525   : > { %10138 = vmatmul.mubr.f32.gmra.mrb[22].mxu1 %v13502_v35  ;;  %v10908_v35 = vpack.c.bf16 %v6722_v60, %v6721_v6  ;;  %v6697_v6 = vld [vmem:[#allocation2 + $0x142] sm:$0xff]  ;;  %v6698_v60 = vld [vmem:[#allocation2 + $0x152] sm:$0xff] }
 0x526   : > { %10140 = vmatprep.mubr.f32.mxu1 %v13505_v52  ;;  %10895 = vmatpush3.bf16.msra.mxu1 %v10892_v20  ;;  %v7147_v52 = vld [vmem:[%s13845_s6] sm:$0xff]  ;;  %v6687_v20 = vld [vmem:[#allocation2 + $0xca] sm:$0xff] }
 0x527   : > { %10897 = vmatprep.subr.bf16.mxu1 %v10896_v0 }
 0x529   : > { %10141 = vmatmul.mubr.f32.gmra.mrb[24].mxu1 %v13508_v3  ;;  %v7148_v3 = vld [vmem:[%s13845_s6 + $0x8] sm:$0xff] }
 0x52a   : > { %10143 = vmatprep.mubr.f32.mxu1 %v13511_v33  ;;  %10899 = vmatpush3.bf16.msra.mxu1 %v10896_v0  ;;  %v10912_v33 = vpack.c.bf16 %v7148_v3, %v7147_v52  ;;  %v6690_v0 = vld [vmem:[#allocation2 + $0xf2] sm:$0xff]  ;;  %v6700_v52 = vld [vmem:[#allocation2 + $0x16a] sm:$0xff] }
 0x52b   : > { %10901 = vmatprep.subr.bf16.mxu1 %v10900_v54  ;;  %v6701_v3 = vld [vmem:[#allocation2 + $0x172] sm:$0xff] }
 0x52d   : > { %10144 = vmatmul.mubr.f32.gmra.mrb[26].mxu1 %v13514_v36  ;;  %v14077_v36 = vld [vmem:[#allocation44_spill] sm:$0xff] }
 0x52e   : > { %10146 = vmatprep.mubr.f32.mxu1 %v13517_v22  ;;  %10903 = vmatpush3.bf16.msra.mxu1 %v10900_v54  ;;  %v14078_v22 = vld [vmem:[#allocation45_spill] sm:$0xff]  ;;  %v6693_v54 = vld [vmem:[#allocation2 + $0x112] sm:$0xff] }
 0x52f   : > { %10905 = vmatprep.subr.bf16.mxu1 %v10904_v31 }
 0x531   : > { %10147 = vmatmul.mubr.f32.gmra.mrb[28].mxu1 %v13520_v14  ;;  %v6326_v14 = vld [vmem:[#allocation2 + $0x139] sm:$0xff] }
 0x532   : > { %10149 = vmatprep.mubr.f32.mxu1 %v13523_v19  ;;  %10907 = vmatpush3.bf16.msra.mxu1 %v10904_v31  ;;  %v6327_v19 = vld [vmem:[#allocation2 + $0x141] sm:$0xff] }
 0x533   : > { %10909 = vmatprep.subr.bf16.mxu1 %v10908_v35  ;;  %v6696_v31 = vld [vmem:[#allocation2 + $0x13a] sm:$0xff] }
 0x535   : > { %10150 = vmatmul.mubr.f32.gmra.mrb[30].mxu1 %v13526_v27  ;;  %v6329_v27 = vld [vmem:[#allocation2 + $0x159] sm:$0xff] }
 0x536   : > { %10152 = vmatprep.mubr.f32.mxu1 %v13529_v5  ;;  %10911 = vmatpush3.bf16.msra.mxu1 %v10908_v35  ;;  %v6330_v5 = vld [vmem:[#allocation2 + $0x169] sm:$0xff]  ;;  %v6699_v35 = vld [vmem:[#allocation2 + $0x15a] sm:$0xff] }
 0x537   : > { %10913 = vmatprep.subr.bf16.mxu1 %v10912_v33 }
 0x539   : > { %10153 = vmatmul.mubr.f32.gmra.mrb[0].mxu1 %v13532_v12  ;;  %v6332_v12 = vld [vmem:[#allocation2 + $0x181] sm:$0xff] }
 0x53a   : > { %10155 = vmatprep.mubr.f32.mxu1 %v13535_v25  ;;  %v6334_v25 = vld [vmem:[#allocation2 + $0x199] sm:$0xff] }
 0x53d   : > { %10156 = vmatmul.mubr.f32.gmra.mrb[2].mxu1 %v13538_v7  ;;  %v6333_v7 = vld [vmem:[#allocation2 + $0x189] sm:$0xff] }
 0x53e   : > { %10158 = vmatprep.mubr.f32.mxu1 %v14077_v36  ;;  %v6705_v36 = vld [vmem:[#allocation2 + $0x1a2] sm:$0xff] }
 0x541   : > { %10159 = vmatmul.mubr.f32.gmra.mrb[4].mxu1 %v14078_v22  ;;  %v7115_v22 = vld [vmem:[%s11933_s10] sm:$0xff] }
 0x542   : > { %10161 = vmatprep.mubr.f32.mxu1 %v6326_v14  ;;  %v7116_v14 = vld [vmem:[%s11933_s10 + $0x8] sm:$0xff] }
 0x545   : > { %10162 = vmatmul.mubr.f32.gmra.mrb[6].mxu1 %v6327_v19  ;;  %v7117_v19 = vld [vmem:[%s11933_s10 + $0x10] sm:$0xff] }
 0x546   : > { %10164 = vmatprep.mubr.f32.mxu1 %v6328_v24  ;;  %v7118_v24 = vld [vmem:[%s11933_s10 + $0x18] sm:$0xff] }
 0x549   : > { %10165 = vmatmul.mubr.f32.gmra.mrb[8].mxu1 %v6329_v27  ;;  %v7121_v27 = vld [vmem:[%s11933_s10 + $0x30] sm:$0xff] }
 0x54a   : > { %10167 = vmatprep.mubr.f32.mxu1 %v6330_v5  ;;  %v7122_v5 = vld [vmem:[%s11933_s10 + $0x38] sm:$0xff] }
 0x54d   : > { %10168 = vmatmul.mubr.f32.gmra.mrb[10].mxu1 %v6331_v48  ;;  %v7123_v48 = vld [vmem:[%s11933_s10 + $0x40] sm:$0xff] }
 0x54e   : > { %10170 = vmatprep.mubr.f32.mxu1 %v6332_v12  ;;  %v7124_v12 = vld [vmem:[%s11933_s10 + $0x48] sm:$0xff] }
 0x551   : > { %10171 = vmatmul.mubr.f32.gmra.mrb[12].mxu1 %v6333_v7  ;;  %v7126_v7 = vld [vmem:[%s11933_s10 + $0x58] sm:$0xff] }
 0x552   : > { %10173 = vmatprep.mubr.f32.mxu1 %v6334_v25  ;;  %v7125_v25 = vld [vmem:[%s11933_s10 + $0x50] sm:$0xff] }
 0x555   : > { %10174 = vmatmul.mubr.f32.gmra.mrb[14].mxu1 %v6335_v53  ;;  %v7127_v53 = vld [vmem:[%s11933_s10 + $0x60] sm:$0xff] }
 0x556   : > { %10208 = vmatprep.mubr.f32.mxu1 %v6674_v8  ;;  %v7130_v8 = vld [vmem:[%s11933_s10 + $0x78] sm:$0xff] }
 0x559   : > { %10209 = vmatmul.mubr.f32.vlgmr.msra.gmra.mrb[16].mxu1 %v6675_v41  ;;  %v7132_v41 = vld [vmem:[%s11933_s10 + $0x88] sm:$0xff] }
 0x55a   : > { %10211 = vmatprep.mubr.f32.mxu1 %v6676_v61  ;;  %10915 = vmatpush3.bf16.msra.mxu1 %v10912_v33  ;;  %v6704_v33 = vld [vmem:[#allocation2 + $0x19a] sm:$0xff]  ;;  %v7135_v61 = vld [vmem:[%s11933_s10 + $0xa0] sm:$0xff] }
 0x55b   : > { %10917 = vmatprep.subr.bf16.mxu1 %v10916_v1 }
 0x55d   : > { %10212 = vmatmul.mubr.f32.gmra.mrb[18].mxu1 %v6677_v50  ;;  %v7137_v50 = vld [vmem:[%s11933_s10 + $0xb0] sm:$0xff] }
 0x55e   : > { %10214 = vmatprep.mubr.f32.mxu1 %v6678_v37  ;;  %10919 = vmatpush3.bf16.msra.mxu1 %v10916_v1  ;;  %v7131_v1 = vld [vmem:[%s11933_s10 + $0x80] sm:$0xff]  ;;  %v7140_v37 = vld [vmem:[%s11933_s10 + $0xc8] sm:$0xff] }
 0x55f   : > { %10921 = vmatprep.subr.bf16.mxu1 %v10920_v59 }
 0x561   : > { %10215 = vmatmul.mubr.f32.gmra.mrb[20].mxu1 %v6679_v47  ;;  %v7142_v47 = vld [vmem:[%s11933_s10 + $0xd8] sm:$0xff] }
 0x562   : > { %10217 = vmatprep.mubr.f32.mxu1 %v6680_v16  ;;  %10923 = vmatpush3.bf16.msra.mxu1 %v10920_v59  ;;  %v7136_v59 = vld [vmem:[%s11933_s10 + $0xa8] sm:$0xff]  ;;  %v7145_v16 = vld [vmem:[%s11933_s10 + $0xf0] sm:$0xff] }
 0x563   : > { %10925 = vmatprep.subr.bf16.mxu1 %v10924_v26 }
 0x565   : > { %10218 = vmatmul.mubr.f32.gmra.mrb[22].mxu1 %v6681_v21  ;;  %v13702_v21 = vld [vmem:[%s13843_s4] ss:$0 sm:$0xff] }
 0x566   : > { %10220 = vmatprep.mubr.f32.mxu1 %v6682_v39  ;;  %10927 = vmatpush3.bf16.msra.mxu1 %v10924_v26  ;;  %v7141_v26 = vld [vmem:[%s11933_s10 + $0xd0] sm:$0xff]  ;;  %v10960_v9 = vadd.f32 %v14079_v28, %v13702_v21  ;;  %v14080_v39 = vld [vmem:[#allocation27_spill] sm:$0xff]  ;;  %v10966_v63 = vadd.f32 %v13702_v21, %v14083_v32 }
 0x567   : > { %10929 = vmatprep.subr.bf16.mxu1 %v10928_v34 }
 0x569   : > { %10221 = vmatmul.mubr.f32.gmra.mrb[24].mxu1 %v6683_v62 }
 0x56a   : > { %10223 = vmatprep.mubr.f32.mxu1 %v6684_v45  ;;  %10931 = vmatpush3.bf16.msra.mxu1 %v10928_v34  ;;  %v7146_v34 = vld [vmem:[%s11933_s10 + $0xf8] sm:$0xff] }
 0x56b   : > { %10933 = vmatprep.subr.bf16.mxu1 %v10932_v42 }
 0x56d   : > { %10224 = vmatmul.mubr.f32.gmra.mrb[26].mxu1 %v6685_v40 }
 0x56e   : > { %10226 = vmatprep.mubr.f32.mxu1 %v6686_v51  ;;  %10935 = vmatpush3.bf16.msra.mxu1 %v10932_v42  ;;  %v10962_v42 = vadd.f32 %v13702_v21, %v14080_v39 }
 0x56f   : > { %10937 = vmatprep.subr.bf16.mxu1 %v10936_v58 }
 0x571   : > { %10227 = vmatmul.mubr.f32.gmra.mrb[28].mxu1 %v6687_v20 }
 0x572   : > { %10229 = vmatprep.mubr.f32.mxu1 %v6688_v38  ;;  %10939 = vmatpush3.bf16.msra.mxu1 %v10936_v58  ;;  %v14081_v58 = vld [vmem:[#allocation30_spill] sm:$0xff] }
 0x573   : > { %10941 = vmatprep.subr.bf16.mxu1 %v10940_v49  ;;  %v10964_v40 = vadd.f32 %v14081_v58, %v13702_v21 }
 0x575   : > { %10230 = vmatmul.mubr.f32.gmra.mrb[30].mxu1 %v6689_v29  ;;  %v14084_v29 = vld [vmem:[#allocation32_spill] sm:$0xff] }
 0x576   : > { %10232 = vmatprep.mubr.f32.mxu1 %v6690_v0  ;;  %10943 = vmatpush3.bf16.msra.mxu1 %v10940_v49  ;;  %v10968_v0 = vadd.f32 %v14084_v29, %v13702_v21 }
 0x579   : > { %10233 = vmatmul.mubr.f32.gmra.mrb[0].mxu1 %v6691_v46  ;;  %v14085_v46 = vld [vmem:[#allocation33_spill] sm:$0xff] }
 0x57a   : > { %10235 = vmatprep.mubr.f32.mxu1 %v6692_v18  ;;  %v10970_v18 = vadd.f32 %v13702_v21, %v14085_v46 }
 0x57d   : > { %10236 = vmatmul.mubr.f32.gmra.mrb[2].mxu1 %v6693_v54 }
 0x57e   : > { %10238 = vmatprep.mubr.f32.mxu1 %v6694_v2 }
 0x581   : > { %10239 = vmatmul.mubr.f32.gmra.mrb[4].mxu1 %v6695_v55 }
 0x582   : > { %10241 = vmatprep.mubr.f32.mxu1 %v6696_v31 }
 0x585   : > { %10242 = vmatmul.mubr.f32.gmra.mrb[6].mxu1 %v6697_v6  ;;  %v14086_v6 = vld [vmem:[#allocation34_spill] sm:$0xff] }
 0x586   : > { %10244 = vmatprep.mubr.f32.mxu1 %v6698_v60  ;;  %v10972_v60 = vadd.f32 %v14086_v6, %v13702_v21 }
 0x589   : > { %10245 = vmatmul.mubr.f32.gmra.mrb[8].mxu1 %v6699_v35  ;;  %v14087_v35 = vld [vmem:[#allocation35_spill] sm:$0xff] }
 0x58a   : > { %10247 = vmatprep.mubr.f32.mxu1 %v6700_v52  ;;  %v10974_v52 = vadd.f32 %v13702_v21, %v14087_v35 }
 0x58d   : > { %10248 = vmatmul.mubr.f32.gmra.mrb[10].mxu1 %v6701_v3 }
 0x58e   : > { %10250 = vmatprep.mubr.f32.mxu1 %v13587_v15  ;;  %v7119_v15 = vld [vmem:[%s11933_s10 + $0x20] sm:$0xff] }
 0x591   : > { %10251 = vmatmul.mubr.f32.gmra.mrb[12].mxu1 %v13590_v57  ;;  %v7120_v57 = vld [vmem:[%s11933_s10 + $0x28] sm:$0xff]  ;;  %s14082_s10 = sshll.u32 %s11927_s22, 8 }
 0x592   : > { %10253 = vmatprep.mubr.f32.mxu1 %v6704_v33  ;;  %s13712_s15 = scalar_lea.vmem [#allocation10], %s14082_s10 }
 0x593   : > { %s7466_s30 = sshll.u32 %s13712_s15, 4  ;;  %s13792_s30 = int_to_ptr.vmem [resolvable:$true] %s7466_s30 }
 0x594   : > { %s11658_s9 = scalar_lea.vmem %s13792_s30, 4096  ;;  %p11665_p13 = scmp.lt.s32.totalorder %s13792_s30, %s11663_s17 }
 0x595   : > { %10254 = vmatmul.mubr.f32.gmra.mrb[14].mxu1 %v6705_v36  ;;  %p11659_p6 = scmp.ne.s32.totalorder %s13792_s30, %s11658_s9  ;;  %p11666_p3 = scmp.lt.s32.totalorder %s11664_s12, %s11658_s9 }
 0x596   : > { %10288 = vmatprep.mubr.f32.mxu1 %v7115_v22 }
 0x597   : > { %p11660_p8 = pnand %p11659_p6, %p11872_p12  ;;  %p11667_p7 = por %p11666_p3, %p11665_p13 }
 0x599   : > { %10289 = vmatmul.mubr.f32.vlgmr.msra.gmra.mrb[16].mxu1 %v7116_v14  ;;  %v14088_v14 = vld [vmem:[#allocation36_spill] sm:$0xff]  ;;  %p11661_p10 = pneg %p11660_p8 }
 0x59a   : > { %10291 = vmatprep.mubr.f32.mxu1 %v7117_v19  ;;  %v10976_v19 = vadd.f32 %v14088_v14, %v13702_v21 }
 0x59b   : > { %p11668_p9 = pnand %p11667_p7, %p11661_p10 }
 0x59d   : > { %10292 = vmatmul.mubr.f32.gmra.mrb[18].mxu1 %v7118_v24  ;;  %v14089_v24 = vld [vmem:[#allocation37_spill] sm:$0xff] }
 0x59e   : > { %10294 = vmatprep.mubr.f32.mxu1 %v7119_v15  ;;  %v10978_v15 = vadd.f32 %v13702_v21, %v14089_v24 }
 0x5a1   : > { %10295 = vmatmul.mubr.f32.gmra.mrb[20].mxu1 %v7120_v57 }
 0x5a2   : > { %10297 = vmatprep.mubr.f32.mxu1 %v7121_v27 }
 0x5a5   : > { %10298 = vmatmul.mubr.f32.gmra.mrb[22].mxu1 %v7122_v5 }
 0x5a6   : > { %10300 = vmatprep.mubr.f32.mxu1 %v7123_v48 }
 0x5a9   : > { %10301 = vmatmul.mubr.f32.gmra.mrb[24].mxu1 %v7124_v12  ;;  %v14090_v12 = vld [vmem:[#allocation38_spill] sm:$0xff] }
 0x5aa   : > { %10303 = vmatprep.mubr.f32.mxu1 %v7125_v25  ;;  %v10980_v25 = vadd.f32 %v14090_v12, %v13702_v21 }
 0x5ad   : > { %10304 = vmatmul.mubr.f32.gmra.mrb[26].mxu1 %v7126_v7  ;;  %v14091_v7 = vld [vmem:[#allocation39_spill] sm:$0xff] }
 0x5ae   : > { %10306 = vmatprep.mubr.f32.mxu1 %v7127_v53  ;;  %v10982_v53 = vadd.f32 %v13702_v21, %v14091_v7 }
 0x5b1   : > { %10307 = vmatmul.mubr.f32.gmra.mrb[28].mxu1 %v7128_v23 }
 0x5b2   : > { %10309 = vmatprep.mubr.f32.mxu1 %v7129_v44 }
 0x5b5   : > { %10310 = vmatmul.mubr.f32.gmra.mrb[30].mxu1 %v7130_v8 }
 0x5b6   : > { %10312 = vmatprep.mubr.f32.mxu1 %v7131_v1 }
 0x5b9   : > { %10313 = vmatmul.mubr.f32.gmra.mrb[0].mxu1 %v7132_v41  ;;  %v14092_v41 = vld [vmem:[#allocation40_spill] sm:$0xff] }
 0x5ba   : > { %10315 = vmatprep.mubr.f32.mxu1 %v7133_v10  ;;  %v10984_v10 = vadd.f32 %v14092_v41, %v13702_v21 }
 0x5bd   : > { %10316 = vmatmul.mubr.f32.gmra.mrb[2].mxu1 %v7134_v30  ;;  %v14093_v30 = vld [vmem:[#allocation41_spill] sm:$0xff] }
 0x5be   : > { %10318 = vmatprep.mubr.f32.mxu1 %v7135_v61  ;;  %v10986_v61 = vadd.f32 %v13702_v21, %v14093_v30 }
 0x5c1   : > { %10319 = vmatmul.mubr.f32.gmra.mrb[4].mxu1 %v7136_v59 }
 0x5c2   : > { %10321 = vmatprep.mubr.f32.mxu1 %v7137_v50 }
 0x5c5   : > { %10322 = vmatmul.mubr.f32.gmra.mrb[6].mxu1 %v7138_v4 }
 0x5c6   : > { %10324 = vmatprep.mubr.f32.mxu1 %v7139_v56 }
 0x5c9   : > { %10325 = vmatmul.mubr.f32.gmra.mrb[8].mxu1 %v7140_v37  ;;  %v14094_v37 = vld [vmem:[#allocation42_spill] sm:$0xff] }
 0x5ca   : > { %10327 = vmatprep.mubr.f32.mxu1 %v7141_v26  ;;  %v10988_v26 = vadd.f32 %v14094_v37, %v13702_v21 }
 0x5cd   : > { %10328 = vmatmul.mubr.f32.gmra.mrb[10].mxu1 %v7142_v47  ;;  %v14095_v47 = vld [vmem:[#allocation43_spill] sm:$0xff] }
 0x5ce   : > { %10330 = vmatprep.mubr.f32.mxu1 %v7143_v17  ;;  %v10990_v17 = vadd.f32 %v13702_v21, %v14095_v47 }
 0x5d1   : > { %10331 = vmatmul.mubr.f32.gmra.mrb[12].mxu1 %v7144_v43 }
 0x5d2   : > { %10333 = vmatprep.mubr.f32.mxu1 %v7145_v16 }
 0x5d5   : > { %10334 = vmatmul.mubr.f32.gmra.mrb[14].mxu1 %v7146_v34 }
 0x66c   : > { %v10290_v62 = vpop.f32.mrb[16].mxu1 }
 0x66d   : > { %v10961_v13 = vadd.f32 %v10960_v9, %v10290_v62  ;;  %v7229_v11 = vpop.f32.mrb[17].mxu1 }
 0x66e   : > { %v10963_v45 = vadd.f32 %v10962_v42, %v7229_v11 }
 0x66f   : > { %7421 = vst [vmem:[%s13712_s15 + $0x8] sm:$0xff] %v10961_v13 }
 0x670   : > { %7420 = vst [vmem:[%s13712_s15] sm:$0xff] %v10963_v45  ;;  %v10293_v51 = vpop.f32.mrb[18].mxu1 }
 0x671   : > { %v10965_v49 = vadd.f32 %v10964_v40, %v10293_v51  ;;  %v7239_v20 = vpop.f32.mrb[19].mxu1 }
 0x672   : > { %v10967_v38 = vadd.f32 %v10966_v63, %v7239_v20 }
 0x673   : > { %7423 = vst [vmem:[%s13712_s15 + $0x18] sm:$0xff] %v10965_v49 }
 0x674   : > { %7422 = vst [vmem:[%s13712_s15 + $0x10] sm:$0xff] %v10967_v38  ;;  %v10296_v54 = vpop.f32.mrb[20].mxu1 }
 0x675   : > { %v10969_v2 = vadd.f32 %v10968_v0, %v10296_v54  ;;  %v7249_v55 = vpop.f32.mrb[21].mxu1 }
 0x676   : > { %v10971_v31 = vadd.f32 %v10970_v18, %v7249_v55 }
 0x677   : > { %7425 = vst [vmem:[%s13712_s15 + $0x28] sm:$0xff] %v10969_v2 }
 0x678   : > { %7424 = vst [vmem:[%s13712_s15 + $0x20] sm:$0xff] %v10971_v31  ;;  %v10299_v3 = vpop.f32.mrb[22].mxu1 }
 0x679   : > { %v10973_v33 = vadd.f32 %v10972_v60, %v10299_v3  ;;  %v7259_v36 = vpop.f32.mrb[23].mxu1 }
 0x67a   : > { %v10975_v22 = vadd.f32 %v10974_v52, %v7259_v36 }
 0x67b   : > { %7427 = vst [vmem:[%s13712_s15 + $0x38] sm:$0xff] %v10973_v33 }
 0x67c   : > { %7426 = vst [vmem:[%s13712_s15 + $0x30] sm:$0xff] %v10975_v22  ;;  %v10302_v57 = vpop.f32.mrb[24].mxu1 }
 0x67d   : > { %v10977_v27 = vadd.f32 %v10976_v19, %v10302_v57  ;;  %v7269_v5 = vpop.f32.mrb[25].mxu1 }
 0x67e   : > { %v10979_v48 = vadd.f32 %v10978_v15, %v7269_v5 }
 0x67f   : > { %7429 = vst [vmem:[%s13712_s15 + $0x48] sm:$0xff] %v10977_v27 }
 0x680   : > { %7428 = vst [vmem:[%s13712_s15 + $0x40] sm:$0xff] %v10979_v48  ;;  %v10305_v23 = vpop.f32.mrb[26].mxu1 }
 0x681   : > { %v10981_v44 = vadd.f32 %v10980_v25, %v10305_v23  ;;  %v7279_v8 = vpop.f32.mrb[27].mxu1 }
 0x682   : > { %v10983_v1 = vadd.f32 %v10982_v53, %v7279_v8 }
 0x683   : > { %7431 = vst [vmem:[%s13712_s15 + $0x58] sm:$0xff] %v10981_v44 }
 0x684   : > { %7430 = vst [vmem:[%s13712_s15 + $0x50] sm:$0xff] %v10983_v1  ;;  %v10308_v59 = vpop.f32.mrb[28].mxu1 }
 0x685   : > { %v10985_v50 = vadd.f32 %v10984_v10, %v10308_v59  ;;  %v7289_v4 = vpop.f32.mrb[29].mxu1 }
 0x686   : > { %v10987_v56 = vadd.f32 %v10986_v61, %v7289_v4 }
 0x687   : > { %7433 = vst [vmem:[%s13712_s15 + $0x68] sm:$0xff] %v10985_v50 }
 0x688   : > { %7432 = vst [vmem:[%s13712_s15 + $0x60] sm:$0xff] %v10987_v56  ;;  %v10311_v43 = vpop.f32.mrb[30].mxu1 }
 0x689   : > { %v10989_v16 = vadd.f32 %v10988_v26, %v10311_v43  ;;  %v7299_v34 = vpop.f32.mrb[31].mxu1 }
 0x68a   : > { %v10991_v28 = vadd.f32 %v10990_v17, %v7299_v34 }
 0x68b   : > { %7435 = vst [vmem:[%s13712_s15 + $0x78] sm:$0xff] %v10989_v16 }
 0x68c   : > { %7434 = vst [vmem:[%s13712_s15 + $0x70] sm:$0xff] %v10991_v28  ;;  %v10314_v9 = vpop.f32.mrb[0].mxu1 }
 0x68d   : > { %v10992_v39 = vadd.f32 %v10314_v9, %v13702_v21  ;;  %v7309_v42 = vpop.f32.mrb[1].mxu1 }
 0x68e   : > { %v10993_v62 = vadd.f32 %v13702_v21, %v7309_v42 }
 0x68f   : > { %7437 = vst [vmem:[%s13712_s15 + $0x88] sm:$0xff] %v10992_v39 }
 0x690   : > { %7436 = vst [vmem:[%s13712_s15 + $0x80] sm:$0xff] %v10993_v62  ;;  %v10317_v13 = vpop.f32.mrb[2].mxu1 }
 0x691   : > { %v10994_v11 = vadd.f32 %v10317_v13, %v13702_v21  ;;  %v7319_v45 = vpop.f32.mrb[3].mxu1 }
 0x692   : > { %v10995_v58 = vadd.f32 %v13702_v21, %v7319_v45 }
 0x693   : > { %7439 = vst [vmem:[%s13712_s15 + $0x98] sm:$0xff] %v10994_v11 }
 0x694   : > { %7438 = vst [vmem:[%s13712_s15 + $0x90] sm:$0xff] %v10995_v58  ;;  %v10320_v40 = vpop.f32.mrb[4].mxu1 }
 0x695   : > { %v10996_v32 = vadd.f32 %v10320_v40, %v13702_v21  ;;  %v7329_v63 = vpop.f32.mrb[5].mxu1 }
 0x696   : > { %v10997_v51 = vadd.f32 %v13702_v21, %v7329_v63 }
 0x697   : > { %7441 = vst [vmem:[%s13712_s15 + $0xa8] sm:$0xff] %v10996_v32 }
 0x698   : > { %7440 = vst [vmem:[%s13712_s15 + $0xa0] sm:$0xff] %v10997_v51  ;;  %v10323_v49 = vpop.f32.mrb[6].mxu1 }
 0x699   : > { %v10998_v20 = vadd.f32 %v10323_v49, %v13702_v21  ;;  %v7339_v38 = vpop.f32.mrb[7].mxu1 }
 0x69a   : > { %v10999_v29 = vadd.f32 %v13702_v21, %v7339_v38 }
 0x69b   : > { %7443 = vst [vmem:[%s13712_s15 + $0xb8] sm:$0xff] %v10998_v20 }
 0x69c   : > { %7442 = vst [vmem:[%s13712_s15 + $0xb0] sm:$0xff] %v10999_v29  ;;  %v10326_v0 = vpop.f32.mrb[8].mxu1 }
 0x69d   : > { %v11000_v46 = vadd.f32 %v10326_v0, %v13702_v21  ;;  %v7349_v18 = vpop.f32.mrb[9].mxu1 }
 0x69e   : > { %v11001_v54 = vadd.f32 %v13702_v21, %v7349_v18 }
 0x69f   : > { %7445 = vst [vmem:[%s13712_s15 + $0xc8] sm:$0xff] %v11000_v46 }
 0x6a0   : > { %7444 = vst [vmem:[%s13712_s15 + $0xc0] sm:$0xff] %v11001_v54  ;;  %v10329_v2 = vpop.f32.mrb[10].mxu1 }
 0x6a1   : > { %v11002_v55 = vadd.f32 %v10329_v2, %v13702_v21  ;;  %v7359_v31 = vpop.f32.mrb[11].mxu1 }
 0x6a2   : > { %v11003_v6 = vadd.f32 %v13702_v21, %v7359_v31 }
 0x6a3   : > { %7447 = vst [vmem:[%s13712_s15 + $0xd8] sm:$0xff] %v11002_v55 }
 0x6a4   : > { %7446 = vst [vmem:[%s13712_s15 + $0xd0] sm:$0xff] %v11003_v6  ;;  %v10332_v60 = vpop.f32.mrb[12].mxu1 }
 0x6a5   : > { %v11004_v35 = vadd.f32 %v10332_v60, %v13702_v21  ;;  %v7369_v52 = vpop.f32.mrb[13].mxu1 }
 0x6a6   : > { %v11005_v3 = vadd.f32 %v13702_v21, %v7369_v52 }
 0x6a7   : > { %7449 = vst [vmem:[%s13712_s15 + $0xe8] sm:$0xff] %v11004_v35 }
 0x6a8   : > { %7448 = vst [vmem:[%s13712_s15 + $0xe0] sm:$0xff] %v11005_v3  ;;  %v10335_v33 = vpop.f32.mrb[14].mxu1 }
 0x6a9   : > { %v11006_v36 = vadd.f32 %v10335_v33, %v13702_v21  ;;  %v7379_v22 = vpop.f32.mrb[15].mxu1 }
 0x6aa   : > { %v11007_v14 = vadd.f32 %v13702_v21, %v7379_v22 }
 0x6ab   : > { %7451 = vst [vmem:[%s13712_s15 + $0xf8] sm:$0xff] %v11006_v36 }
 0x6ac   : > { %7450 = vst [vmem:[%s13712_s15 + $0xf0] sm:$0xff] %v11007_v14 }
 0x6ad   : > { %11671 = shalt.err (!%p11668_p9)
}
 0x6ae   : > { %s11672_s20 = scalar_lea.hbm %s13790_s11, 4096  ;;  %s11676_s15 = scalar_lea.hbm %s13846_s7, 8192 }
 0x6af   : > { %p11673_p1 = scmp.ne.s32.totalorder %s13790_s11, %s11672_s20  ;;  %p11677_p2 = scmp.lt.u32.totalorder %s13790_s11, %s13846_s7 }
 0x6b0   : > { %p11678_p11 = scmp.lt.u32.totalorder %s11676_s15, %s11672_s20  ;;  %p11680_p6 = scmp.lt.u32.totalorder %s11672_s20, %s13790_s11 }
 0x6b1   : > { %p11674_p0 = pnand %p11673_p1, %p11872_p12 }
 0x6b2   : > { %p11679_p4 = por %p11678_p11, %p11677_p2 }
 0x6b3   : > { %p11675_p5 = pneg %p11674_p0 }
 0x6b4   : > { %p11681_p8 = por %p11680_p6, %p11679_p4 }
 0x6b6   : > { %p11682_p10 = pnand %p11681_p8, %p11675_p5 }
 0x6b8   : > { %11685 = shalt.err (!%p11682_p10)
}
 0x6b9   : > { %s11736_s16 = smov 128   ;;  %s11737_s9 = smov 8  }
 0x6ba   : > { %11543 = dma.vmem_to_hbm [thread:$0]  (%p11872_p12), %s13792_s30, 4096, %s13790_s11, %s7453_s28, %s11736_s16, %s11736_s16, %s11737_s9  }
 0x6bb PF: > { %s7481_s14 = sand.u32 1, %s11716_s24   ;;  %p14096_p13 = scmp.ne.s32.totalorder %s13928_s8, 0 }
 0x6bc   : > { %p14097_p3 = scmp.ge.s32.totalorder %s11728_s27, 2  ;;  %s7482_s17 = scalar_lea.sflag [#allocation7], %s7481_s14 }
 0x6be   : > { %p11554_p7 = pnand %p14097_p3, %p14096_p13 }
 0x6c0   : > { %11711 = dma.done.wait (!%p11554_p7), %s7482_s17, 4096  }
 0x6c1   : > { %11713 = vsyncadd (!%p11554_p7), %s7482_s17, 4294963200  ;;  %p21_p9 = scmp.ge.s32.totalorder %s11834_s13, 4   ;;  %s14098_s24 = smov %s11720_s25 }
 0x6c2   : > { %s14099_s25 = smov %s11724_s26  ;;  %s14100_s26 = smov %s11868_s18 }
 0x6c3   : > { %s14101_s27 = smov %s11834_s13  ;;  %23 = sbr.rel (!%p21_p9) target bundleno = 6 (0x6), region = 122 }
 0x6ca   :  { %7487 = vsyncpa [#allocation6], 1 }
 0x6cb   :  { %7489 = vsyncpa [#allocation6 + $0x1], 1 }
 0x6cc   :  { %7490 = vsyncpa [#allocation9], 1 }
 0x6cd   :  { %7492 = vsyncpa [#allocation9 + $0x1], 1 }
 0x6ce   :  { %7493 = vsyncpa [#allocation7], 1 }
 0x6cf   :  { %7495 = vsyncpa [#allocation7 + $0x1], 1 }

</bundles_post_ra>
